<compile_context>
chip_gen: v7x
topology: tpu7x:2x2x1
jax: 0.10.0
libtpu: 0.0.40
codegen_flags: <defaults>
</compile_context>

<pallas_src>
from functools import partial

import jax
import jax.numpy as jnp
from jax import lax
from jax.experimental import pallas as pl
from jax.experimental.pallas import tpu as pltpu


# ------------------------------------------------------------------ utilities
def _make_divisible(v, divisor=8, min_value=None):
    if min_value is None:
        min_value = divisor
    new_v = max(min_value, int(v + divisor / 2) // divisor * divisor)
    if new_v < 0.9 * v:
        new_v += divisor
    return new_v


def _fold_bn(gamma, beta, mean, var, eps=1e-5):
    scale = gamma / jnp.sqrt(var + eps)
    bias = beta - mean * scale
    c = scale.shape[0]
    return scale.reshape(1, c), bias.reshape(1, c)


# ------------------------------------------------------------------ fused kernel
def _mbconv_fused_kernel(meta, *refs):
    """One grid step == one batch image, everything in lane-dense (rows, W*C) layout."""
    (K, stride, has_expand, use_res, H, W, C_in, C_exp, C_out,
     H_out, W_out, P, row0, lane0) = meta
    f32 = jnp.float32
    Wc = W * C_exp                              # lane width of the stride-1 activation

    it = iter(refs)
    x_ref = next(it)                            # (1, H, W*C_in)
    if has_expand:
        bd_exp_ref = next(it)                   # (W*C_in, W*C_exp) block-diag, BN folded
        b_exp_ref = next(it)                    # (1, W*C_exp)
    w_dw_ref = next(it)                         # (K*K, W*C_exp) per-tap weights, W-tiled
    s_dw_ref = next(it)                         # (1, W_out*C_exp)
    b_dw_ref = next(it)                         # (1, W_out*C_exp)
    if stride > 1:
        sel_h_ref = next(it)                    # (H_out, H)            0/1 row selector
        sel_w_ref = next(it)                    # (W*C_exp, W_out*C_exp) 0/1 col selector
    fold_ref = next(it)                         # (W_out*C_exp, C_exp)  SE pooling fold
    tile_ref = next(it)                         # (C_exp, W_out*C_exp)  SE gate broadcast
    w_se1_ref = next(it)
    b_se1_ref = next(it)
    w_se2_ref = next(it)
    b_se2_ref = next(it)
    bd_pr_ref = next(it)                        # (W_out*C_exp, W_out*C_out) block-diag
    b_pr_ref = next(it)                         # (1, W_out*C_out)
    o_ref = next(it)                            # (1, H_out, W_out*C_out)
    epad_ref = next(it)                         # VMEM scratch: zero-padded activation

    x2 = x_ref[0].astype(f32)                                   # (H, W*C_in)

    # ---- expand 1x1 conv (+ folded BN) + SiLU -------------------------------
    if has_expand:
        e = jnp.dot(x2, bd_exp_ref[...], preferred_element_type=f32) + b_exp_ref[...]
        e = e * jax.nn.sigmoid(e)                               # SiLU -> (H, W*C_exp)
    else:
        e = x2                                                  # C_exp == C_in

    # ---- depthwise KxK conv: MAC over K*K shifted windows of the padded
    #      activation held in VMEM (no HBM intermediates) ---------------------
    epad_ref[...] = jnp.zeros_like(epad_ref)                    # zero padding ring
    epad_ref[pl.ds(row0, H), pl.ds(lane0, Wc)] = e              # aligned center store

    acc = jnp.zeros((H, Wc), f32)
    for kh in range(K):
        for kw in range(K):
            t = kh * K + kw
            win = epad_ref[pl.ds(row0 - P + kh, H),
                           pl.ds(lane0 - P * C_exp + kw * C_exp, Wc)]
            acc = acc + win * w_dw_ref[pl.ds(t, 1), :]

    # ---- stride subsampling (0/1 selection matmuls keep the layout lane-dense)
    if stride > 1:
        acc = jnp.dot(acc, sel_w_ref[...], preferred_element_type=f32)
        acc = jnp.dot(sel_h_ref[...], acc, preferred_element_type=f32)

    # ---- depthwise folded BN + SiLU ----------------------------------------
    d = acc * s_dw_ref[...] + b_dw_ref[...]
    d = d * jax.nn.sigmoid(d)                                   # (H_out, W_out*C_exp)

    # ---- squeeze & excitation ----------------------------------------------
    colsum = jnp.sum(d, axis=0, keepdims=True)                  # (1, W_out*C_exp)
    pooled = jnp.dot(colsum, fold_ref[...],
                     preferred_element_type=f32) * (1.0 / (H_out * W_out))    # (1, C_exp)
    h1 = jnp.dot(pooled, w_se1_ref[...], preferred_element_type=f32) + b_se1_ref[...]
    h1 = h1 * jax.nn.sigmoid(h1)                                # SiLU
    g = jax.nn.sigmoid(jnp.dot(h1, w_se2_ref[...],
                               preferred_element_type=f32) + b_se2_ref[...])  # (1, C_exp)
    g_t = jnp.dot(g, tile_ref[...], preferred_element_type=f32)               # (1, W_out*C_exp)

    # ---- 1x1 projection (+ folded BN) and residual --------------------------
    p = jnp.dot(d * g_t, bd_pr_ref[...], preferred_element_type=f32) + b_pr_ref[...]
    if use_res:
        p = p + x2                                              # same lane-dense layout
    o_ref[0] = p.astype(o_ref.dtype)                            # lane-dense store


# ------------------------------------------------------------------ wrapper
def mbconv_forward(x_nchw, params, cfg):
    """torchvision MBConv forward (inference) as one fused Pallas TPU kernel."""
    K, stride = cfg["K"], cfg["stride"]
    P = (K - 1) // 2
    N, C_in, H, W = x_nchw.shape
    has_expand = "w_exp" in params
    C_exp = params["w_exp"].shape[1] if has_expand else C_in
    C_out = params["w_pr"].shape[1]
    H_out = (H + 2 * P - K) // stride + 1
    W_out = (W + 2 * P - K) // stride + 1
    use_res = (stride == 1) and (C_in == C_out)

    f32 = jnp.float32
    # NCHW -> lane-dense NHWC: last dim = W*C so the 128-wide lanes are fully used.
    x2 = jnp.transpose(x_nchw, (0, 2, 3, 1)).reshape(N, H, W * C_in).astype(f32)

    # ---- wrapper-side layout plumbing (small constants, built once) ----------
    eye_c = jnp.eye(C_exp, dtype=f32)
    w_dw_t = jnp.tile(params["w_dw"].reshape(K * K, C_exp).astype(f32), (1, W))
    s_dw_t = jnp.tile(params["s_dw"].astype(f32), (1, W_out))
    b_dw_t = jnp.tile(params["b_dw"].astype(f32), (1, W_out))
    fold = jnp.tile(eye_c, (W_out, 1))                            # (W_out*C_exp, C_exp)
    tile = jnp.tile(eye_c, (1, W_out))                            # (C_exp, W_out*C_exp)
    bd_pr = jnp.kron(jnp.eye(W_out, dtype=f32),
                     (params["w_pr"] * params["s_pr"]).astype(f32))
    b_pr_t = jnp.tile(params["b_pr"].astype(f32), (1, W_out))

    # Place the padded activation so its center store is (8,128)-aligned in VMEM.
    row0 = ((P + 7) // 8) * 8
    lane0 = ((P * C_exp + 127) // 128) * 128

    args = [x2]
    in_specs = [pl.BlockSpec((1, H, W * C_in), lambda b: (b, 0, 0))]

    def add_const(a):
        a = jnp.asarray(a, f32)
        assert a.ndim == 2
        args.append(a)
        in_specs.append(pl.BlockSpec(a.shape, lambda b: (0, 0)))

    if has_expand:
        add_const(jnp.kron(jnp.eye(W, dtype=f32),
                           (params["w_exp"] * params["s_exp"]).astype(f32)))  # bd_exp
        add_const(jnp.tile(params["b_exp"].astype(f32), (1, W)))              # b_exp tiled
    add_const(w_dw_t)
    add_const(s_dw_t)
    add_const(b_dw_t)
    if stride > 1:
        sel_h = (jnp.arange(H_out)[:, None] * stride
                 == jnp.arange(H)[None, :]).astype(f32)
        sel_w = jnp.kron((jnp.arange(W)[:, None]
                          == jnp.arange(W_out)[None, :] * stride).astype(f32), eye_c)
        add_const(sel_h)
        add_const(sel_w)
    add_const(fold)
    add_const(tile)
    add_const(params["w_se1"])
    add_const(params["b_se1"])
    add_const(params["w_se2"])
    add_const(params["b_se2"])
    add_const(bd_pr)
    add_const(b_pr_t)

    meta = (K, stride, has_expand, use_res, H, W, C_in, C_exp, C_out,
            H_out, W_out, P, row0, lane0)

    out2 = pl.pallas_call(
        partial(_mbconv_fused_kernel, meta),
        out_shape=jax.ShapeDtypeStruct((N, H_out, W_out * C_out), f32),
        grid=(N,),
        in_specs=in_specs,
        out_specs=pl.BlockSpec((1, H_out, W_out * C_out), lambda b: (b, 0, 0)),
        scratch_shapes=[pltpu.VMEM((row0 + H + P, lane0 + (W + P) * C_exp), f32)],
        compiler_params=pltpu.CompilerParams(dimension_semantics=("parallel",)),
    )(*args)

    out = out2.reshape(N, H_out, W_out, C_out)
    return jnp.transpose(out, (0, 3, 1, 2))                       # NHWC -> NCHW


# ------------------------------------------------------------------ pure-JAX reference
def mbconv_ref(x_nchw, params, cfg):
    K, stride = cfg["K"], cfg["stride"]
    P = (K - 1) // 2
    x = jnp.transpose(x_nchw, (0, 2, 3, 1)).astype(jnp.float32)
    dn = ("NHWC", "HWIO", "NHWC")
    C_in = x.shape[-1]
    C_out = params["w_pr"].shape[1]
    silu = lambda t: t * jax.nn.sigmoid(t)

    if "w_exp" in params:
        C_exp = params["w_exp"].shape[1]
        e = lax.conv_general_dilated(x, params["w_exp"].reshape(1, 1, C_in, C_exp),
                                     (1, 1), "VALID", dimension_numbers=dn)
        e = silu(e * params["s_exp"] + params["b_exp"])
    else:
        C_exp = C_in
        e = x
    d = lax.conv_general_dilated(e, params["w_dw"].reshape(K, K, 1, C_exp),
                                 (stride, stride), [(P, P), (P, P)],
                                 feature_group_count=C_exp, dimension_numbers=dn)
    d = silu(d * params["s_dw"] + params["b_dw"])
    pooled = jnp.mean(d, axis=(1, 2))
    h = silu(pooled @ params["w_se1"] + params["b_se1"])
    g = jax.nn.sigmoid(h @ params["w_se2"] + params["b_se2"])
    d = d * g[:, None, None, :]
    out = lax.conv_general_dilated(d, params["w_pr"].reshape(1, 1, C_exp, C_out),
                                   (1, 1), "VALID", dimension_numbers=dn)
    out = out * params["s_pr"] + params["b_pr"]
    if stride == 1 and C_in == C_out:
        out = out + x
    return jnp.transpose(out, (0, 3, 1, 2))


# ------------------------------------------------------------------ param builder
def make_mbconv_params(key, C_in, C_out, expand_ratio, K):
    C_exp = _make_divisible(C_in * expand_ratio, 8)
    Csq = max(1, C_in // 4)
    ks = jax.random.split(key, 24)
    normal = jax.random.normal

    def bn(i, C):
        gamma = jax.random.uniform(ks[i], (C,), minval=0.5, maxval=1.5)
        beta = 0.1 * normal(ks[i + 1], (C,))
        mean = 0.1 * normal(ks[i + 2], (C,))
        var = jax.random.uniform(ks[i + 3], (C,), minval=0.5, maxval=1.5)
        return _fold_bn(gamma, beta, mean, var)

    params = {}
    if C_exp != C_in:                                     # expansion present
        params["w_exp"] = 0.2 * normal(ks[12], (C_in, C_exp), jnp.float32)
        params["s_exp"], params["b_exp"] = bn(0, C_exp)
    params["w_dw"] = 0.2 * normal(ks[13], (K, K, C_exp), jnp.float32)
    params["s_dw"], params["b_dw"] = bn(4, C_exp)
    params["w_se1"] = 0.2 * normal(ks[14], (C_exp, Csq), jnp.float32)
    params["b_se1"] = 0.1 * normal(ks[15], (1, Csq), jnp.float32)
    params["w_se2"] = 0.2 * normal(ks[16], (Csq, C_exp), jnp.float32)
    params["b_se2"] = 0.1 * normal(ks[17], (1, C_exp), jnp.float32)
    params["w_pr"] = 0.2 * normal(ks[18], (C_exp, C_out), jnp.float32)
    params["s_pr"], params["b_pr"] = bn(8, C_out)
    return params


# ------------------------------------------------------------------ main
if __name__ == "__main__":
    key = jax.random.PRNGKey(0)
    N, H, W = 2, 16, 16
    # MBConvConfig variants: (expansion + residual), (5x5 depthwise stride-2), (no expansion)
    test_cfgs = [
        dict(expand_ratio=4.0, K=3, stride=1, C_in=8, C_out=8),
        dict(expand_ratio=4.0, K=5, stride=2, C_in=8, C_out=16),
        dict(expand_ratio=1.0, K=3, stride=1, C_in=8, C_out=8),
    ]

    for i, tc in enumerate(test_cfgs):
        kp, kx, key = jax.random.split(key, 3)
        params = make_mbconv_params(kp, tc["C_in"], tc["C_out"], tc["expand_ratio"], tc["K"])
        cfg = dict(K=tc["K"], stride=tc["stride"])
        x = jax.random.normal(kx, (N, tc["C_in"], H, W), jnp.float32)   # NCHW, PyTorch layout

        out = jax.block_until_ready(mbconv_forward(x, params, cfg))
        ref = mbconv_ref(x, params, cfg)

        P = (tc["K"] - 1) // 2
        H_out = (H + 2 * P - tc["K"]) // tc["stride"] + 1
        W_out = (W + 2 * P - tc["K"]) // tc["stride"] + 1
        assert out.shape == (N, tc["C_out"], H_out, W_out), (i, out.shape)
        max_err = float(jnp.max(jnp.abs(out - ref)))
        assert max_err < 2e-3, f"config {i}: mismatch vs reference: {max_err}"

    print("KERNEL_OK")
</pallas_src>

<mosaic_0001>
module attributes {stable_mosaic.version = 11 : i64} {
  func.func @_mbconv_fused_kernel(%arg0: i32, %arg1: memref<1x16x128xf32, #tpu.memory_space<vmem>>, %arg2: memref<128x512xf32, #tpu.memory_space<vmem>>, %arg3: memref<1x512xf32, #tpu.memory_space<vmem>>, %arg4: memref<9x512xf32, #tpu.memory_space<vmem>>, %arg5: memref<1x512xf32, #tpu.memory_space<vmem>>, %arg6: memref<1x512xf32, #tpu.memory_space<vmem>>, %arg7: memref<512x32xf32, #tpu.memory_space<vmem>>, %arg8: memref<32x512xf32, #tpu.memory_space<vmem>>, %arg9: memref<32x2xf32, #tpu.memory_space<vmem>>, %arg10: memref<1x2xf32, #tpu.memory_space<vmem>>, %arg11: memref<2x32xf32, #tpu.memory_space<vmem>>, %arg12: memref<1x32xf32, #tpu.memory_space<vmem>>, %arg13: memref<512x128xf32, #tpu.memory_space<vmem>>, %arg14: memref<1x128xf32, #tpu.memory_space<vmem>>, %arg15: memref<1x16x128xf32, #tpu.memory_space<vmem>>, %arg16: memref<25x672xf32, #tpu.memory_space<vmem>>) attributes {dimension_semantics = [#tpu.dimension_semantics<parallel>], iteration_bounds = array<i64: 2>, scalar_prefetch = 0 : i64, scratch_operands = 1 : i64, tpu.core_type = #tpu.core_type<tc>, window_params = [{transform_indices = @transform_0, window_bounds = array<i64: 1, 16, 128>}, {pipeline_mode = #tpu.pipeline_mode<synchronous>, transform_indices = @transform_1, window_bounds = array<i64: 128, 512>}, {pipeline_mode = #tpu.pipeline_mode<synchronous>, transform_indices = @transform_2, window_bounds = array<i64: 1, 512>}, {pipeline_mode = #tpu.pipeline_mode<synchronous>, transform_indices = @transform_3, window_bounds = array<i64: 9, 512>}, {pipeline_mode = #tpu.pipeline_mode<synchronous>, transform_indices = @transform_4, window_bounds = array<i64: 1, 512>}, {pipeline_mode = #tpu.pipeline_mode<synchronous>, transform_indices = @transform_5, window_bounds = array<i64: 1, 512>}, {pipeline_mode = #tpu.pipeline_mode<synchronous>, transform_indices = @transform_6, window_bounds = array<i64: 512, 32>}, {pipeline_mode = #tpu.pipeline_mode<synchronous>, transform_indices = @transform_7, window_bounds = array<i64: 32, 512>}, {pipeline_mode = #tpu.pipeline_mode<synchronous>, transform_indices = @transform_8, window_bounds = array<i64: 32, 2>}, {pipeline_mode = #tpu.pipeline_mode<synchronous>, transform_indices = @transform_9, window_bounds = array<i64: 1, 2>}, {pipeline_mode = #tpu.pipeline_mode<synchronous>, transform_indices = @transform_10, window_bounds = array<i64: 2, 32>}, {pipeline_mode = #tpu.pipeline_mode<synchronous>, transform_indices = @transform_11, window_bounds = array<i64: 1, 32>}, {pipeline_mode = #tpu.pipeline_mode<synchronous>, transform_indices = @transform_12, window_bounds = array<i64: 512, 128>}, {pipeline_mode = #tpu.pipeline_mode<synchronous>, transform_indices = @transform_13, window_bounds = array<i64: 1, 128>}, {transform_indices = @transform_14, window_bounds = array<i64: 1, 16, 128>}]} {
    %c0 = arith.constant 0 : index
    %c0_0 = arith.constant 0 : index
    %c0_1 = arith.constant 0 : index
    %0 = vector.load %arg1[%c0, %c0_0, %c0_1] : memref<1x16x128xf32, #tpu.memory_space<vmem>>, vector<1x16x128xf32>
    %1 = vector.shape_cast %0 : vector<1x16x128xf32> to vector<16x128xf32>
    %c0_2 = arith.constant 0 : index
    %c0_3 = arith.constant 0 : index
    %2 = vector.load %arg2[%c0_2, %c0_3] : memref<128x512xf32, #tpu.memory_space<vmem>>, vector<128x512xf32>
    %cst = arith.constant dense<0.000000e+00> : vector<16x512xf32>
    %3 = tpu.matmul %1, %2, %cst {dimension_numbers = #tpu.dot_dimension_numbers<[1], [0], [0], [1], [0, 0, 1, 1], [], []>} : vector<16x128xf32>, vector<128x512xf32>, vector<16x512xf32> -> vector<16x512xf32>
    %c0_4 = arith.constant 0 : index
    %c0_5 = arith.constant 0 : index
    %4 = vector.load %arg3[%c0_4, %c0_5] : memref<1x512xf32, #tpu.memory_space<vmem>>, vector<1x512xf32>
    %5 = vector.broadcast %4 : vector<1x512xf32> to vector<16x512xf32>
    %6 = arith.addf %3, %5 : vector<16x512xf32>
    %7 = arith.negf %6 : vector<16x512xf32>
    %8 = math.exp %7 : vector<16x512xf32>
    %cst_6 = arith.constant 1.000000e+00 : f32
    %9 = vector.broadcast %cst_6 : f32 to vector<16x512xf32>
    %10 = arith.addf %9, %8 : vector<16x512xf32>
    %11 = arith.divf %9, %10 : vector<16x512xf32>
    %12 = arith.mulf %6, %11 : vector<16x512xf32>
    %cst_7 = arith.constant 0.000000e+00 : f32
    %13 = vector.broadcast %cst_7 : f32 to vector<25x672xf32>
    %c0_8 = arith.constant 0 : index
    %c0_9 = arith.constant 0 : index
    %14 = vector.load %arg16[%c0_8, %c0_9] : memref<25x672xf32, #tpu.memory_space<vmem>>, vector<25x672xf32>
    tpu.vector_store %arg16[%c0_8, %c0_9], %13 {strides = array<i32>} : memref<25x672xf32, #tpu.memory_space<vmem>>, vector<25x672xf32>,
    %c8 = arith.constant 8 : index
    %c128 = arith.constant 128 : index
    %15 = vector.load %arg16[%c8, %c128] : memref<25x672xf32, #tpu.memory_space<vmem>>, vector<16x512xf32>
    tpu.vector_store %arg16[%c8, %c128], %12 {strides = array<i32>} : memref<25x672xf32, #tpu.memory_space<vmem>>, vector<16x512xf32>,
    %cst_10 = arith.constant 0.000000e+00 : f32
    %16 = vector.broadcast %cst_10 : f32 to vector<16x512xf32>
    %c7 = arith.constant 7 : index
    %c96 = arith.constant 96 : index
    %17 = vector.load %arg16[%c7, %c96] : memref<25x672xf32, #tpu.memory_space<vmem>>, vector<16x512xf32>
    %c0_11 = arith.constant 0 : index
    %c0_12 = arith.constant 0 : index
    %18 = vector.load %arg4[%c0_11, %c0_12] : memref<9x512xf32, #tpu.memory_space<vmem>>, vector<1x512xf32>
    %19 = vector.broadcast %18 : vector<1x512xf32> to vector<16x512xf32>
    %20 = arith.mulf %17, %19 : vector<16x512xf32>
    %21 = arith.addf %16, %20 : vector<16x512xf32>
    %c7_13 = arith.constant 7 : index
    %c128_14 = arith.constant 128 : index
    %22 = vector.load %arg16[%c7_13, %c128_14] : memref<25x672xf32, #tpu.memory_space<vmem>>, vector<16x512xf32>
    %c1 = arith.constant 1 : index
    %c0_15 = arith.constant 0 : index
    %23 = vector.load %arg4[%c1, %c0_15] : memref<9x512xf32, #tpu.memory_space<vmem>>, vector<1x512xf32>
    %24 = vector.broadcast %23 : vector<1x512xf32> to vector<16x512xf32>
    %25 = arith.mulf %22, %24 : vector<16x512xf32>
    %26 = arith.addf %21, %25 : vector<16x512xf32>
    %c7_16 = arith.constant 7 : index
    %c160 = arith.constant 160 : index
    %27 = vector.load %arg16[%c7_16, %c160] : memref<25x672xf32, #tpu.memory_space<vmem>>, vector<16x512xf32>
    %c2 = arith.constant 2 : index
    %c0_17 = arith.constant 0 : index
    %28 = vector.load %arg4[%c2, %c0_17] : memref<9x512xf32, #tpu.memory_space<vmem>>, vector<1x512xf32>
    %29 = vector.broadcast %28 : vector<1x512xf32> to vector<16x512xf32>
    %30 = arith.mulf %27, %29 : vector<16x512xf32>
    %31 = arith.addf %26, %30 : vector<16x512xf32>
    %c8_18 = arith.constant 8 : index
    %c96_19 = arith.constant 96 : index
    %32 = vector.load %arg16[%c8_18, %c96_19] : memref<25x672xf32, #tpu.memory_space<vmem>>, vector<16x512xf32>
    %c3 = arith.constant 3 : index
    %c0_20 = arith.constant 0 : index
    %33 = vector.load %arg4[%c3, %c0_20] : memref<9x512xf32, #tpu.memory_space<vmem>>, vector<1x512xf32>
    %34 = vector.broadcast %33 : vector<1x512xf32> to vector<16x512xf32>
    %35 = arith.mulf %32, %34 : vector<16x512xf32>
    %36 = arith.addf %31, %35 : vector<16x512xf32>
    %c8_21 = arith.constant 8 : index
    %c128_22 = arith.constant 128 : index
    %37 = vector.load %arg16[%c8_21, %c128_22] : memref<25x672xf32, #tpu.memory_space<vmem>>, vector<16x512xf32>
    %c4 = arith.constant 4 : index
    %c0_23 = arith.constant 0 : index
    %38 = vector.load %arg4[%c4, %c0_23] : memref<9x512xf32, #tpu.memory_space<vmem>>, vector<1x512xf32>
    %39 = vector.broadcast %38 : vector<1x512xf32> to vector<16x512xf32>
    %40 = arith.mulf %37, %39 : vector<16x512xf32>
    %41 = arith.addf %36, %40 : vector<16x512xf32>
    %c8_24 = arith.constant 8 : index
    %c160_25 = arith.constant 160 : index
    %42 = vector.load %arg16[%c8_24, %c160_25] : memref<25x672xf32, #tpu.memory_space<vmem>>, vector<16x512xf32>
    %c5 = arith.constant 5 : index
    %c0_26 = arith.constant 0 : index
    %43 = vector.load %arg4[%c5, %c0_26] : memref<9x512xf32, #tpu.memory_space<vmem>>, vector<1x512xf32>
    %44 = vector.broadcast %43 : vector<1x512xf32> to vector<16x512xf32>
    %45 = arith.mulf %42, %44 : vector<16x512xf32>
    %46 = arith.addf %41, %45 : vector<16x512xf32>
    %c9 = arith.constant 9 : index
    %c96_27 = arith.constant 96 : index
    %47 = vector.load %arg16[%c9, %c96_27] : memref<25x672xf32, #tpu.memory_space<vmem>>, vector<16x512xf32>
    %c6 = arith.constant 6 : index
    %c0_28 = arith.constant 0 : index
    %48 = vector.load %arg4[%c6, %c0_28] : memref<9x512xf32, #tpu.memory_space<vmem>>, vector<1x512xf32>
    %49 = vector.broadcast %48 : vector<1x512xf32> to vector<16x512xf32>
    %50 = arith.mulf %47, %49 : vector<16x512xf32>
    %51 = arith.addf %46, %50 : vector<16x512xf32>
    %c9_29 = arith.constant 9 : index
    %c128_30 = arith.constant 128 : index
    %52 = vector.load %arg16[%c9_29, %c128_30] : memref<25x672xf32, #tpu.memory_space<vmem>>, vector<16x512xf32>
    %c7_31 = arith.constant 7 : index
    %c0_32 = arith.constant 0 : index
    %53 = vector.load %arg4[%c7_31, %c0_32] : memref<9x512xf32, #tpu.memory_space<vmem>>, vector<1x512xf32>
    %54 = vector.broadcast %53 : vector<1x512xf32> to vector<16x512xf32>
    %55 = arith.mulf %52, %54 : vector<16x512xf32>
    %56 = arith.addf %51, %55 : vector<16x512xf32>
    %c9_33 = arith.constant 9 : index
    %c160_34 = arith.constant 160 : index
    %57 = vector.load %arg16[%c9_33, %c160_34] : memref<25x672xf32, #tpu.memory_space<vmem>>, vector<16x512xf32>
    %c8_35 = arith.constant 8 : index
    %c0_36 = arith.constant 0 : index
    %58 = vector.load %arg4[%c8_35, %c0_36] : memref<9x512xf32, #tpu.memory_space<vmem>>, vector<1x512xf32>
    %59 = vector.broadcast %58 : vector<1x512xf32> to vector<16x512xf32>
    %60 = arith.mulf %57, %59 : vector<16x512xf32>
    %61 = arith.addf %56, %60 : vector<16x512xf32>
    %c0_37 = arith.constant 0 : index
    %c0_38 = arith.constant 0 : index
    %62 = vector.load %arg5[%c0_37, %c0_38] : memref<1x512xf32, #tpu.memory_space<vmem>>, vector<1x512xf32>
    %63 = vector.broadcast %62 : vector<1x512xf32> to vector<16x512xf32>
    %64 = arith.mulf %61, %63 : vector<16x512xf32>
    %c0_39 = arith.constant 0 : index
    %c0_40 = arith.constant 0 : index
    %65 = vector.load %arg6[%c0_39, %c0_40] : memref<1x512xf32, #tpu.memory_space<vmem>>, vector<1x512xf32>
    %66 = vector.broadcast %65 : vector<1x512xf32> to vector<16x512xf32>
    %67 = arith.addf %64, %66 : vector<16x512xf32>
    %68 = arith.negf %67 : vector<16x512xf32>
    %69 = math.exp %68 : vector<16x512xf32>
    %cst_41 = arith.constant 1.000000e+00 : f32
    %70 = vector.broadcast %cst_41 : f32 to vector<16x512xf32>
    %71 = arith.addf %70, %69 : vector<16x512xf32>
    %72 = arith.divf %70, %71 : vector<16x512xf32>
    %73 = arith.mulf %67, %72 : vector<16x512xf32>
    %cst_42 = arith.constant dense<0.000000e+00> : vector<512xf32>
    %74 = vector.multi_reduction <add>, %73, %cst_42 [0] : vector<16x512xf32> to vector<512xf32>
    %75 = vector.shape_cast %74 : vector<512xf32> to vector<1x512xf32>
    %c0_43 = arith.constant 0 : index
    %c0_44 = arith.constant 0 : index
    %76 = vector.load %arg7[%c0_43, %c0_44] : memref<512x32xf32, #tpu.memory_space<vmem>>, vector<512x32xf32>
    %cst_45 = arith.constant dense<0.000000e+00> : vector<1x32xf32>
    %77 = tpu.matmul %75, %76, %cst_45 {dimension_numbers = #tpu.dot_dimension_numbers<[1], [0], [0], [1], [0, 0, 1, 1], [], []>} : vector<1x512xf32>, vector<512x32xf32>, vector<1x32xf32> -> vector<1x32xf32>
    %cst_46 = arith.constant 3.906250e-03 : f32
    %78 = vector.broadcast %cst_46 : f32 to vector<1x32xf32>
    %79 = arith.mulf %77, %78 : vector<1x32xf32>
    %c0_47 = arith.constant 0 : index
    %c0_48 = arith.constant 0 : index
    %80 = vector.load %arg9[%c0_47, %c0_48] : memref<32x2xf32, #tpu.memory_space<vmem>>, vector<32x2xf32>
    %cst_49 = arith.constant dense<0.000000e+00> : vector<1x2xf32>
    %81 = tpu.matmul %79, %80, %cst_49 {dimension_numbers = #tpu.dot_dimension_numbers<[1], [0], [0], [1], [0, 0, 1, 1], [], []>} : vector<1x32xf32>, vector<32x2xf32>, vector<1x2xf32> -> vector<1x2xf32>
    %c0_50 = arith.constant 0 : index
    %c0_51 = arith.constant 0 : index
    %82 = vector.load %arg10[%c0_50, %c0_51] : memref<1x2xf32, #tpu.memory_space<vmem>>, vector<1x2xf32>
    %83 = arith.addf %81, %82 : vector<1x2xf32>
    %84 = arith.negf %83 : vector<1x2xf32>
    %85 = math.exp %84 : vector<1x2xf32>
    %cst_52 = arith.constant 1.000000e+00 : f32
    %86 = vector.broadcast %cst_52 : f32 to vector<1x2xf32>
    %87 = arith.addf %86, %85 : vector<1x2xf32>
    %88 = arith.divf %86, %87 : vector<1x2xf32>
    %89 = arith.mulf %83, %88 : vector<1x2xf32>
    %c0_53 = arith.constant 0 : index
    %c0_54 = arith.constant 0 : index
    %90 = vector.load %arg11[%c0_53, %c0_54] : memref<2x32xf32, #tpu.memory_space<vmem>>, vector<2x32xf32>
    %cst_55 = arith.constant dense<0.000000e+00> : vector<1x32xf32>
    %91 = tpu.matmul %89, %90, %cst_55 {dimension_numbers = #tpu.dot_dimension_numbers<[1], [0], [0], [1], [0, 0, 1, 1], [], []>} : vector<1x2xf32>, vector<2x32xf32>, vector<1x32xf32> -> vector<1x32xf32>
    %c0_56 = arith.constant 0 : index
    %c0_57 = arith.constant 0 : index
    %92 = vector.load %arg12[%c0_56, %c0_57] : memref<1x32xf32, #tpu.memory_space<vmem>>, vector<1x32xf32>
    %93 = arith.addf %91, %92 : vector<1x32xf32>
    %94 = arith.negf %93 : vector<1x32xf32>
    %95 = math.exp %94 : vector<1x32xf32>
    %cst_58 = arith.constant 1.000000e+00 : f32
    %96 = vector.broadcast %cst_58 : f32 to vector<1x32xf32>
    %97 = arith.addf %96, %95 : vector<1x32xf32>
    %98 = arith.divf %96, %97 : vector<1x32xf32>
    %c0_59 = arith.constant 0 : index
    %c0_60 = arith.constant 0 : index
    %99 = vector.load %arg8[%c0_59, %c0_60] : memref<32x512xf32, #tpu.memory_space<vmem>>, vector<32x512xf32>
    %cst_61 = arith.constant dense<0.000000e+00> : vector<1x512xf32>
    %100 = tpu.matmul %98, %99, %cst_61 {dimension_numbers = #tpu.dot_dimension_numbers<[1], [0], [0], [1], [0, 0, 1, 1], [], []>} : vector<1x32xf32>, vector<32x512xf32>, vector<1x512xf32> -> vector<1x512xf32>
    %101 = vector.broadcast %100 : vector<1x512xf32> to vector<16x512xf32>
    %102 = arith.mulf %73, %101 : vector<16x512xf32>
    %c0_62 = arith.constant 0 : index
    %c0_63 = arith.constant 0 : index
    %103 = vector.load %arg13[%c0_62, %c0_63] : memref<512x128xf32, #tpu.memory_space<vmem>>, vector<512x128xf32>
    %cst_64 = arith.constant dense<0.000000e+00> : vector<16x128xf32>
    %104 = tpu.matmul %102, %103, %cst_64 {dimension_numbers = #tpu.dot_dimension_numbers<[1], [0], [0], [1], [0, 0, 1, 1], [], []>} : vector<16x512xf32>, vector<512x128xf32>, vector<16x128xf32> -> vector<16x128xf32>
    %c0_65 = arith.constant 0 : index
    %c0_66 = arith.constant 0 : index
    %105 = vector.load %arg14[%c0_65, %c0_66] : memref<1x128xf32, #tpu.memory_space<vmem>>, vector<1x128xf32>
    %106 = vector.broadcast %105 : vector<1x128xf32> to vector<16x128xf32>
    %107 = arith.addf %104, %106 : vector<16x128xf32>
    %108 = arith.addf %107, %1 : vector<16x128xf32>
    %c0_67 = arith.constant 0 : index
    %c0_68 = arith.constant 0 : index
    %c0_69 = arith.constant 0 : index
    %109 = vector.load %arg15[%c0_67, %c0_68, %c0_69] : memref<1x16x128xf32, #tpu.memory_space<vmem>>, vector<1x16x128xf32>
    %110 = vector.shape_cast %109 : vector<1x16x128xf32> to vector<16x128xf32>
    %111 = vector.shape_cast %108 : vector<16x128xf32> to vector<1x16x128xf32>
    tpu.vector_store %arg15[%c0_67, %c0_68, %c0_69], %111 {strides = array<i32>} : memref<1x16x128xf32, #tpu.memory_space<vmem>>, vector<1x16x128xf32>,
    return
  }
  func.func @transform_0(%arg0: i32) -> (i32, i32, i32) {
    %c0_i32 = arith.constant 0 : i32
    %c0_i32_0 = arith.constant 0 : i32
    %c0_i32_1 = arith.constant 0 : i32
    return %arg0, %c0_i32, %c0_i32_0 : i32, i32, i32
  }
  func.func @transform_1(%arg0: i32) -> (i32, i32) {
    %c0_i32 = arith.constant 0 : i32
    %c0_i32_0 = arith.constant 0 : i32
    %c0_i32_1 = arith.constant 0 : i32
    return %c0_i32, %c0_i32_0 : i32, i32
  }
  func.func @transform_2(%arg0: i32) -> (i32, i32) {
    %c0_i32 = arith.constant 0 : i32
    %c0_i32_0 = arith.constant 0 : i32
    %c0_i32_1 = arith.constant 0 : i32
    return %c0_i32, %c0_i32_0 : i32, i32
  }
  func.func @transform_3(%arg0: i32) -> (i32, i32) {
    %c0_i32 = arith.constant 0 : i32
    %c0_i32_0 = arith.constant 0 : i32
    %c0_i32_1 = arith.constant 0 : i32
    return %c0_i32, %c0_i32_0 : i32, i32
  }
  func.func @transform_4(%arg0: i32) -> (i32, i32) {
    %c0_i32 = arith.constant 0 : i32
    %c0_i32_0 = arith.constant 0 : i32
    %c0_i32_1 = arith.constant 0 : i32
    return %c0_i32, %c0_i32_0 : i32, i32
  }
  func.func @transform_5(%arg0: i32) -> (i32, i32) {
    %c0_i32 = arith.constant 0 : i32
    %c0_i32_0 = arith.constant 0 : i32
    %c0_i32_1 = arith.constant 0 : i32
    return %c0_i32, %c0_i32_0 : i32, i32
  }
  func.func @transform_6(%arg0: i32) -> (i32, i32) {
    %c0_i32 = arith.constant 0 : i32
    %c0_i32_0 = arith.constant 0 : i32
    %c0_i32_1 = arith.constant 0 : i32
    return %c0_i32, %c0_i32_0 : i32, i32
  }
  func.func @transform_7(%arg0: i32) -> (i32, i32) {
    %c0_i32 = arith.constant 0 : i32
    %c0_i32_0 = arith.constant 0 : i32
    %c0_i32_1 = arith.constant 0 : i32
    return %c0_i32, %c0_i32_0 : i32, i32
  }
  func.func @transform_8(%arg0: i32) -> (i32, i32) {
    %c0_i32 = arith.constant 0 : i32
    %c0_i32_0 = arith.constant 0 : i32
    %c0_i32_1 = arith.constant 0 : i32
    return %c0_i32, %c0_i32_0 : i32, i32
  }
  func.func @transform_9(%arg0: i32) -> (i32, i32) {
    %c0_i32 = arith.constant 0 : i32
    %c0_i32_0 = arith.constant 0 : i32
    %c0_i32_1 = arith.constant 0 : i32
    return %c0_i32, %c0_i32_0 : i32, i32
  }
  func.func @transform_10(%arg0: i32) -> (i32, i32) {
    %c0_i32 = arith.constant 0 : i32
    %c0_i32_0 = arith.constant 0 : i32
    %c0_i32_1 = arith.constant 0 : i32
    return %c0_i32, %c0_i32_0 : i32, i32
  }
  func.func @transform_11(%arg0: i32) -> (i32, i32) {
    %c0_i32 = arith.constant 0 : i32
    %c0_i32_0 = arith.constant 0 : i32
    %c0_i32_1 = arith.constant 0 : i32
    return %c0_i32, %c0_i32_0 : i32, i32
  }
  func.func @transform_12(%arg0: i32) -> (i32, i32) {
    %c0_i32 = arith.constant 0 : i32
    %c0_i32_0 = arith.constant 0 : i32
    %c0_i32_1 = arith.constant 0 : i32
    return %c0_i32, %c0_i32_0 : i32, i32
  }
  func.func @transform_13(%arg0: i32) -> (i32, i32) {
    %c0_i32 = arith.constant 0 : i32
    %c0_i32_0 = arith.constant 0 : i32
    %c0_i32_1 = arith.constant 0 : i32
    return %c0_i32, %c0_i32_0 : i32, i32
  }
  func.func @transform_14(%arg0: i32) -> (i32, i32, i32) {
    %c0_i32 = arith.constant 0 : i32
    %c0_i32_0 = arith.constant 0 : i32
    %c0_i32_1 = arith.constant 0 : i32
    return %arg0, %c0_i32, %c0_i32_0 : i32, i32, i32
  }
}

</mosaic_0001>

<bundles_post_ra>
// kernel: tpu_custom_call.1
= control target key start
LH: loop header
LB: loop body
LE: loop exit
PB: predicated region body
PF: predicated region fallthrough
CT: control target
= control target key end

     0   :  { %s6322_s0 = inlined_call_operand.vmem [shape: f32[2,16,128], index: 0, kind: input, shape index: {}]   ;;  %s6323_s1 = inlined_call_operand.vmem [shape: f32[128,512], index: 1, kind: input, shape index: {}]   ;;  %s6324_s2 = inlined_call_operand.vmem [shape: f32[1,512], index: 2, kind: input, shape index: {}]   ;;  %s6325_s3 = inlined_call_operand.hbm [shape: f32[9,512], index: 3, kind: input, shape index: {}]   ;;  %s6326_s4 = inlined_call_operand.vmem [shape: f32[1,512], index: 4, kind: input, shape index: {}]   ;;  %s6327_s5 = inlined_call_operand.vmem [shape: f32[1,512], index: 5, kind: input, shape index: {}]   ;;  %s6328_s6 = inlined_call_operand.vmem [shape: f32[512,32], index: 6, kind: input, shape index: {}]   ;;  %s6329_s7 = inlined_call_operand.vmem [shape: f32[32,512], index: 7, kind: input, shape index: {}]   ;;  %s6330_s8 = inlined_call_operand.vmem [shape: f32[32,2], index: 8, kind: input, shape index: {}]   ;;  %s6331_s9 = inlined_call_operand.vmem [shape: f32[1,2], index: 9, kind: input, shape index: {}]   ;;  %s6332_s10 = inlined_call_operand.vmem [shape: f32[2,32], index: 10, kind: input, shape index: {}]   ;;  %s6333_s11 = inlined_call_operand.vmem [shape: f32[1,32], index: 11, kind: input, shape index: {}]   ;;  %s6334_s12 = inlined_call_operand.hbm [shape: f32[512,128], index: 12, kind: input, shape index: {}]   ;;  %s6335_s13 = inlined_call_operand.vmem [shape: f32[1,128], index: 13, kind: input, shape index: {}]   ;;  %s6336_s14 = inlined_call_operand.hbm [shape: f32[2,16,128], index: 14, kind: output, shape index: {}]  }
   0x1   :  { %6432 = sst [smem:[#allocation84_spill]] %s6336_s14 }
   0x2   :  { %19 = vsyncpa [#allocation4], 0 }
   0x3   :  { %20 = vsyncpa [#allocation7], 0 }
   0x4   :  { %21 = vsyncpa [#allocation5], 0 }
   0x5   :  { %23 = vsyncpa [#allocation5 + $0x1], 0  ;;  %s4113_s29 = smov 0   ;;  %s4115_s30 = smov 0  }
   0x6   :  { %s4117_s15 = smov 0   ;;  %s4119_s16 = smov 0  }
   0x7 LB: > { %6433 = sst [smem:[#allocation12_spill]] %s4009_s29  ;;  %s4134_s17 = sadd.s32 4294967295, %s4021_s16   ;;  %s4021_s16 = sphi %s4119_s16, %s6669_s16   ;;  %s4017_s15 = sphi %s4117_s15, %s6674_s15   ;;  %s4013_s30 = sphi %s4115_s30, %s6673_s30   ;;  %s4009_s29 = sphi %s4113_s29, %s6672_s29  }
   0x8   : > { %6434 = sst [smem:[#allocation13_spill]] %s4017_s15  ;;  %s3251_s18 = sadd.s32 4294967294, %s4021_s16  }
   0x9   : > { %6435 = sst [smem:[#allocation14_spill]] %s4021_s16  ;;  %s4138_s19 = sadd.s32 1, %s4021_s16  }
   0xa   : > { %6436 = sst [smem:[#allocation15_spill]] %s4138_s19  ;;  %s335_s20 = sadd.s32 1, %s4017_s15 }
   0xb   : > { %s332_s21 = ssub.s32 %s4021_s16, %s4138_s19  ;;  %p345_p0 = scmp.ne.s32.totalorder %s4017_s15, %s4013_s30 }
   0xc   : > { %p333_p1 = scmp.eq.s32.totalorder %s332_s21, 0  ;;  %p346_p2 = scmp.eq.s32.totalorder %s4134_s17, 1 }
   0xd   : > { %p351_p3 = scmp.ne.s32.totalorder %s4013_s30, %s4009_s29  ;;  %p352_p4 = scmp.eq.s32.totalorder %s3251_s18, 1 }
   0xe   : > { %s4149_s22 = scalar_select %p333_p1, %s4017_s15, %s335_s20  }
   0xf   : > { %p4151_p5 = por %p346_p2, %p345_p0  ;;  %p4155_p6 = por %p352_p4, %p351_p3 }
  0x10   : > { %6437 = sst [smem:[#allocation16_spill]] %s4149_s22  ;;  %p3252_p7 = scmp.ge.s32.totalorder %s4021_s16, 1 }
  0x11   : > { %s6438_s23 = scalar_select %p4151_p5, 1, 0 }
  0x12   : > { %s6440_s24 = scalar_select %p4155_p6, 1, 0 }
  0x13   : > { %6439 = sst [smem:[#allocation17_spill]] %s6438_s23  ;;  %p359_p8 = scmp.lt.s32.totalorder %s4021_s16, 3 }
  0x14   : > { %6441 = sst [smem:[#allocation18_spill]] %s6440_s24  ;;  %p6342_p9 = scmp.eq.s32.totalorder %s4134_s17, 0 }
  0x15   : > { %p4162_p10 = pnand %p3252_p7, %p359_p8  ;;  %s4023_s26 = smov [#allocation3]  }
  0x16   : > { %s377_s27 = sshll.u32 %s4023_s26, 4  ;;  %s4024_s18 = smov [#allocation6]   ;;  %s378_s27 = int_to_ptr.vmem [resolvable:$true] %s377_s27 }
  0x17   : > { %s6442_s25 = scalar_select %p4162_p10, 1, 0 }
  0x18   : > { %p3693_p11 = pneg %p4162_p10  ;;  %s414_s20 = sshll.u32 %s4024_s18, 4  ;;  %s4174_s20 = int_to_ptr.vmem [resolvable:$true] %s414_s20 }
  0x19   : > { %s3895_s15 = scalar_lea.hbm %s6325_s3, 1024 }
  0x1a   : > { %p4170_p12 = pnand %p6342_p9, %p3693_p11  ;;  %p3896_p13 = scmp.ne.s32.totalorder %s6325_s3, %s3895_s15 }
  0x1b   : > { %p3902_p3 = scmp.lt.u32.totalorder %s3895_s15, %s6325_s3 }
  0x1c   : > { %p3897_p0 = pneg %p4170_p12 }
  0x1e   : > { %p3898_p1 = pnand %p3897_p0, %p3896_p13 }
  0x20   : > { %p3899_p2 = pneg %p3898_p1 }
  0x22   : > { %p3904_p4 = pnand %p3902_p3, %p3899_p2 }
  0x24   : > { %3907 = shalt.err (!%p3904_p4)
}
  0x25   : > { %s3908_s18 = scalar_lea.vmem %s378_s27, 1024  ;;  %p3916_p9 = scmp.lt.s32.totalorder %s378_s27, %s378_s27 }
  0x26   : > { %p3909_p7 = scmp.ne.s32.totalorder %s378_s27, %s3908_s18  ;;  %p3917_p6 = scmp.lt.s32.totalorder %s3908_s18, %s3908_s18 }
  0x28   : > { %p3911_p8 = pnand %p3909_p7, %p3897_p0  ;;  %p3918_p5 = por %p3917_p6, %p3916_p9 }
  0x2a   : > { %p3912_p11 = pneg %p3911_p8 }
  0x2c   : > { %p3919_p10 = pnand %p3918_p5, %p3912_p11 }
  0x2e   : > { %3922 = shalt.err (!%p3919_p10)
}
  0x2f   : > { %s4025_s19 = smov 512   ;;  %s4026_s22 = smov 32  }
  0x30   : > { %3696 = dma.hbm_to_vmem [thread:$0]  (!%p4170_p12), %s6325_s3, 1024, %s378_s27, [#allocation4], %s4025_s19, %s4025_s19, %s4026_s22  }
  0x31   : > { %s3923_s26 = scalar_lea.hbm %s6334_s12, 8192 }
  0x32   : > { %p3924_p13 = scmp.ne.s32.totalorder %s6334_s12, %s3923_s26  ;;  %p3930_p9 = scmp.lt.u32.totalorder %s3923_s26, %s6334_s12 }
  0x34   : > { %p3926_p5 = pnand %p3924_p13, %p3897_p0 }
  0x36   : > { %p3927_p6 = pneg %p3926_p5 }
  0x38   : > { %p3932_p10 = pnand %p3930_p9, %p3927_p6 }
  0x3a   : > { %3935 = shalt.err (!%p3932_p10)
}
  0x3b   : > { %s3936_s27 = scalar_lea.vmem %s4174_s20, 8192  ;;  %p3944_p4 = scmp.lt.s32.totalorder %s4174_s20, %s4174_s20 }
  0x3c   : > { %p3937_p1 = scmp.ne.s32.totalorder %s4174_s20, %s3936_s27  ;;  %p3945_p7 = scmp.lt.s32.totalorder %s3936_s27, %s3936_s27 }
  0x3e   : > { %p3939_p2 = pnand %p3937_p1, %p3897_p0  ;;  %p3946_p8 = por %p3945_p7, %p3944_p4 }
  0x40   : > { %p3940_p3 = pneg %p3939_p2 }
  0x42   : > { %p3947_p11 = pnand %p3946_p8, %p3940_p3 }
  0x44   : > { %3950 = shalt.err (!%p3947_p11)
}
  0x45   : > { %s4027_s14 = smov 128   ;;  %s4028_s16 = smov 8  }
  0x46   : > { %3699 = dma.hbm_to_vmem [thread:$0]  (!%p4170_p12), %s6334_s12, 8192, %s4174_s20, [#allocation7], %s4027_s14, %s4027_s14, %s4028_s16  }
  0x47   : > { %p6444_p13 = scmp.ne.s32.totalorder %s6442_s25, 0 }
  0x49   : > { %441 = sbr.rel (%p6444_p13) target bundleno = 2199 (0x897), region = 76 }
  0x50   : > { %p6445_p0 = scmp.eq.s32.totalorder %s4134_s17, 0 }
  0x52   : > { %3996 = dma.done.wait (%p6445_p0), [#allocation4], 1024   ;;  %p6446_p5 = pmov %p6445_p0 }
  0x53   : > { %p6447_p6 = pmov %p6445_p0 }
  0x54   : > { %3998 = vsyncadd (%p6446_p5), [#allocation4], 4294966272 }
  0x55   : > { %4000 = dma.done.wait (%p6447_p6), [#allocation7], 8192   ;;  %p6448_p9 = pmov %p6445_p0 }
  0x56   : > { %v4029_v0 = vmov 0.0   ;;  %v499_v1 = vld [vmem:[%s6323_s1 + $0x8] sm:$0xff]  ;;  %v501_v3 = vld [vmem:[%s6323_s1 + $0x18] sm:$0xff]  ;;  %v498_v6 = vld [vmem:[%s6323_s1] sm:$0xff]  ;;  %v564_v48 = vlaneseq  ;;  %vm799_vm0 = vcmask 261120   ;;  %p491_p12 = scmp.lt.s32.totalorder %s4134_s17, 1 }
  0x57   : > { %4002 = vsyncadd (%p6448_p9), [#allocation7], 4294959104  ;;  %648 = vmatprep.mubr.f32.mxu0 %v4029_v0  ;;  %794 = vst [vmem:[#allocation2] sm:$0xff] %v4029_v0  ;;  %725 = vmatprep.mubr.f32.mxu1 %v4029_v0  ;;  %v503_v2 = vld [vmem:[%s6323_s1 + $0x28] sm:$0xff]  ;;  %v505_v5 = vld [vmem:[%s6323_s1 + $0x38] sm:$0xff]  ;;  %s4030_s28 = smov 32  }
  0x58   : > { %795 = vst [vmem:[#allocation2 + $0x8] sm:$0xff] %v4029_v0  ;;  %796 = vst [vmem:[#allocation2 + $0x10] sm:$0xff] %v4029_v0  ;;  %v3469_v4 = vpack.c.bf16 %v503_v2, %v499_v1  ;;  %v502_v7 = vld [vmem:[%s6323_s1 + $0x20] sm:$0xff]  ;;  %v3501_v8 = vpack.c.bf16 %v505_v5, %v501_v3  ;;  %v500_v10 = vld [vmem:[%s6323_s1 + $0x10] sm:$0xff]  ;;  %v565_v62 = vshrl.u32 %v564_v48, 7  ;;  %s4437_s14 = scalar_select %p491_p12, %s4134_s17, 1 }
  0x59   : > { %797 = vst [vmem:[#allocation2 + $0x18] sm:$0xff] %v4029_v0  ;;  %798 = vst [vmem:[#allocation2 + $0x20] sm:$0xff] %v4029_v0  ;;  %v3471_v9 = vpack.c.bf16 %v502_v7, %v498_v6  ;;  %v504_v11 = vld [vmem:[%s6323_s1 + $0x30] sm:$0xff]  ;;  %v507_v12 = vld [vmem:[%s6323_s1 + $0x48] sm:$0xff]  ;;  %vm818_vm1 = vcmask 253952   ;;  %s4032_s15 = smov 64  }
  0x5a   : > { %801 = vst [vmem:[#allocation2 + $0x30] sm:$0xff] %v4029_v0  ;;  %807 = vst [vmem:[#allocation2 + $0x60] sm:$0xff] %v4029_v0  ;;  %3470 = vmatprep.subr.bf16.mxu0 %v3469_v4  ;;  %v3503_v13 = vpack.c.bf16 %v504_v11, %v500_v10  ;;  %v511_v14 = vld [vmem:[%s6323_s1 + $0x68] sm:$0xff]  ;;  %v509_v15 = vld [vmem:[%s6323_s1 + $0x58] sm:$0xff]  ;;  %3502 = vmatprep.subr.bf16.mxu1 %v3501_v8  ;;  %s3298_s27 = sshll.u32 %s4437_s14, 4  ;;  %s4031_s14 = smov 96  }
  0x5b   : > { %813 = vst [vmem:[#allocation2 + $0x90] sm:$0x1] %v4029_v0  ;;  %814 = vst [vmem:[#allocation2 + $0x98] sm:$0x1] %v4029_v0  ;;  %v513_v16 = vld [vmem:[%s6323_s1 + $0x78] sm:$0xff]  ;;  %3472 = vmatpush1.bf16.msra.mxu0 %v3471_v9  ;;  %v3473_v17 = vpack.c.bf16 %v511_v14, %v507_v12  ;;  %v506_v19 = vld [vmem:[%s6323_s1 + $0x40] sm:$0xff]  ;;  %s4471_s19 = scalar_lea.vmem %s6322_s0, %s3298_s27 }
  0x5c   : > { %815 = vst [vmem:[#allocation2 + $0xa0] sm:$0x1] %v4029_v0  ;;  %816 = vst [vmem:[#allocation2 + $0xa8] sm:$0x1] %v4029_v0  ;;  %v3505_v18 = vpack.c.bf16 %v513_v16, %v509_v15  ;;  %v510_v20 = vld [vmem:[%s6323_s1 + $0x60] sm:$0xff]  ;;  %v508_v21 = vld [vmem:[%s6323_s1 + $0x50] sm:$0xff]  ;;  %3504 = vmatpush1.bf16.msra.mxu1 %v3503_v13 }
  0x5d   : > { %817 = vst [vmem:[#allocation2 + $0xb0] sm:$0x1] %v4029_v0  ;;  %v3475_v22 = vpack.c.bf16 %v510_v20, %v506_v19  ;;  %v512_v23 = vld [vmem:[%s6323_s1 + $0x70] sm:$0xff]  ;;  %v515_v24 = vld [vmem:[%s6323_s1 + $0x88] sm:$0xff]  ;;  %3474 = vmatprep.subr.bf16.mxu0 %v3473_v17  ;;  %v517_v28 = vld [vmem:[%s6323_s1 + $0x98] sm:$0xff]  ;;  %v4404_v12 = vsub.s32 0, %v565_v62 }
  0x5e   : > { %v519_v25 = vld [vmem:[%s6323_s1 + $0xa8] sm:$0xff]  ;;  %3506 = vmatprep.subr.bf16.mxu1 %v3505_v18  ;;  %v3507_v26 = vpack.c.bf16 %v512_v23, %v508_v21  ;;  %v521_v29 = vld [vmem:[%s6323_s1 + $0xb8] sm:$0xff]  ;;  %v514_v30 = vld [vmem:[%s6323_s1 + $0x80] sm:$0xff]  ;;  %800 = vst.msk [vmem:[#allocation2 + $0x28] sm:$0xff] %vm799_vm0, %v4029_v0  ;;  %v4406_v13 = vsub.s32 2, %v565_v62  ;;  %v4417_v18 = vsub.s32 3, %v565_v62 }
  0x5f   : > { %v3477_v27 = vpack.c.bf16 %v519_v25, %v515_v24  ;;  %v3509_v31 = vpack.c.bf16 %v521_v29, %v517_v28  ;;  %v518_v32 = vld [vmem:[%s6323_s1 + $0xa0] sm:$0xff]  ;;  %v516_v33 = vld [vmem:[%s6323_s1 + $0x90] sm:$0xff]  ;;  %3476 = vmatpush1.bf16.msra.mxu0 %v3475_v22  ;;  %v523_v36 = vld [vmem:[%s6323_s1 + $0xc8] sm:$0xff]  ;;  %806 = vst.msk [vmem:[#allocation2 + $0x58] sm:$0xff] %vm799_vm0, %v4029_v0  ;;  %vm1219_vm2 = vcmask 1046528   ;;  %vm1597_vm3 = vcmask 1045504  }
  0x60   : > { %v520_v34 = vld [vmem:[%s6323_s1 + $0xb0] sm:$0xff]  ;;  %v3479_v35 = vpack.c.bf16 %v518_v32, %v514_v30  ;;  %v527_v37 = vld [vmem:[%s6323_s1 + $0xe8] sm:$0xff]  ;;  %v525_v38 = vld [vmem:[%s6323_s1 + $0xd8] sm:$0xff]  ;;  %3508 = vmatpush1.bf16.msra.mxu1 %v3507_v26  ;;  %812 = vst.msk [vmem:[#allocation2 + $0x88] sm:$0xff] %vm799_vm0, %v4029_v0  ;;  %v4441_v30 = vsub.s32 1, %v565_v62  ;;  %vm869_vm4 = vcmask 785408  }
  0x61   : > { %3478 = vmatprep.subr.bf16.mxu0 %v3477_v27  ;;  %v3511_v39 = vpack.c.bf16 %v520_v34, %v516_v33  ;;  %v3481_v40 = vpack.c.bf16 %v527_v37, %v523_v36  ;;  %v529_v41 = vld [vmem:[%s6323_s1 + $0xf8] sm:$0xff]  ;;  %v522_v42 = vld [vmem:[%s6323_s1 + $0xc0] sm:$0xff]  ;;  %3510 = vmatprep.subr.bf16.mxu1 %v3509_v31  ;;  %v524_v45 = vld [vmem:[%s6323_s1 + $0xd0] sm:$0xff]  ;;  %6449 = vst [vmem:[#allocation19_spill] sm:$0xff] %v4404_v12  ;;  %vm1116_vm5 = vcmask 523264   ;;  %vm2165_vm6 = vcmask 1040384  }
  0x62   : > { %v526_v43 = vld [vmem:[%s6323_s1 + $0xe0] sm:$0xff]  ;;  %v3513_v44 = vpack.c.bf16 %v529_v41, %v525_v38  ;;  %v528_v46 = vld [vmem:[%s6323_s1 + $0xf0] sm:$0xff]  ;;  %v531_v47 = vld [vmem:[%s6323_s1 + $0x108] sm:$0xff]  ;;  %6450 = vst [vmem:[#allocation20_spill] sm:$0xff] %v4406_v13  ;;  %vm2201_vm7 = vcmask 1048320   ;;  %vm4034_vm8 = vmmov 0  }
  0x63   : > { %v535_v49 = vld [vmem:[%s6323_s1 + $0x128] sm:$0xff]  ;;  %v533_v50 = vld [vmem:[%s6323_s1 + $0x118] sm:$0xff]  ;;  %3480 = vmatpush1.bf16.msra.mxu0 %v3479_v35  ;;  %v3483_v52 = vpack.c.bf16 %v526_v43, %v522_v42  ;;  %v3515_v53 = vpack.c.bf16 %v528_v46, %v524_v45  ;;  %v530_v55 = vld [vmem:[%s6323_s1 + $0x100] sm:$0xff]  ;;  %6451 = vst [vmem:[#allocation21_spill] sm:$0xff] %v4417_v18  ;;  %vm2560_vm9 = vcmask 1041408   ;;  %vm2556_vm10 = vcmask 15360  }
  0x64   : > { %v537_v51 = vld [vmem:[%s6323_s1 + $0x138] sm:$0xff]  ;;  %3512 = vmatpush1.bf16.msra.mxu1 %v3511_v39  ;;  %3482 = vmatprep.subr.bf16.mxu0 %v3481_v40  ;;  %v3485_v54 = vpack.c.bf16 %v535_v49, %v531_v47  ;;  %v534_v56 = vld [vmem:[%s6323_s1 + $0x120] sm:$0xff]  ;;  %v532_v57 = vld [vmem:[%s6323_s1 + $0x110] sm:$0xff]  ;;  %819 = vst.msk [vmem:[#allocation2 + $0xb8] sm:$0x1] %vm818_vm1, %v4029_v0  ;;  %s488_s29 = sand.u32 1, %s4013_s30  }
  0x65   : > { %3514 = vmatprep.subr.bf16.mxu1 %v3513_v44  ;;  %v3517_v58 = vpack.c.bf16 %v537_v51, %v533_v50  ;;  %v536_v59 = vld [vmem:[%s6323_s1 + $0x130] sm:$0xff]  ;;  %v539_v60 = vld [vmem:[%s6323_s1 + $0x148] sm:$0xff]  ;;  %v541_v63 = vld [vmem:[%s6323_s1 + $0x158] sm:$0xff]  ;;  %v3487_v2 = vpack.c.bf16 %v534_v56, %v530_v55  ;;  %s6662_s24 = sld [smem:[#allocation17_spill]]  ;;  %s3299_s18 = sshll.u32 %s4134_s17, 8 }
  0x66   : > { %v543_v61 = vld [vmem:[%s6323_s1 + $0x168] sm:$0xff]  ;;  %v545_v1 = vld [vmem:[%s6323_s1 + $0x178] sm:$0xff]  ;;  %v3519_v3 = vpack.c.bf16 %v536_v59, %v532_v57  ;;  %v538_v5 = vld [vmem:[%s6323_s1 + $0x140] sm:$0xff]  ;;  %s6663_s23 = sld [smem:[#allocation84_spill]]  ;;  %s6281_s20 = scalar_lea.sflag [#allocation5], %s488_s29 }
  0x67   : > { %3484 = vmatpush1.bf16.msra.mxu0 %v3483_v52  ;;  %v3489_v4 = vpack.c.bf16 %v543_v61, %v539_v60  ;;  %v542_v6 = vld [vmem:[%s6323_s1 + $0x160] sm:$0xff]  ;;  %v540_v7 = vld [vmem:[%s6323_s1 + $0x150] sm:$0xff]  ;;  %v3521_v8 = vpack.c.bf16 %v545_v1, %v541_v63  ;;  %v547_v10 = vld [vmem:[%s6323_s1 + $0x188] sm:$0xff]  ;;  %s4035_s17 = smov [#allocation8]  }
  0x68   : > { %3516 = vmatpush1.bf16.msra.mxu1 %v3515_v53  ;;  %3486 = vmatprep.subr.bf16.mxu0 %v3485_v54  ;;  %v544_v9 = vld [vmem:[%s6323_s1 + $0x170] sm:$0xff]  ;;  %v551_v11 = vld [vmem:[%s6323_s1 + $0x1a8] sm:$0xff]  ;;  %v549_v14 = vld [vmem:[%s6323_s1 + $0x198] sm:$0xff]  ;;  %v3491_v16 = vpack.c.bf16 %v542_v6, %v538_v5 }
  0x69   : > { %3518 = vmatprep.subr.bf16.mxu1 %v3517_v58  ;;  %v553_v15 = vld [vmem:[%s6323_s1 + $0x1b8] sm:$0xff]  ;;  %v546_v17 = vld [vmem:[%s6323_s1 + $0x180] sm:$0xff]  ;;  %v3523_v19 = vpack.c.bf16 %v544_v9, %v540_v7  ;;  %v3493_v20 = vpack.c.bf16 %v551_v11, %v547_v10  ;;  %v548_v22 = vld [vmem:[%s6323_s1 + $0x190] sm:$0xff] }
  0x6a   : > { %v550_v21 = vld [vmem:[%s6323_s1 + $0x1a0] sm:$0xff]  ;;  %v3525_v24 = vpack.c.bf16 %v553_v15, %v549_v14  ;;  %v552_v25 = vld [vmem:[%s6323_s1 + $0x1b0] sm:$0xff]  ;;  %v555_v26 = vld [vmem:[%s6323_s1 + $0x1c8] sm:$0xff] }
  0x6b   : > { %3488 = vmatpush1.bf16.msra.mxu0 %v3487_v2  ;;  %v1022_v23 = vld [vmem:[#allocation3 + $0x2] ss:$8 sm:$0xf]  ;;  %v3495_v33 = vpack.c.bf16 %v550_v21, %v546_v17  ;;  %v3527_v35 = vpack.c.bf16 %v552_v25, %v548_v22  ;;  %v1381_v43 = vld [vmem:[#allocation3 + $0x5] ss:$8 sm:$0xf] }
  0x6c   : > { %3520 = vmatpush1.bf16.msra.mxu1 %v3519_v3  ;;  %3490 = vmatprep.subr.bf16.mxu0 %v3489_v4  ;;  %v559_v27 = vld [vmem:[%s6323_s1 + $0x1e8] sm:$0xff]  ;;  %v1035_v28 = vrot.slane %v1022_v23, %v4406_v13  ;;  %v1027_v29 = vrot.slane %v1022_v23, %v4404_v12  ;;  %v557_v31 = vld [vmem:[%s6323_s1 + $0x1d8] sm:$0xff]  ;;  %v1039_v34 = vrot.slane %v1022_v23, %v4417_v18  ;;  %v554_v37 = vld [vmem:[%s6323_s1 + $0x1c0] sm:$0xff]  ;;  %s6279_s25 = scalar_lea.hbm %s6663_s23, %s3299_s18  ;;  %p6664_p1 = scmp.ne.s32.totalorder %s6662_s24, 0 }
  0x6d   : > { %3522 = vmatprep.subr.bf16.mxu1 %v3521_v8  ;;  %v561_v32 = vld [vmem:[%s6323_s1 + $0x1f8] sm:$0xff]  ;;  %v3497_v36 = vpack.c.bf16 %v559_v27, %v555_v26  ;;  %v558_v38 = vld [vmem:[%s6323_s1 + $0x1e0] sm:$0xff]  ;;  %v556_v40 = vld [vmem:[%s6323_s1 + $0x1d0] sm:$0xff]  ;;  %v1031_v42 = vrot.slane %v1022_v23, %v4441_v30  ;;  %v1394_v45 = vrot.slane %v1381_v43, %v4406_v13  ;;  %v1398_v47 = vrot.slane %v1381_v43, %v4417_v18 }
  0x6e   : > { %1044 = vrot.lane.b32.xlu0 %v1035_v28, %s4030_s28  ;;  %v3529_v39 = vpack.c.bf16 %v561_v32, %v557_v31  ;;  %v560_v41 = vld [vmem:[%s6323_s1 + $0x1f0] sm:$0xff]  ;;  %1040 = vrot.lane.b32.xlu1 %v1027_v29, %s4030_s28  ;;  %v3499_v44 = vpack.c.bf16 %v558_v38, %v554_v37  ;;  %v496_v48 = vld [vmem:[%s4471_s19] sm:$0xff]  ;;  %v1386_v49 = vrot.slane %v1381_v43, %v4404_v12  ;;  %v4513_v7 = vld [vmem:[#allocation2 + $0x8] sm:$0x80] }
  0x6f   : > { %3492 = vmatpush1.bf16.msra.mxu0 %v3491_v16  ;;  %v3531_v46 = vpack.c.bf16 %v560_v41, %v556_v40  ;;  %v1390_v50 = vrot.slane %v1381_v43, %v4441_v30  ;;  %v1786_v51 = vld [vmem:[#allocation3 + $0x20] ss:$8 sm:$0xf]  ;;  %v1165_v62 = vld [vmem:[#allocation3 + $0x3] ss:$8 sm:$0xf] }
  0x70   : > { %3524 = vmatpush1.bf16.msra.mxu1 %v3523_v19  ;;  %3494 = vmatprep.subr.bf16.mxu0 %v3493_v20  ;;  %v497_v52 = vld [vmem:[%s4471_s19 + $0x8] sm:$0xff]  ;;  %v1799_v53 = vrot.slane %v1786_v51, %v4406_v13  ;;  %v1803_v54 = vrot.slane %v1786_v51, %v4417_v18  ;;  %v1791_v55 = vrot.slane %v1786_v51, %v4404_v12  ;;  %v4515_v8 = vld [vmem:[#allocation2 + $0x10] sm:$0x80]  ;;  %v4529_v15 = vld [vmem:[#allocation2 + $0x18] sm:$0x80] }
  0x71   : > { %3526 = vmatprep.subr.bf16.mxu1 %v3525_v24  ;;  %v1795_v56 = vrot.slane %v1786_v51, %v4441_v30  ;;  %v843_v57 = vld [vmem:[#allocation3] ss:$8 sm:$0xf]  ;;  %v1170_v63 = vrot.slane %v1165_v62, %v4404_v12  ;;  %v1174_v1 = vrot.slane %v1165_v62, %v4441_v30  ;;  %v909_v2 = vld [vmem:[#allocation3 + $0x1] ss:$8 sm:$0xf]  ;;  %v1178_v3 = vrot.slane %v1165_v62, %v4406_v13 }
  0x72   : > { %1046 = vrot.lane.b32.xlu0 %v1039_v34, %s4030_s28  ;;  %1042 = vrot.lane.b32.xlu1 %v1031_v42, %s4030_s28  ;;  %v848_v58 = vrot.slane %v843_v57, %v4404_v12  ;;  %v852_v59 = vrot.slane %v843_v57, %v4441_v30  ;;  %v856_v60 = vrot.slane %v843_v57, %v4406_v13  ;;  %v4531_v16 = vld [vmem:[#allocation2 + $0x20] sm:$0x80]  ;;  %v1533_v20 = vld [vmem:[#allocation3 + $0x6] ss:$8 sm:$0xf] }
  0x73   : > { %3496 = vmatpush1.bf16.msra.mxu0 %v3495_v33  ;;  %v860_v61 = vrot.slane %v843_v57, %v4417_v18  ;;  %v4506_v4 = vrot.slane %v909_v2, %v4404_v12  ;;  %v1182_v5 = vrot.slane %v1165_v62, %v4417_v18  ;;  %v4511_v6 = vrot.slane %v909_v2, %v4441_v30  ;;  %v1947_v25 = vld [vmem:[%s6326_s4] sm:$0xf] }
  0x74   : > { %3528 = vmatpush1.bf16.msra.mxu1 %v3527_v35  ;;  %3498 = vmatprep.subr.bf16.mxu0 %v3497_v36  ;;  %v4521_v10 = vrot.slane %v909_v2, %v4406_v13  ;;  %v4527_v14 = vrot.slane %v909_v2, %v4417_v18  ;;  %v1542_v21 = vrot.slane %v1533_v20, %v4441_v30  ;;  %v4561_v31 = vld [vmem:[%s6327_s5] sm:$0xf]  ;;  %v1018_v35 = vld [vmem:[#allocation2 + $0x28] sm:$0x80] }
  0x75   : > { %3530 = vmatprep.subr.bf16.mxu1 %v3529_v39  ;;  %6452 = vst [vmem:[#allocation22_spill] sm:$0xff] %v4506_v4  ;;  %6453 = vst [vmem:[#allocation23_spill] sm:$0xff] %v4511_v6  ;;  %v931_v9 = vmul.f32 %v4506_v4, %v4513_v7  ;;  %v932_v11 = vmul.f32 %v4511_v6, %v4515_v8  ;;  %v1538_v22 = vrot.slane %v1533_v20, %v4404_v12  ;;  %v1019_v39 = vld [vmem:[#allocation2 + $0x58] sm:$0xff] }
  0x76   : > { %1403 = vrot.lane.b32.xlu0 %v1394_v45, %s4030_s28  ;;  %1405 = vrot.lane.b32.xlu1 %v1398_v47, %s4030_s28  ;;  %6454 = vst [vmem:[#allocation24_spill] sm:$0xff] %v4521_v10  ;;  %6455 = vst [vmem:[#allocation25_spill] sm:$0xff] %v4527_v14  ;;  %v933_v17 = vmul.f32 %v4521_v10, %v4529_v15  ;;  %v934_v19 = vmul.f32 %v4527_v14, %v4531_v16  ;;  %v1020_v45 = vld [vmem:[#allocation2 + $0x88] sm:$0x7f] }
  0x77   : > { %3500 = vmatpush1.bf16.msra.mxu0 %v3499_v44  ;;  %v1550_v23 = vrot.slane %v1533_v20, %v4417_v18  ;;  %v1546_v24 = vrot.slane %v1533_v20, %v4406_v13  ;;  %v1956_v26 = vrot.slane %v1947_v25, %v4441_v30  ;;  %v1952_v27 = vrot.slane %v1947_v25, %v4404_v12 }
  0x78   : > { %3532 = vmatpush1.bf16.msra.mxu1 %v3531_v46  ;;  %v1964_v28 = vrot.slane %v1947_v25, %v4417_v18  ;;  %v1960_v29 = vrot.slane %v1947_v25, %v4406_v13  ;;  %6456 = vst [vmem:[#allocation26_spill] sm:$0xff] %v4561_v31  ;;  %v2005_v32 = vrot.slane %v4561_v31, %v4441_v30 }
  0x79   : > { %v2001_v33 = vrot.slane %v4561_v31, %v4404_v12 }
  0x7a   : > { %649 = vmatmul.mubr.f32.vlgmr.msra.gmra.mrb[0].mxu0 %v496_v48  ;;  %1399 = vrot.lane.b32.xlu0 %v1386_v49, %s4030_s28  ;;  %v1379_v49 = vld [vmem:[#allocation2 + $0x88] sm:$0xff] }
  0x7b   : > { %726 = vmatmul.mubr.f32.vlgmr.msra.gmra.mrb[0].mxu1 %v496_v48  ;;  %654 = vmatprep.mubr.f32.mxu0 %v4029_v0 }
  0x7c   : > { %731 = vmatprep.mubr.f32.mxu1 %v4029_v0  ;;  %1401 = vrot.lane.b32.xlu1 %v1390_v50, %s4030_s28 }
  0x7e   : > { %655 = vmatmul.mubr.f32.gmra.mrb[2].mxu0 %v497_v52  ;;  %1808 = vrot.lane.b32.xlu0 %v1799_v53, %s4030_s28 }
  0x7f   : > { %732 = vmatmul.mubr.f32.gmra.mrb[2].mxu1 %v497_v52 }
  0x80   : > { %1810 = vrot.lane.b32.xlu1 %v1803_v54, %s4030_s28 }
  0x82   : > { %1804 = vrot.lane.b32.xlu0 %v1791_v55, %s4030_s28 }
  0x84   : > { %1806 = vrot.lane.b32.xlu1 %v1795_v56, %s4030_s28 }
  0x86   : > { %861 = vrot.lane.b32.xlu0 %v848_v58, %s4031_s14  ;;  %v1783_v58 = vld [vmem:[#allocation2 + $0x58] sm:$0xfe] }
  0x88   : > { %863 = vrot.lane.b32.xlu1 %v852_v59, %s4031_s14 }
  0x8a   : > { %865 = vrot.lane.b32.xlu0 %v856_v60, %s4031_s14 }
  0x8c   : > { %867 = vrot.lane.b32.xlu1 %v860_v61, %s4031_s14  ;;  %v1784_v61 = vld [vmem:[#allocation2 + $0xb8] sm:$0x1] }
  0x8e   : > { %1183 = vrot.lane.b32.xlu0 %v1170_v63, %s4031_s14 }
  0x90   : > { %1185 = vrot.lane.b32.xlu1 %v1174_v1, %s4031_s14 }
  0x92   : > { %1187 = vrot.lane.b32.xlu0 %v1178_v3, %s4031_s14 }
  0x94   : > { %1189 = vrot.lane.b32.xlu1 %v1182_v5, %s4031_s14 }
  0x96   : > { %955 = vrot.lane.b32.xlu0 %v931_v9, %s4031_s14 }
  0x98   : > { %957 = vrot.lane.b32.xlu1 %v932_v11, %s4031_s14 }
  0x9a   : > { %959 = vrot.lane.b32.xlu0 %v933_v17, %s4031_s14 }
  0x9c   : > { %961 = vrot.lane.b32.xlu1 %v934_v19, %s4031_s14 }
  0x9e   : > { %1553 = vrot.lane.b32.xlu0 %v1542_v21, %s4031_s14 }
  0xa0   : > { %1551 = vrot.lane.b32.xlu1 %v1538_v22, %s4031_s14 }
  0xa2   : > { %1557 = vrot.lane.b32.xlu0 %v1550_v23, %s4031_s14 }
  0xa4   : > { %1555 = vrot.lane.b32.xlu1 %v1546_v24, %s4031_s14 }
  0xa6   : > { %1967 = vrot.lane.b32.xlu0 %v1956_v26, %s4031_s14 }
  0xa8   : > { %1965 = vrot.lane.b32.xlu1 %v1952_v27, %s4031_s14 }
  0xaa   : > { %1971 = vrot.lane.b32.xlu0 %v1964_v28, %s4031_s14 }
  0xac   : > { %1969 = vrot.lane.b32.xlu1 %v1960_v29, %s4031_s14 }
  0xae   : > { %2016 = vrot.lane.b32.xlu0 %v2005_v32, %s4031_s14 }
  0xb0   : > { %2014 = vrot.lane.b32.xlu1 %v2001_v33, %s4031_s14 }
  0xe0   : > { %v1045_v34 = vpop.permute.xlu0 %1044  ;;  %v4572_v36 = vpop.permute.xlu1 %1040 }
  0xe1   : > { %6457 = vst [vmem:[#allocation27_spill] sm:$0xff] %v4572_v36  ;;  %v1056_v37 = vmul.f32 %v4572_v36, %v4513_v7 }
  0xe3   : > { %1086 = vrot.lane.b32.xlu0 %v1056_v37, %s4032_s15 }
  0xe4   : > { %v1047_v38 = vpop.permute.xlu0 %1046  ;;  %v1043_v42 = vpop.permute.xlu1 %1042 }
  0xe5   : > { %v1060_v40 = vmul.f32 %v1047_v38, %v1018_v35  ;;  %v4578_v41 = vsel %vm799_vm0, %v1045_v34, %v1047_v38  ;;  %v1065_v43 = vmul.f32 %v1047_v38, %v1019_v39  ;;  %v4584_v44 = vsel %vm799_vm0, %v1043_v42, %v1045_v34 }
  0xe6   : > { %6458 = vst [vmem:[#allocation28_spill] sm:$0xff] %v4578_v41  ;;  %v1059_v0 = vmul.f32 %v4578_v41, %v4531_v16  ;;  %6459 = vst [vmem:[#allocation29_spill] sm:$0xff] %v4584_v44  ;;  %v1058_v47 = vmul.f32 %v4584_v44, %v4529_v15  ;;  %v1070_v50 = vmul.f32 %v1047_v38, %v1020_v45 }
  0xe7   : > { %1094 = vrot.lane.b32.xlu1 %v1060_v40, %s4032_s15  ;;  %v4597_v52 = vsel %vm799_vm0, %v4572_v36, %v1043_v42 }
  0xe8   : > { %v4586_v46 = vpop.permute.xlu0 %1403  ;;  %1092 = vrot.lane.b32.xlu0 %v1059_v0, %s4032_s15  ;;  %v4591_v48 = vpop.permute.xlu1 %1405  ;;  %6460 = vst [vmem:[#allocation30_spill] sm:$0xff] %v4597_v52  ;;  %v1057_v57 = vmul.f32 %v4597_v52, %v4515_v8 }
  0xe9   : > { %v1419_v51 = vmul.f32 %v4591_v48, %v1019_v39  ;;  %v1424_v55 = vmul.f32 %v4591_v48, %v1379_v49  ;;  %v4657_v39 = vld [vmem:[#allocation2 + $0xa0] sm:$0x1] }
  0xea   : > { %6467 = vst [vmem:[#allocation37_spill] sm:$0xff] %v4657_v39 }
  0xeb   : > { %1104 = vrot.lane.b32.xlu1 %v1065_v43, %s4032_s15  ;;  %v1439_v54 = vrot.slane %v1419_v51, 1  ;;  %v1448_v60 = vrot.slane %v1424_v55, 1 }
  0xec   : > { %1090 = vrot.lane.b32.xlu0 %v1058_v47, %s4032_s15  ;;  %v4600_v53 = vpop.permute.xlu0 %1399  ;;  %v4671_v47 = vld [vmem:[#allocation2 + $0xa8] sm:$0x1] }
  0xed   : > { %v1449_v17 = vsel %vm1219_vm2, %v1439_v54, %v1448_v60  ;;  %6470 = vst [vmem:[#allocation40_spill] sm:$0xff] %v4671_v47 }
  0xee   : > { %v4603_v56 = vpop.permute.xlu1 %1401 }
  0xef   : > { %1114 = vrot.lane.b32.xlu1 %v1070_v50, %s4032_s15 }
  0xf0   : > { %v4608_v59 = vpop.permute.xlu0 %1808  ;;  %1458 = vrot.lane.b32.xlu0 %v1439_v54, %s4032_s15 }
  0xf2   : > { %v4611_v62 = vpop.permute.xlu1 %1810 }
  0xf3   : > { %1088 = vrot.lane.b32.xlu1 %v1057_v57, %s4032_s15  ;;  %v1829_v63 = vmul.f32 %v4611_v62, %v1379_v49  ;;  %v1824_v1 = vmul.f32 %v4611_v62, %v1783_v58  ;;  %v1834_v2 = vmul.f32 %v4611_v62, %v1784_v61  ;;  %v562_v57 = vld [vmem:[%s6324_s2] sm:$0xf] }
  0xf4   : > { %v4617_v3 = vpop.permute.xlu0 %1804  ;;  %1478 = vrot.lane.b32.xlu0 %v1448_v60, %s4032_s15  ;;  %v567_v58 = vrot.slane %v562_v57, %v4404_v12  ;;  %v575_v60 = vrot.slane %v562_v57, %v4406_v13  ;;  %v571_v61 = vrot.slane %v562_v57, %v4441_v30 }
  0xf5   : > { %6461 = vst [vmem:[#allocation31_spill] sm:$0xff] %v4617_v3  ;;  %v1854_v5 = vrot.slane %v1824_v1, 2  ;;  %v1863_v9 = vrot.slane %v1829_v63, 2  ;;  %v1873_v20 = vrot.slane %v1834_v2, 2  ;;  %v579_v1 = vrot.slane %v562_v57, %v4417_v18 }
  0xf6   : > { %v4620_v11 = vpop.permute.xlu1 %1806 }
  0xf7   : > { %1883 = vrot.lane.b32.xlu1 %v1854_v5, %s4032_s15  ;;  %v1864_v19 = vsel %vm1597_vm3, %v1854_v5, %v1863_v9  ;;  %v1874_v23 = vsel %vm1597_vm3, %v1863_v9, %v1873_v20 }
  0xf8   : > { %v4625_v21 = vpop.permute.xlu0 %861  ;;  %1468 = vrot.lane.b32.xlu0 %v1449_v17, %s4032_s15 }
  0xf9   : > { %6462 = vst [vmem:[#allocation32_spill] sm:$0xff] %v4625_v21 }
  0xfa   : > { %v4628_v22 = vpop.permute.xlu1 %863 }
  0xfb   : > { %1893 = vrot.lane.b32.xlu1 %v1864_v19, %s4032_s15 }
  0xfc   : > { %v4632_v24 = vpop.permute.xlu0 %865 }
  0xfe   : > { %v4634_v25 = vpop.permute.xlu1 %867 }
  0xff   : > { %6463 = vst [vmem:[#allocation33_spill] sm:$0xff] %v4634_v25  ;;  %1903 = vrot.lane.b32.xlu1 %v1874_v23, %s4032_s15 }
 0x100   : > { %v4637_v26 = vpop.permute.xlu0 %1183 }
 0x101   : > { %6464 = vst [vmem:[#allocation34_spill] sm:$0xff] %v4637_v26 }
 0x102   : > { %v4639_v27 = vpop.permute.xlu1 %1185 }
 0x104   : > { %v4641_v28 = vpop.permute.xlu0 %1187 }
 0x106   : > { %v4643_v29 = vpop.permute.xlu1 %1189 }
 0x108   : > { %v4645_v32 = vpop.permute.xlu0 %955 }
 0x109   : > { %6465 = vst [vmem:[#allocation35_spill] sm:$0xff] %v4645_v32 }
 0x10a   : > { %v4647_v33 = vpop.permute.xlu1 %957 }
 0x10c   : > { %v4649_v34 = vpop.permute.xlu0 %959 }
 0x10e   : > { %v4651_v35 = vpop.permute.xlu1 %961 }
 0x110   : > { %v4655_v38 = vpop.permute.xlu0 %1553 }
 0x112   : > { %v4653_v37 = vpop.permute.xlu1 %1551 }
 0x113   : > { %6466 = vst [vmem:[#allocation36_spill] sm:$0xff] %v4653_v37 }
 0x114   : > { %v4667_v43 = vpop.permute.xlu0 %1557 }
 0x116   : > { %v1556_v40 = vpop.permute.xlu1 %1555 }
 0x117   : > { %v4661_v42 = vsel %vm869_vm4, %v4655_v38, %v1556_v40  ;;  %v4675_v49 = vsel %vm869_vm4, %v1556_v40, %v4667_v43 }
 0x118   : > { %v4665_v0 = vmul.f32 %v4661_v42, %v4657_v39  ;;  %6471 = vst [vmem:[#allocation41_spill] sm:$0xff] %v4675_v49  ;;  %v4679_v51 = vpop.permute.xlu0 %1967  ;;  %v4683_v54 = vmul.f32 %v4675_v49, %v4671_v47 }
 0x119   : > { %6473 = vst [vmem:[#allocation43_spill] sm:$0xff] %v4679_v51 }
 0x11a   : > { %6468 = vst [vmem:[#allocation38_spill] sm:$0xff] %v4665_v0  ;;  %v4669_v45 = vpop.permute.xlu1 %1965  ;;  %6474 = vst [vmem:[#allocation44_spill] sm:$0xff] %v4683_v54 }
 0x11b   : > { %6469 = vst [vmem:[#allocation39_spill] sm:$0xff] %v4669_v45 }
 0x11c   : > { %v4696_v63 = vpop.permute.xlu0 %1971 }
 0x11d   : > { %6476 = vst [vmem:[#allocation46_spill] sm:$0xff] %v4696_v63 }
 0x11e   : > { %v4677_v50 = vpop.permute.xlu1 %1969 }
 0x11f   : > { %6472 = vst [vmem:[#allocation42_spill] sm:$0xff] %v4677_v50  ;;  %v4688_v55 = vsel %vm869_vm4, %v4679_v51, %v4677_v50 }
 0x120   : > { %6475 = vst [vmem:[#allocation45_spill] sm:$0xff] %v4688_v55  ;;  %v4710_v57 = vpop.permute.xlu0 %2016 }
 0x121   : > { %6477 = vst [vmem:[#allocation47_spill] sm:$0xff] %v4710_v57 }
 0x122   : > { %v4722_v54 = vpop.permute.xlu1 %2014 }
 0x123   : > { %6478 = vst [vmem:[#allocation48_spill] sm:$0xff] %v4722_v54 }
 0x14d   : > { %v650_v2 = vpop.f32.mrb[0].mxu0 }
 0x14e   : > { %v4699_v5 = vadd.f32 %v650_v2, %v567_v58  ;;  %v727_v9 = vpop.f32.mrb[0].mxu1  ;;  %v652_v17 = vpop.f32.mrb[1].mxu0 }
 0x14f   : > { %v4701_v19 = vadd.f32 %v727_v9, %v575_v60  ;;  %v4703_v20 = vadd.f32 %v652_v17, %v571_v61  ;;  %v729_v23 = vpop.f32.mrb[1].mxu1 }
 0x150   : > { %v3262_v40 = vmul.f32 -1.442695, %v4699_v5  ;;  %v4706_v55 = vadd.f32 %v729_v23, %v579_v1 }
 0x151   : > { %v3264_v45 = vmul.f32 -1.442695, %v4701_v19  ;;  %v3263_v51 = vmul.f32 -1.442695, %v4703_v20  ;;  %v656_v50 = vpop.f32.mrb[2].mxu0 }
 0x152   : > { %3790 = vpow2.f32 %v3262_v40  ;;  %v3265_v2 = vmul.f32 -1.442695, %v4706_v55  ;;  %v4713_v63 = vadd.f32 %v656_v50, %v567_v58  ;;  %v733_v9 = vpop.f32.mrb[2].mxu1  ;;  %v658_v17 = vpop.f32.mrb[3].mxu0 }
 0x153   : > { %3792 = vpow2.f32 %v3264_v45  ;;  %v4715_v31 = vadd.f32 %v733_v9, %v575_v60  ;;  %v4717_v39 = vadd.f32 %v658_v17, %v571_v61  ;;  %v735_v23 = vpop.f32.mrb[3].mxu1 }
 0x154   : > { %3794 = vpow2.f32 %v3263_v51  ;;  %v3266_v47 = vmul.f32 -1.442695, %v4713_v63  ;;  %v4720_v49 = vadd.f32 %v735_v23, %v579_v1 }
 0x155   : > { %3796 = vpow2.f32 %v3265_v2  ;;  %v3268_v40 = vmul.f32 -1.442695, %v4715_v31  ;;  %v3267_v50 = vmul.f32 -1.442695, %v4717_v39  ;;  %v4727_v58 = vpop.permute.xlu0 %1086 }
 0x156   : > { %3798 = vpow2.f32 %v3266_v47  ;;  %v3269_v45 = vmul.f32 -1.442695, %v4720_v49  ;;  %6479 = vst [vmem:[#allocation49_spill] sm:$0xff] %v4727_v58 }
 0x157   : > { %3800 = vpow2.f32 %v3268_v40 }
 0x158   : > { %3802 = vpow2.f32 %v3267_v50 }
 0x159   : > { %3804 = vpow2.f32 %v3269_v45  ;;  %v1095_v51 = vpop.permute.xlu1 %1094 }
 0x15a   : > { %v1093_v61 = vpop.permute.xlu0 %1092 }
 0x15b   : > { %v4730_v2 = vsel %vm1116_vm5, %v1093_v61, %v1095_v51 }
 0x15c   : > { %v3791_v60 = vpop.eup %3790  ;;  %6480 = vst [vmem:[#allocation50_spill] sm:$0xff] %v4730_v2 }
 0x15d   : > { %v3793_v1 = vpop.eup %3792  ;;  %v762_v9 = vadd.f32 1.0, %v3791_v60  ;;  %v4732_v57 = vpop.permute.xlu1 %1104 }
 0x15e   : > { %v3795_v17 = vpop.eup %3794  ;;  %v764_v23 = vadd.f32 1.0, %v3793_v1  ;;  %6481 = vst [vmem:[#allocation51_spill] sm:$0xff] %v4732_v57  ;;  %v1091_v45 = vpop.permute.xlu0 %1090 }
 0x15f   : > { %v3797_v47 = vpop.eup %3796  ;;  %3806 = vrcp.f32 %v762_v9  ;;  %v763_v40 = vadd.f32 1.0, %v3795_v17  ;;  %v4735_v14 = vsel %vm1116_vm5, %v1091_v45, %v1093_v61  ;;  %v1266_v9 = vld [vmem:[#allocation3 + $0x4] ss:$8 sm:$0xf] }
 0x160   : > { %v3799_v50 = vpop.eup %3798  ;;  %3808 = vrcp.f32 %v764_v23  ;;  %v765_v54 = vadd.f32 1.0, %v3797_v47  ;;  %v4742_v23 = vsel %vm799_vm0, %v4586_v46, %v4591_v48  ;;  %v4745_v47 = vrot.slane %v1266_v9, %v4404_v12 }
 0x161   : > { %v3801_v0 = vpop.eup %3800  ;;  %3810 = vrcp.f32 %v763_v40  ;;  %v766_v52 = vadd.f32 1.0, %v3799_v50  ;;  %v4737_v2 = vpop.permute.xlu1 %1114  ;;  %v4758_v40 = vrot.slane %v1266_v9, %v4441_v30  ;;  %v4763_v48 = vsel %vm799_vm0, %v4603_v56, %v4586_v46 }
 0x162   : > { %v3803_v60 = vpop.eup %3802  ;;  %3812 = vrcp.f32 %v765_v54  ;;  %v768_v51 = vadd.f32 1.0, %v3801_v0  ;;  %6482 = vst [vmem:[#allocation52_spill] sm:$0xff] %v4737_v2  ;;  %v1654_v0 = vld [vmem:[#allocation3 + $0x7] ss:$8 sm:$0xf]  ;;  %v4768_v50 = vsel %vm869_vm4, %v4625_v21, %v4628_v22  ;;  %v4786_v46 = vsel %vm869_vm4, %v4628_v22, %v4632_v24 }
 0x163   : > { %v3805_v1 = vpop.eup %3804  ;;  %3814 = vrcp.f32 %v766_v52  ;;  %v767_v57 = vadd.f32 1.0, %v3803_v60  ;;  %6483 = vst [vmem:[#allocation53_spill] sm:$0xff] %v4768_v50  ;;  %v4771_v60 = vrot.slane %v1266_v9, %v4417_v18  ;;  %6485 = vst [vmem:[#allocation55_spill] sm:$0xff] %v4786_v46  ;;  %v4803_v2 = vrot.slane %v1654_v0, %v4441_v30 }
 0x164   : > { %3816 = vrcp.f32 %v768_v51  ;;  %v769_v17 = vadd.f32 1.0, %v3805_v1  ;;  %v4781_v1 = vsel %vm799_vm0, %v4608_v59, %v4611_v62  ;;  %v4806_v22 = vrot.slane %v1654_v0, %v4417_v18 }
 0x165   : > { %3818 = vrcp.f32 %v767_v57  ;;  %v1089_v61 = vpop.permute.xlu1 %1088  ;;  %v4755_v57 = vrot.slane %v1266_v9, %v4406_v13  ;;  %6484 = vst [vmem:[#allocation54_spill] sm:$0xff] %v4781_v1  ;;  %v4792_v9 = vrot.slane %v1654_v0, %v4406_v13  ;;  %6490 = vst [vmem:[#allocation60_spill] sm:$0xff] %v4803_v2  ;;  %v4821_v30 = vsel %vm799_vm0, %v4617_v3, %v4620_v11 }
 0x166   : > { %3820 = vrcp.f32 %v769_v17  ;;  %v4749_v54 = vsel %vm1116_vm5, %v4727_v58, %v1089_v61  ;;  %v4752_v52 = vsel %vm1116_vm5, %v1089_v61, %v1091_v45  ;;  %v4776_v45 = vsel %vm799_vm0, %v4600_v53, %v4603_v56  ;;  %6491 = vst [vmem:[#allocation61_spill] sm:$0xff] %v4806_v22  ;;  %6494 = vst [vmem:[#allocation64_spill] sm:$0xff] %v4821_v30 }
 0x167   : > { %v4789_v17 = vrot.slane %v1654_v0, %v4404_v12  ;;  %6487 = vst [vmem:[#allocation57_spill] sm:$0xff] %v4792_v9  ;;  %v4797_v56 = vsel %vm869_vm4, %v4632_v24, %v4634_v25  ;;  %v4811_v58 = vsel %vm799_vm0, %v4620_v11, %v4608_v59  ;;  %v879_v24 = vmul.f32 %v4768_v50, %v4513_v7 }
 0x168   : > { %6488 = vst [vmem:[#allocation58_spill] sm:$0xff] %v4797_v56  ;;  %6492 = vst [vmem:[#allocation62_spill] sm:$0xff] %v4811_v58  ;;  %v880_v0 = vmul.f32 %v4786_v46, %v4515_v8  ;;  %v881_v11 = vmul.f32 %v4797_v56, %v4529_v15  ;;  %v4840_v8 = vsel %vm869_vm4, %v4637_v26, %v4639_v27 }
 0x169   : > { %v3807_v51 = vpop.eup %3806  ;;  %6486 = vst [vmem:[#allocation56_spill] sm:$0xff] %v4789_v17  ;;  %v979_v15 = vsel %vm869_vm4, %v4645_v32, %v4647_v33  ;;  %v4858_v50 = vsel %vm869_vm4, %v4653_v37, %v4655_v38  ;;  %v980_v38 = vsel %vm869_vm4, %v4647_v33, %v4649_v34  ;;  %v4889_v33 = vld [vmem:[#allocation2 + $0xb0] sm:$0x1] }
 0x16a   : > { %v3809_v61 = vpop.eup %3808  ;;  %v4800_v62 = vmul.f32 %v3807_v51, %v4699_v5  ;;  %v4829_v51 = vld [vmem:[#allocation2 + $0x98] sm:$0x1]  ;;  %6498 = vst [vmem:[#allocation68_spill] sm:$0xff] %v4889_v33  ;;  %v4906_v37 = vadd.f32 %v980_v38, %v880_v0 }
 0x16b   : > { %v3811_v12 = vpop.eup %3810  ;;  %v4814_v13 = vmul.f32 %v3809_v61, %v4701_v19  ;;  %6496 = vst [vmem:[#allocation66_spill] sm:$0xff] %v4829_v51 }
 0x16c   : > { %6489 = vst [vmem:[#allocation59_spill] sm:$0xff] %v4800_v62  ;;  %v3813_v5 = vpop.eup %3812  ;;  %820 = vst [vmem:[#allocation2 + $0x38] sm:$0xff] %v4800_v62  ;;  %v4827_v59 = vmul.f32 %v3811_v12, %v4703_v20  ;;  %v1061_v19 = vmul.f32 %v4572_v36, %v4800_v62  ;;  %v935_v7 = vmul.f32 %v4506_v4, %v4800_v62 }
 0x16d   : > { %6493 = vst [vmem:[#allocation63_spill] sm:$0xff] %v4814_v13  ;;  %v3815_v61 = vpop.eup %3814  ;;  %822 = vst [vmem:[#allocation2 + $0x48] sm:$0xff] %v4814_v13  ;;  %v4844_v12 = vmul.f32 %v3813_v5, %v4706_v55  ;;  %v882_v20 = vmul.f32 %v4634_v25, %v4531_v16  ;;  %v4865_v55 = vsel %vm869_vm4, %v4639_v27, %v4641_v28 }
 0x16e   : > { %6495 = vst [vmem:[#allocation65_spill] sm:$0xff] %v4827_v59  ;;  %v3817_v18 = vpop.eup %3816  ;;  %821 = vst [vmem:[#allocation2 + $0x40] sm:$0xff] %v4827_v59  ;;  %v4853_v56 = vmul.f32 %v3815_v61, %v4713_v63  ;;  %1096 = vrot.lane.b32.xlu1 %v1061_v19, %s4032_s15  ;;  %963 = vrot.lane.b32.xlu0 %v935_v7, %s4031_s14  ;;  %v4876_v5 = vmul.f32 %v4858_v50, %v4829_v51 }
 0x16f   : > { %v3819_v16 = vpop.eup %3818  ;;  %823 = vst [vmem:[#allocation2 + $0x50] sm:$0xff] %v4844_v12  ;;  %v4869_v63 = vmul.f32 %v3817_v18, %v4715_v31  ;;  %v981_v27 = vsel %vm869_vm4, %v4649_v34, %v4651_v35  ;;  %v1063_v18 = vmul.f32 %v4584_v44, %v4814_v13  ;;  %v937_v31 = vmul.f32 %v4521_v10, %v4814_v13 }
 0x170   : > { %6497 = vst [vmem:[#allocation67_spill] sm:$0xff] %v4876_v5  ;;  %v3821_v19 = vpop.eup %3820  ;;  %824 = vst [vmem:[#allocation2 + $0x68] sm:$0xff] %v4853_v56  ;;  %v4880_v7 = vmul.f32 %v3819_v16, %v4717_v39  ;;  %v4894_v61 = vsel %vm869_vm4, %v4641_v28, %v4643_v29  ;;  %v4897_v39 = vadd.f32 %v4651_v35, %v882_v20 }
 0x171   : > { %v4899_v16 = vadd.f32 %v979_v15, %v879_v24  ;;  %826 = vst [vmem:[#allocation2 + $0x78] sm:$0xff] %v4869_v63  ;;  %v4903_v34 = vmul.f32 %v3821_v19, %v4720_v49  ;;  %v4914_v28 = vmul.f32 %v4667_v43, %v4889_v33  ;;  %v4919_v35 = vadd.f32 %v981_v27, %v881_v11 }
 0x172   : > { %825 = vst [vmem:[#allocation2 + $0x70] sm:$0xff] %v4880_v7  ;;  %v4910_v25 = vmul.f32 %v4661_v42, %v4880_v7  ;;  %1100 = vrot.lane.b32.xlu1 %v1063_v18, %s4032_s15  ;;  %967 = vrot.lane.b32.xlu0 %v937_v31, %s4031_s14  ;;  %v1288_v0 = vmul.f32 %v4745_v47, %v4800_v62 }
 0x173   : > { %6499 = vst [vmem:[#allocation69_spill] sm:$0xff] %v4914_v28  ;;  %827 = vst [vmem:[#allocation2 + $0x80] sm:$0xff] %v4903_v34  ;;  %v4921_v49 = vld [vmem:[#allocation2 + $0x38] sm:$0xfe]  ;;  %v4928_v20 = vmul.f32 %v4755_v57, %v4814_v13  ;;  %v936_v15 = vmul.f32 %v4511_v6, %v4827_v59  ;;  %v1064_v38 = vmul.f32 %v4578_v41, %v4844_v12  ;;  %v6502_v41 = vld [vmem:[#allocation25_spill] sm:$0xff] }
 0x174   : > { %v4934_v19 = vld [vmem:[#allocation2 + $0x48] sm:$0xfe]  ;;  %v4938_v11 = vmul.f32 %v4600_v53, %v4800_v62  ;;  %v4942_v27 = vmul.f32 %v4763_v48, %v4814_v13  ;;  %v4946_v31 = vmul.f32 %v4789_v17, %v4921_v49  ;;  %v4950_v24 = vmul.f32 %v4617_v3, %v4921_v49 }
 0x175   : > { %6500 = vst [vmem:[#allocation70_spill] sm:$0xff] %v4934_v19  ;;  %v1524_v18 = vld [vmem:[#allocation2 + $0x40] sm:$0xfe]  ;;  %v4954_v46 = vmul.f32 %v4742_v23, %v4844_v12  ;;  %v4958_v32 = vmul.f32 %v4758_v40, %v4827_v59  ;;  %v4968_v33 = vmul.f32 %v4792_v9, %v4934_v19  ;;  %v4972_v51 = vmul.f32 %v4811_v58, %v4934_v19 }
 0x176   : > { %v4961_v26 = vmul.f32 %v4661_v42, %v1524_v18  ;;  %965 = vrot.lane.b32.xlu1 %v936_v15, %s4031_s14  ;;  %1102 = vrot.lane.b32.xlu0 %v1064_v38, %s4032_s15  ;;  %v938_v44 = vmul.f32 %v6502_v41, %v4844_v12  ;;  %v6503_v42 = vld [vmem:[#allocation30_spill] sm:$0xff]  ;;  %v1304_v10 = vrot.slane %v1288_v0, 1  ;;  %v4978_v21 = vld [vmem:[#allocation2 + $0x50] sm:$0xfe]  ;;  %v4982_v15 = vmul.f32 %v4776_v45, %v4827_v59 }
 0x177   : > { %v1062_v36 = vmul.f32 %v6503_v42, %v4827_v59  ;;  %6504 = vst [vmem:[#allocation72_spill] sm:$0xff] %v4978_v21  ;;  %v1306_v38 = vrot.slane %v4928_v20, 1  ;;  %v1435_v4 = vrot.slane %v4938_v11, 1  ;;  %v4987_v6 = vmul.f32 %v4803_v2, %v1524_v18 }
 0x178   : > { %6501 = vst [vmem:[#allocation71_spill] sm:$0xff] %v4961_v26  ;;  %v4991_v41 = vmul.f32 %v4771_v60, %v4844_v12  ;;  %v1700_v42 = vrot.slane %v4946_v31, 2  ;;  %v1702_v20 = vrot.slane %v4968_v33, 2  ;;  %v1850_v11 = vrot.slane %v4950_v24, 2 }
 0x179   : > { %v5004_v19 = vmul.f32 %v4806_v22, %v4978_v21  ;;  %v5008_v28 = vmul.f32 %v4821_v30, %v1524_v18  ;;  %v5021_v24 = vmul.f32 %v4755_v57, %v4869_v63  ;;  %v5025_v26 = vmul.f32 %v4600_v53, %v4853_v56 }
 0x17a   : > { %969 = vrot.lane.b32.xlu1 %v938_v44, %s4031_s14  ;;  %1098 = vrot.lane.b32.xlu0 %v1062_v36, %s4032_s15  ;;  %v5012_v44 = vmul.f32 %v4781_v1, %v4978_v21  ;;  %v5016_v36 = vmul.f32 %v4745_v47, %v4853_v56  ;;  %v5029_v18 = vmul.f32 %v4758_v40, %v4880_v7 }
 0x17b   : > { %v5034_v47 = vmul.f32 %v4763_v48, %v4869_v63  ;;  %v5038_v33 = vmul.f32 %v4771_v60, %v4903_v34  ;;  %v5042_v57 = vmul.f32 %v4742_v23, %v4903_v34  ;;  %v6402_v40 = vrot.slane %v5025_v26, 1 }
 0x17c   : > { %v6401_v5 = vrot.slane %v5016_v36, 1  ;;  %v5051_v48 = vmul.f32 %v4776_v45, %v4880_v7  ;;  %v6506_v31 = vrot.slane %v5021_v24, 1  ;;  %v5074_v0 = vmul.f32 %v4617_v3, %v4853_v56 }
 0x17d   : > { %6505 = vst [vmem:[#allocation73_spill] sm:$0xff] %v5042_v57  ;;  %v5064_v53 = vsel %vm1219_vm2, %v1435_v4, %v6402_v40  ;;  %v5085_v40 = vmul.f32 %v4789_v17, %v4853_v56  ;;  %v5093_v60 = vmul.f32 %v4792_v9, %v4869_v63  ;;  %v6521_v3 = vrot.slane %v4958_v32, 1 }
 0x17e   : > { %1316 = vrot.lane.b32.xlu1 %v1304_v10, %s4031_s14  ;;  %1720 = vrot.lane.b32.xlu0 %v1700_v42, %s4031_s14  ;;  %v5058_v23 = vsel %vm1219_vm2, %v1304_v10, %v6401_v5  ;;  %v5069_v45 = vsel %vm1219_vm2, %v1306_v38, %v6506_v31  ;;  %6508 = vst [vmem:[#allocation75_spill] sm:$0xff] %v5074_v0  ;;  %v6509_v10 = vrot.slane %v5034_v47, 1  ;;  %v6510_v5 = vrot.slane %v4942_v27, 1 }
 0x17f   : > { %6507 = vst [vmem:[#allocation74_spill] sm:$0xff] %v5069_v45  ;;  %v5089_v31 = vmul.f32 %v4811_v58, %v4869_v63  ;;  %v6515_v58 = vrot.slane %v5051_v48, 1  ;;  %v1307_v45 = vrot.slane %v4991_v41, 1  ;;  %v5157_v41 = vmul.f32 %v4858_v50, %v4853_v56 }
 0x180   : > { %v5081_v21 = vsel %vm1219_vm2, %v6510_v5, %v6509_v10  ;;  %v6512_v5 = vrot.slane %v5042_v57, 1  ;;  %v6513_v10 = vrot.slane %v4954_v46, 1 }
 0x181   : > { %6511 = vst [vmem:[#allocation76_spill] sm:$0xff] %v5081_v21  ;;  %v6516_v21 = vrot.slane %v4982_v15, 1 }
 0x182   : > { %1320 = vrot.lane.b32.xlu1 %v1306_v38, %s4031_s14  ;;  %1724 = vrot.lane.b32.xlu0 %v1702_v20, %s4031_s14  ;;  %v5103_v17 = vsel %vm1219_vm2, %v6513_v10, %v6512_v5  ;;  %v5114_v38 = vmul.f32 %v4803_v2, %v4880_v7  ;;  %v5121_v5 = vmul.f32 %v4806_v22, %v4903_v34  ;;  %v6520_v2 = vrot.slane %v5029_v18, 1 }
 0x183   : > { %6514 = vst [vmem:[#allocation77_spill] sm:$0xff] %v5103_v17  ;;  %v5110_v9 = vsel %vm1219_vm2, %v6516_v21, %v6515_v58  ;;  %v6518_v17 = vrot.slane %v5074_v0, 2  ;;  %v6523_v22 = vrot.slane %v5085_v40, 2  ;;  %v6524_v0 = vrot.slane %v5089_v31, 2 }
 0x184   : > { %6517 = vst [vmem:[#allocation78_spill] sm:$0xff] %v5110_v9  ;;  %v5135_v57 = vsel %vm1219_vm2, %v6521_v3, %v6520_v2  ;;  %v6526_v9 = vrot.slane %v5093_v60, 2  ;;  %v6527_v2 = vrot.slane %v5114_v38, 2  ;;  %v6533_v3 = vld [vmem:[#allocation38_spill] sm:$0xff] }
 0x185   : > { %v5127_v21 = vsel %vm1597_vm3, %v1850_v11, %v6518_v17  ;;  %6522 = vst [vmem:[#allocation80_spill] sm:$0xff] %v5135_v57  ;;  %v5141_v10 = vsel %vm1597_vm3, %v1700_v42, %v6523_v22  ;;  %v6525_v17 = vrot.slane %v4972_v51, 2  ;;  %v6528_v22 = vrot.slane %v4987_v6, 2 }
 0x186   : > { %6519 = vst [vmem:[#allocation79_spill] sm:$0xff] %v5127_v21  ;;  %v5153_v21 = vsel %vm1597_vm3, %v1702_v20, %v6526_v9  ;;  %1450 = vrot.lane.b32.xlu1 %v1435_v4, %s4032_s15  ;;  %1875 = vrot.lane.b32.xlu0 %v1850_v11, %s4032_s15  ;;  %v6529_v20 = vrot.slane %v5038_v33, 1  ;;  %v5178_v4 = vmul.f32 %v4821_v30, %v4880_v7  ;;  %v6535_v57 = vrot.slane %v5121_v5, 2 }
 0x187   : > { %v5148_v58 = vsel %vm1597_vm3, %v6525_v17, %v6524_v0  ;;  %v5167_v42 = vsel %vm1597_vm3, %v6528_v22, %v6527_v2  ;;  %v5182_v11 = vmul.f32 %v4781_v1, %v4903_v34  ;;  %v1617_v2 = vrot.slane %v6533_v3, 2  ;;  %v6534_v22 = vld [vmem:[#allocation50_spill] sm:$0xff] }
 0x188   : > { %v5174_v17 = vsel %vm1219_vm2, %v1307_v45, %v6529_v20  ;;  %6531 = vst [vmem:[#allocation82_spill] sm:$0xff] %v5178_v4  ;;  %v1148_v9 = vadd.f32 %v6534_v22, %v4897_v39  ;;  %v1147_v0 = vadd.f32 %v4735_v14, %v4919_v35  ;;  %v6536_v20 = vrot.slane %v5004_v19, 2 }
 0x189   : > { %6530 = vst [vmem:[#allocation81_spill] sm:$0xff] %v5174_v17  ;;  %6532 = vst [vmem:[#allocation83_spill] sm:$0xff] %v5182_v11  ;;  %v1576_v30 = vmul.f32 %v4667_v43, %v4903_v34  ;;  %v1145_v1 = vadd.f32 %v4749_v54, %v4899_v16  ;;  %v6415_v39 = vrot.slane %v5182_v11, 2  ;;  %v1146_v14 = vadd.f32 %v4752_v52, %v4906_v37  ;;  %v6539_v16 = vld [vmem:[#allocation44_spill] sm:$0xff] }
 0x18a   : > { %v5194_v17 = vsel %vm1597_vm3, %v6536_v20, %v6535_v57  ;;  %v6537_v35 = vrot.slane %v4942_v27, 1  ;;  %v6538_v57 = vrot.slane %v4972_v51, 2  ;;  %v1200_v22 = vmul.f32 %v4840_v8, %v4800_v62 }
 0x18b   : > { %v1201_v54 = vmul.f32 %v4865_v55, %v4827_v59  ;;  %v1619_v20 = vrot.slane %v6539_v16, 2  ;;  %v5217_v3 = vmul.f32 %v4858_v50, %v4921_v49  ;;  %v1605_v37 = vrot.slane %v5157_v41, 2 }
 0x18c   : > { %1454 = vrot.lane.b32.xlu1 %v6537_v35, %s4032_s15  ;;  %1879 = vrot.lane.b32.xlu0 %v6538_v57, %s4032_s15  ;;  %v6540_v52 = vrot.slane %v5012_v44, 2  ;;  %v6542_v27 = vrot.slane %v5178_v4, 2  ;;  %v6543_v35 = vrot.slane %v5008_v28, 2  ;;  %v1221_v16 = vrot.slane %v1200_v22, 1 }
 0x18d   : > { %v1222_v62 = vrot.slane %v1201_v54, 1  ;;  %v1202_v50 = vmul.f32 %v4894_v61, %v4814_v13  ;;  %v1203_v49 = vmul.f32 %v4643_v29, %v4844_v12  ;;  %v1607_v41 = vrot.slane %v4910_v25, 2 }
 0x18e   : > { %v5225_v51 = vsel %vm1597_vm3, %v6540_v52, %v6415_v39  ;;  %v5232_v57 = vsel %vm1597_vm3, %v6543_v35, %v6542_v27  ;;  %v1611_v11 = vrot.slane %v1576_v30, 2  ;;  %v6545_v52 = vld [vmem:[#allocation70_spill] sm:$0xff]  ;;  %v6546_v39 = vld [vmem:[#allocation41_spill] sm:$0xff]  ;;  %v6548_v22 = vrot.slane %v4954_v46, 1 }
 0x18f   : > { %6541 = vst [vmem:[#allocation38_spill] sm:$0xff] %v5225_v51  ;;  %6544 = vst [vmem:[#allocation50_spill] sm:$0xff] %v5232_v57  ;;  %v5241_v59 = vmul.f32 %v6546_v39, %v6545_v52  ;;  %v6547_v51 = vld [vmem:[#allocation72_spill] sm:$0xff]  ;;  %v6549_v54 = vrot.slane %v4958_v32, 1  ;;  %v5253_v27 = vadd.f32 %v1221_v16, %v1145_v1  ;;  %v5255_v25 = vadd.f32 %v1222_v62, %v1146_v14  ;;  %v6550_v57 = vld [vmem:[#allocation71_spill] sm:$0xff] }
 0x190   : > { %v5245_v4 = vmul.f32 %v4667_v43, %v6547_v51  ;;  %1456 = vrot.lane.b32.xlu1 %v6548_v22, %s4032_s15  ;;  %v1223_v30 = vrot.slane %v1202_v50, 1  ;;  %v1224_v35 = vrot.slane %v1203_v49, 1  ;;  %v6424_v52 = vrot.slane %v5217_v3, 2 }
 0x191   : > { %1318 = vrot.lane.b32.xlu0 %v6549_v54, %s4031_s14  ;;  %v6423_v13 = vrot.slane %v6550_v57, 2  ;;  %v6426_v43 = vrot.slane %v5241_v59, 2  ;;  %v5267_v32 = vmul.f32 %v4840_v8, %v4853_v56  ;;  %v5271_v1 = vmul.f32 %v4865_v55, %v4880_v7 }
 0x192   : > { %v6425_v51 = vrot.slane %v5245_v4, 2  ;;  %v5261_v46 = vadd.f32 %v1223_v30, %v1147_v0  ;;  %v5263_v22 = vadd.f32 %v1224_v35, %v1148_v9  ;;  %v5275_v14 = vmul.f32 %v4894_v61, %v4869_v63  ;;  %v6551_v0 = vld [vmem:[#allocation67_spill] sm:$0xff]  ;;  %v6554_v61 = vld [vmem:[#allocation69_spill] sm:$0xff] }
 0x193   : > { %v5279_v50 = vmul.f32 %v4643_v29, %v4903_v34  ;;  %v6552_v49 = vrot.slane %v6551_v0, 2  ;;  %v5287_v56 = vsel %vm1597_vm3, %v1607_v41, %v1617_v2  ;;  %v6553_v8 = vrot.slane %v4987_v6, 2 }
 0x194   : > { %v6422_v55 = vrot.slane %v5267_v32, 1  ;;  %v6421_v7 = vrot.slane %v5271_v1, 1  ;;  %v1575_v29 = vmul.f32 %v6546_v39, %v4869_v63  ;;  %v6555_v34 = vrot.slane %v6554_v61, 2 }
 0x195   : > { %v5284_v9 = vsel %vm1597_vm3, %v1605_v37, %v6552_v49  ;;  %1722 = vrot.lane.b32.xlu1 %v6553_v8, %s4031_s14  ;;  %1322 = vrot.lane.b32.xlu0 %v1307_v45, %s4031_s14  ;;  %v6420_v2 = vrot.slane %v5275_v14, 1  ;;  %v6419_v0 = vrot.slane %v5279_v50, 1  ;;  %v5307_v6 = vsel %vm1597_vm3, %v6425_v51, %v1611_v11 }
 0x196   : > { %v5300_v54 = vsel %vm1597_vm3, %v1611_v11, %v6555_v34  ;;  %6556 = vst [vmem:[#allocation44_spill] sm:$0xff] %v5307_v6  ;;  %v5312_v45 = vsel %vm1597_vm3, %v6424_v52, %v1605_v37  ;;  %v5317_v63 = vsel %vm1219_vm2, %v1221_v16, %v6422_v55  ;;  %v5322_v39 = vsel %vm1219_vm2, %v1222_v62, %v6421_v7  ;;  %v6564_v34 = vld [vmem:[#allocation22_spill] sm:$0xff]  ;;  %v6617_v7 = vld [vmem:[#allocation55_spill] sm:$0xff] }
 0x197   : > { %v1609_v49 = vrot.slane %v1575_v29, 2  ;;  %v5327_v11 = vsel %vm1597_vm3, %v6423_v13, %v1607_v41  ;;  %v5332_v37 = vsel %vm1219_vm2, %v1223_v30, %v6420_v2  ;;  %v5337_v16 = vsel %vm1219_vm2, %v1224_v35, %v6419_v0  ;;  %v5359_v29 = vld [vmem:[#allocation2 + $0x70] sm:$0x7f]  ;;  %v6618_v13 = vld [vmem:[#allocation59_spill] sm:$0xff] }
 0x198   : > { %6557 = vst [vmem:[#allocation70_spill] sm:$0xff] %v5327_v11  ;;  %v6558_v62 = vrot.slane %v5004_v19, 2  ;;  %v6559_v8 = vrot.slane %v4982_v15, 1  ;;  %v6561_v35 = vrot.slane %v5008_v28, 2  ;;  %v6562_v19 = vrot.slane %v5012_v44, 2  ;;  %v6565_v44 = vld [vmem:[#allocation25_spill] sm:$0xff] }
 0x199   : > { %v5346_v41 = vsel %vm1597_vm3, %v1609_v49, %v1619_v20  ;;  %v5351_v30 = vsel %vm1597_vm3, %v6426_v43, %v1609_v49  ;;  %v5361_v15 = vld [vmem:[#allocation2 + $0x68] sm:$0x7f]  ;;  %v6563_v20 = vld [vmem:[#allocation23_spill] sm:$0xff]  ;;  %v5371_v49 = vld [vmem:[#allocation2 + $0x78] sm:$0x7f] }
 0x19a   : > { %1726 = vrot.lane.b32.xlu1 %v6558_v62, %s4031_s14  ;;  %1452 = vrot.lane.b32.xlu0 %v6559_v8, %s4032_s15  ;;  %6560 = vst [vmem:[#allocation41_spill] sm:$0xff] %v5351_v30  ;;  %v940_v61 = vmul.f32 %v6563_v20, %v5359_v29  ;;  %v939_v62 = vmul.f32 %v6564_v34, %v5361_v15  ;;  %v5369_v28 = vld [vmem:[#allocation2 + $0x80] sm:$0x7f]  ;;  %v6567_v20 = vld [vmem:[#allocation30_spill] sm:$0xff]  ;;  %v6569_v0 = vld [vmem:[#allocation29_spill] sm:$0xff] }
 0x19b   : > { %v942_v8 = vmul.f32 %v6565_v44, %v5369_v28  ;;  %v1067_v34 = vmul.f32 %v6567_v20, %v5359_v29  ;;  %v1068_v44 = vmul.f32 %v6569_v0, %v5371_v49  ;;  %v6572_v20 = vrot.slane %v5021_v24, 1  ;;  %v6578_v24 = vld [vmem:[#allocation76_spill] sm:$0xff]  ;;  %v6616_v2 = vld [vmem:[#allocation65_spill] sm:$0xff] }
 0x19c   : > { %v6574_v0 = vrot.slane %v5029_v18, 1  ;;  %v6579_v18 = vld [vmem:[#allocation73_spill] sm:$0xff]  ;;  %v885_v55 = vmul.f32 %v6617_v7, %v6616_v2 }
 0x19d   : > { %v6622_v2 = vld [vmem:[#allocation49_spill] sm:$0xff] }
 0x19e   : > { %1877 = vrot.lane.b32.xlu1 %v6561_v35, %s4032_s15  ;;  %1881 = vrot.lane.b32.xlu0 %v6562_v19, %s4032_s15  ;;  %v6566_v35 = vld [vmem:[#allocation24_spill] sm:$0xff] }
 0x19f   : > { %v941_v19 = vmul.f32 %v6566_v35, %v5371_v49  ;;  %v6570_v35 = vrot.slane %v5016_v36, 1  ;;  %v6575_v36 = vrot.slane %v5034_v47, 1  ;;  %v6580_v47 = vrot.slane %v6579_v18, 1 }
 0x1a2   : > { %973 = vrot.lane.b32.xlu1 %v940_v61, %s4031_s14  ;;  %971 = vrot.lane.b32.xlu0 %v939_v62, %s4031_s14  ;;  %v6568_v61 = vld [vmem:[#allocation27_spill] sm:$0xff] }
 0x1a3   : > { %v1066_v62 = vmul.f32 %v6568_v61, %v5361_v15  ;;  %v6576_v61 = vrot.slane %v5038_v33, 1  ;;  %v6581_v33 = vrot.slane %v5051_v48, 1  ;;  %v6587_v48 = vrot.slane %v5085_v40, 2 }
 0x1a4   : > { %v6591_v40 = vrot.slane %v5093_v60, 2  ;;  %v6598_v60 = vrot.slane %v5089_v31, 2 }
 0x1a6   : > { %977 = vrot.lane.b32.xlu1 %v942_v8, %s4031_s14  ;;  %975 = vrot.lane.b32.xlu0 %v941_v19, %s4031_s14  ;;  %v6571_v8 = vld [vmem:[#allocation28_spill] sm:$0xff] }
 0x1a7   : > { %v1069_v19 = vmul.f32 %v6571_v8, %v5369_v28  ;;  %v6585_v8 = vld [vmem:[#allocation40_spill] sm:$0xff] }
 0x1aa   : > { %1108 = vrot.lane.b32.xlu1 %v1067_v34, %s4032_s15  ;;  %1106 = vrot.lane.b32.xlu0 %v1066_v62, %s4032_s15  ;;  %v6573_v34 = vrot.slane %v5025_v26, 1  ;;  %v6577_v26 = vld [vmem:[#allocation74_spill] sm:$0xff] }
 0x1ab   : > { %v6582_v62 = vld [vmem:[#allocation66_spill] sm:$0xff] }
 0x1ae   : > { %1332 = vrot.lane.b32.xlu1 %v6570_v35, %s4031_s14  ;;  %1110 = vrot.lane.b32.xlu0 %v1068_v44, %s4032_s15  ;;  %v6583_v44 = vld [vmem:[#allocation56_spill] sm:$0xff]  ;;  %v6584_v35 = vld [vmem:[#allocation79_spill] sm:$0xff] }
 0x1b2   : > { %1336 = vrot.lane.b32.xlu1 %v6572_v20, %s4031_s14  ;;  %1112 = vrot.lane.b32.xlu0 %v1069_v19, %s4032_s15  ;;  %v6586_v19 = vld [vmem:[#allocation57_spill] sm:$0xff] }
 0x1b3   : > { %v1686_v20 = vmul.f32 %v6586_v19, %v6585_v8  ;;  %v6596_v19 = vld [vmem:[#allocation37_spill] sm:$0xff] }
 0x1b6   : > { %1470 = vrot.lane.b32.xlu1 %v6573_v34, %s4032_s15  ;;  %1334 = vrot.lane.b32.xlu0 %v6574_v0, %s4031_s14  ;;  %v1716_v0 = vrot.slane %v1686_v20, 2  ;;  %v6597_v20 = vld [vmem:[#allocation60_spill] sm:$0xff] }
 0x1b8   : > { %v1717_v18 = vsel %vm1597_vm3, %v6591_v40, %v1716_v0 }
 0x1ba   : > { %1474 = vrot.lane.b32.xlu1 %v6575_v36, %s4032_s15  ;;  %1338 = vrot.lane.b32.xlu0 %v6576_v61, %s4031_s14  ;;  %v6588_v36 = vld [vmem:[#allocation31_spill] sm:$0xff] }
 0x1bb   : > { %v1830_v61 = vmul.f32 %v6588_v36, %v6582_v62  ;;  %v6599_v36 = vld [vmem:[#allocation68_spill] sm:$0xff] }
 0x1be   : > { %1324 = vrot.lane.b32.xlu1 %v5058_v23, %s4031_s14  ;;  %1460 = vrot.lane.b32.xlu0 %v5064_v53, %s4032_s15  ;;  %v1684_v23 = vmul.f32 %v6583_v44, %v6582_v62 }
 0x1c0   : > { %v1712_v53 = vrot.slane %v1684_v23, 2  ;;  %v6594_v23 = vld [vmem:[#allocation75_spill] sm:$0xff] }
 0x1c2   : > { %1328 = vrot.lane.b32.xlu1 %v6577_v26, %s4031_s14  ;;  %1464 = vrot.lane.b32.xlu0 %v6578_v24, %s4032_s15  ;;  %v1713_v34 = vsel %vm1597_vm3, %v6587_v48, %v1712_v53  ;;  %v5443_v26 = vpop.permute.xlu1 %1883  ;;  %v5445_v24 = vpop.permute.xlu0 %1458 }
 0x1c6   : > { %1476 = vrot.lane.b32.xlu1 %v6580_v47, %s4032_s15  ;;  %1472 = vrot.lane.b32.xlu0 %v6581_v33, %s4032_s15  ;;  %v1865_v47 = vrot.slane %v1830_v61, 2  ;;  %v6592_v33 = vld [vmem:[#allocation78_spill] sm:$0xff]  ;;  %v5455_v62 = vpop.permute.xlu1 %1893  ;;  %v5462_v48 = vpop.permute.xlu0 %1478  ;;  %v6600_v61 = vld [vmem:[#allocation61_spill] sm:$0xff] }
 0x1c7   : > { %6593 = vst [vmem:[#allocation72_spill] sm:$0xff] %v5455_v62 }
 0x1ca   : > { %1885 = vrot.lane.b32.xlu1 %v6584_v35, %s4032_s15  ;;  %1728 = vrot.lane.b32.xlu0 %v5141_v10, %s4031_s14  ;;  %v6589_v10 = vld [vmem:[#allocation77_spill] sm:$0xff]  ;;  %v6595_v35 = vrot.slane %v6594_v23, 2 }
 0x1cc   : > { %v1866_v53 = vsel %vm1597_vm3, %v6595_v35, %v1865_v47  ;;  %v828_v35 = vld [vmem:[#allocation2] sm:$0x80] }
 0x1ce   : > { %1889 = vrot.lane.b32.xlu1 %v5148_v58, %s4032_s15  ;;  %1732 = vrot.lane.b32.xlu0 %v5153_v21, %s4031_s14  ;;  %v6590_v58 = vld [vmem:[#allocation62_spill] sm:$0xff] }
 0x1cf   : > { %v1832_v21 = vmul.f32 %v6590_v58, %v6585_v8  ;;  %v1685_v8 = vmul.f32 %v6597_v20, %v6596_v19  ;;  %v5475_v58 = vpop.permute.xlu1 %1903 }
 0x1d0   : > { %6601 = vst [vmem:[#allocation71_spill] sm:$0xff] %v5475_v58  ;;  %v6625_v58 = vld [vmem:[#allocation58_spill] sm:$0xff] }
 0x1d1   : > { %v1869_v44 = vrot.slane %v1832_v21, 2  ;;  %v1714_v0 = vrot.slane %v1685_v8, 2  ;;  %v5477_v21 = vpop.permute.xlu0 %1468  ;;  %v6606_v8 = vrot.slane %v5121_v5, 2 }
 0x1d2   : > { %1466 = vrot.lane.b32.xlu1 %v6589_v10, %s4032_s15  ;;  %1736 = vrot.lane.b32.xlu0 %v1713_v34, %s4031_s14  ;;  %v1687_v10 = vmul.f32 %v6600_v61, %v6599_v36 }
 0x1d3   : > { %v1870_v34 = vsel %vm1597_vm3, %v6598_v60, %v1869_v44  ;;  %v6605_v44 = vld [vmem:[#allocation32_spill] sm:$0xff] }
 0x1d4   : > { %v1718_v31 = vrot.slane %v1687_v10, 2  ;;  %v878_v10 = vmul.f32 %v6605_v44, %v828_v35 }
 0x1d6   : > { %1462 = vrot.lane.b32.xlu1 %v6592_v33, %s4032_s15  ;;  %1740 = vrot.lane.b32.xlu0 %v1717_v18, %s4031_s14  ;;  %v6603_v18 = vld [vmem:[#allocation64_spill] sm:$0xff]  ;;  %v1719_v60 = vsel %vm1597_vm3, %v6606_v8, %v1718_v31  ;;  %v6611_v31 = vld [vmem:[#allocation38_spill] sm:$0xff] }
 0x1d7   : > { %v1831_v47 = vmul.f32 %v6603_v18, %v6596_v19  ;;  %v6604_v33 = vld [vmem:[#allocation80_spill] sm:$0xff]  ;;  %v6607_v19 = vld [vmem:[#allocation81_spill] sm:$0xff]  ;;  %v6613_v8 = vld [vmem:[#allocation26_spill] sm:$0xff] }
 0x1da   : > { %1730 = vrot.lane.b32.xlu1 %v5167_v42, %s4031_s14  ;;  %1895 = vrot.lane.b32.xlu0 %v1866_v53, %s4032_s15  ;;  %v6602_v42 = vrot.slane %v5114_v38, 2 }
 0x1dc   : > { %v1715_v40 = vsel %vm1597_vm3, %v6602_v42, %v1714_v0  ;;  %v6608_v0 = vld [vmem:[#allocation54_spill] sm:$0xff] }
 0x1dd   : > { %v1833_v61 = vmul.f32 %v6608_v0, %v6599_v36  ;;  %v6614_v36 = vld [vmem:[#allocation34_spill] sm:$0xff] }
 0x1de   : > { %1734 = vrot.lane.b32.xlu1 %v5194_v17, %s4031_s14  ;;  %1899 = vrot.lane.b32.xlu0 %v1870_v34, %s4032_s15  ;;  %v5487_v17 = vld [vmem:[#allocation2] sm:$0xff]  ;;  %v1867_v34 = vrot.slane %v1831_v47, 2  ;;  %v6612_v47 = vld [vmem:[#allocation20_spill] sm:$0xff] }
 0x1df   : > { %v883_v23 = vmul.f32 %v5487_v17, %v6605_v44  ;;  %v1204_v35 = vmul.f32 %v5487_v17, %v6614_v36 }
 0x1e0   : > { %v1097_v53 = vpop.permute.xlu1 %1096  ;;  %v964_v20 = vpop.permute.xlu0 %963 }
 0x1e1   : > { %v1008_v38 = vadd.f32 %v964_v20, %v883_v23 }
 0x1e2   : > { %1738 = vrot.lane.b32.xlu1 %v1715_v40, %s4031_s14  ;;  %1326 = vrot.lane.b32.xlu0 %v6604_v33, %s4031_s14  ;;  %v6609_v33 = vld [vmem:[#allocation82_spill] sm:$0xff] }
 0x1e3   : > { %v5500_v42 = vadd.f32 %v1097_v53, %v1008_v38  ;;  %v6610_v23 = vrot.slane %v6609_v33, 2  ;;  %v6615_v38 = vld [vmem:[#allocation35_spill] sm:$0xff] }
 0x1e4   : > { %v1101_v40 = vpop.permute.xlu1 %1100  ;;  %v968_v18 = vpop.permute.xlu0 %967  ;;  %v1003_v0 = vadd.f32 %v6615_v38, %v878_v10 }
 0x1e5   : > { %v1868_v5 = vsel %vm1597_vm3, %v6610_v23, %v1867_v34  ;;  %v6619_v34 = vld [vmem:[#allocation53_spill] sm:$0xff] }
 0x1e6   : > { %1742 = vrot.lane.b32.xlu1 %v1719_v60, %s4031_s14  ;;  %1330 = vrot.lane.b32.xlu0 %v6607_v19, %s4031_s14  ;;  %v2009_v60 = vrot.slane %v6613_v8, %v6612_v47  ;;  %v1871_v19 = vrot.slane %v1833_v61, 2  ;;  %v884_v23 = vmul.f32 %v6619_v34, %v6618_v13  ;;  %v6620_v61 = vld [vmem:[#allocation83_spill] sm:$0xff]  ;;  %v1144_v38 = vadd.f32 %v6622_v2, %v1003_v0  ;;  %v6623_v13 = vld [vmem:[#allocation33_spill] sm:$0xff] }
 0x1e7   : > { %v6621_v8 = vrot.slane %v6620_v61, 2  ;;  %v887_v43 = vmul.f32 %v6623_v13, %v4844_v12 }
 0x1e8   : > { %v966_v33 = vpop.permute.xlu1 %965 }
 0x1e9   : > { %v982_v52 = vsel %vm869_vm4, %v964_v20, %v966_v33  ;;  %v1872_v36 = vsel %vm1597_vm3, %v6621_v8, %v1871_v19  ;;  %v5528_v20 = vrot.slane %v1204_v35, 1  ;;  %v6627_v35 = vld [vmem:[#allocation51_spill] sm:$0xff] }
 0x1ea   : > { %1897 = vrot.lane.b32.xlu1 %v1868_v5, %s4032_s15  ;;  %1891 = vrot.lane.b32.xlu0 %v6611_v31, %s4032_s15  ;;  %v1103_v5 = vpop.permute.xlu0 %1102  ;;  %v983_v31 = vsel %vm869_vm4, %v966_v33, %v968_v18  ;;  %v1009_v51 = vadd.f32 %v982_v52, %v884_v23  ;;  %v6624_v33 = vld [vmem:[#allocation63_spill] sm:$0xff] }
 0x1eb   : > { %v1123_v47 = vsel %vm1116_vm5, %v1101_v40, %v1103_v5  ;;  %v1010_v10 = vadd.f32 %v983_v31, %v885_v55  ;;  %v886_v62 = vmul.f32 %v6625_v58, %v6624_v33  ;;  %v3891_v52 = vld [vmem:[%s6327_s5] sm:$0xf]  ;;  %v6626_v55 = vld [vmem:[#allocation21_spill] sm:$0xff]  ;;  %v1124_v31 = vsel %vm1116_vm5, %v1103_v5, %v6627_v35  ;;  %v6628_v33 = vld [vmem:[#allocation50_spill] sm:$0xff] }
 0x1ec   : > { %v970_v30 = vpop.permute.xlu1 %969  ;;  %v1250_v11 = vadd.f32 %v5528_v20, %v1144_v38 }
 0x1ed   : > { %v984_v19 = vsel %vm869_vm4, %v968_v18, %v970_v30  ;;  %v1012_v23 = vadd.f32 %v970_v30, %v887_v43 }
 0x1ee   : > { %2018 = vrot.lane.b32.xlu1 %v2009_v60, %s4031_s14  ;;  %1901 = vrot.lane.b32.xlu0 %v1872_v36, %s4032_s15  ;;  %v1099_v61 = vpop.permute.xlu0 %1098  ;;  %v2013_v60 = vrot.slane %v3891_v52, %v6626_v55  ;;  %v1011_v8 = vadd.f32 %v984_v19, %v886_v62 }
 0x1ef   : > { %v1121_v0 = vsel %vm1116_vm5, %v1097_v53, %v1099_v61  ;;  %v1122_v12 = vsel %vm1116_vm5, %v1099_v61, %v1101_v40  ;;  %v1153_v6 = vadd.f32 %v1124_v31, %v1012_v23 }
 0x1f0   : > { %v1150_v36 = vadd.f32 %v1121_v0, %v1009_v51  ;;  %v1151_v2 = vadd.f32 %v1122_v12, %v1010_v10  ;;  %v1152_v52 = vadd.f32 %v1123_v47, %v1011_v8  ;;  %v1317_v55 = vpop.permute.xlu1 %1316  ;;  %v1522_v51 = vld [vmem:[#allocation2 + $0x30] sm:$0xfe]  ;;  %v6629_v10 = vld [vmem:[#allocation36_spill] sm:$0xff] }
 0x1f1   : > { %v1364_v53 = vadd.f32 %v1317_v55, %v1250_v11  ;;  %v5551_v62 = vadd.f32 %v5337_v16, %v1153_v6  ;;  %v5558_v38 = vmul.f32 %v6629_v10, %v1522_v51 }
 0x1f2   : > { %1887 = vrot.lane.b32.xlu0 %v6628_v33, %s4032_s15  ;;  %v1721_v18 = vpop.permute.xlu0 %1720  ;;  %v5545_v43 = vadd.f32 %v5322_v39, %v1151_v2  ;;  %v5548_v30 = vadd.f32 %v5317_v63, %v1150_v36  ;;  %v5555_v40 = vadd.f32 %v5332_v37, %v1152_v52  ;;  %s3259_s15 = sshll.u32 %s488_s29, 4 }
 0x1f3   : > { %v6427_v63 = vrot.slane %v5558_v38, 2  ;;  %s490_s21 = scalar_lea.vmem [#allocation8], %s3259_s15 }
 0x1f4   : > { %v1321_v5 = vpop.permute.xlu1 %1320  ;;  %s3167_s26 = sshll.u32 %s490_s21, 4  ;;  %s6273_s26 = int_to_ptr.vmem [resolvable:$true] %s3167_s26 }
 0x1f5   : > { %s3951_s22 = scalar_lea.vmem %s6273_s26, 256 }
 0x1f6   : > { %2020 = vrot.lane.b32.xlu0 %v2013_v60, %s4031_s14  ;;  %v1725_v47 = vpop.permute.xlu0 %1724  ;;  %p3952_p10 = scmp.ne.s32.totalorder %s6273_s26, %s3951_s22 }
 0x1f8   : > { %v1451_v39 = vpop.permute.xlu1 %1450  ;;  %p3953_p2 = pnand %p3952_p10, %p6664_p1 }
 0x1f9   : > { %v1507_v19 = vadd.f32 %v1451_v39, %v1364_v53 }
 0x1fa   : > { %v1876_v61 = vpop.permute.xlu0 %1875  ;;  %p3954_p3 = pneg %p3953_p2 }
 0x1fb   : > { %v1638_v6 = vadd.f32 %v6427_v63, %v1507_v19 }
 0x1fd   : > { %v1768_v60 = vadd.f32 %v1721_v18, %v1638_v6 }
 0x1fe   : > { %v1455_v11 = vpop.permute.xlu1 %1454  ;;  %v1880_v16 = vpop.permute.xlu0 %1879 }
 0x1ff   : > { %v5563_v23 = vadd.f32 %v1876_v61, %v1768_v60 }
 0x202   : > { %v1457_v37 = vpop.permute.xlu1 %1456 }
 0x203   : > { %v1319_v0 = vpop.permute.xlu0 %1318  ;;  %v1482_v12 = vsel %vm1116_vm5, %v1455_v11, %v1457_v37 }
 0x204   : > { %v1340_v35 = vsel %vm869_vm4, %v1317_v55, %v1319_v0  ;;  %v1341_v31 = vsel %vm869_vm4, %v1319_v0, %v1321_v5  ;;  %v1483_v55 = vsel %vm1116_vm5, %v1457_v37, %v5445_v24  ;;  %v6632_v37 = vrot.slane %v5217_v3, 2  ;;  %v6634_v3 = vld [vmem:[#allocation46_spill] sm:$0xff] }
 0x205   : > { %v1365_v8 = vadd.f32 %v1340_v35, %v5253_v27  ;;  %v1366_v36 = vadd.f32 %v1341_v31, %v5255_v25 }
 0x207   : > { %v1723_v2 = vpop.permute.xlu1 %1722  ;;  %v1323_v33 = vpop.permute.xlu0 %1322 }
 0x208   : > { %v1744_v52 = vsel %vm869_vm4, %v1721_v18, %v1723_v2  ;;  %v1745_v53 = vsel %vm869_vm4, %v1723_v2, %v1725_v47  ;;  %v1342_v51 = vsel %vm869_vm4, %v1321_v5, %v1323_v33  ;;  %v1368_v6 = vadd.f32 %v1323_v33, %v5263_v22 }
 0x209   : > { %v1367_v19 = vadd.f32 %v1342_v51, %v5261_v46  ;;  %v6630_v2 = vrot.slane %v5241_v59, 2  ;;  %v6631_v46 = vrot.slane %v5245_v4, 2 }
 0x20a   : > { %v1511_v0 = vadd.f32 %v1483_v55, %v1368_v6 }
 0x20b   : > { %v1510_v60 = vadd.f32 %v1482_v12, %v1367_v19  ;;  %v6633_v19 = vrot.slane %v6550_v57, 2 }
 0x20c   : > { %v1727_v27 = vpop.permute.xlu1 %1726  ;;  %v1453_v35 = vpop.permute.xlu0 %1452  ;;  %v1642_v51 = vadd.f32 %v6631_v46, %v1511_v0 }
 0x20d   : > { %v1746_v25 = vsel %vm869_vm4, %v1725_v47, %v1727_v27  ;;  %v1480_v31 = vsel %vm1116_vm5, %v1451_v39, %v1453_v35  ;;  %v1481_v18 = vsel %vm1116_vm5, %v1453_v35, %v1455_v11  ;;  %v1641_v5 = vadd.f32 %v6630_v2, %v1510_v60 }
 0x20e   : > { %v1508_v22 = vadd.f32 %v1480_v31, %v1365_v8  ;;  %v1509_v33 = vadd.f32 %v1481_v18, %v1366_v36  ;;  %v1772_v24 = vadd.f32 %v1727_v27, %v1642_v51  ;;  %v6635_v27 = vld [vmem:[#allocation42_spill] sm:$0xff]  ;;  %v838_v51 = vld [vmem:[#allocation2 + $0x60] sm:$0x7f] }
 0x20f   : > { %v1771_v63 = vadd.f32 %v1746_v25, %v1641_v5  ;;  %v5598_v57 = vsel %vm869_vm4, %v6635_v27, %v6634_v3  ;;  %v6641_v5 = vld [vmem:[#allocation45_spill] sm:$0xff]  ;;  %v892_v27 = vmul.f32 %v6623_v13, %v5369_v28  ;;  %v2290_v28 = vld [vmem:[%s6328_s6 + $0x188] sm:$0xff]  ;;  %v2257_v13 = vld [vmem:[%s6328_s6 + $0x80] sm:$0xff] }
 0x210   : > { %v1639_v12 = vadd.f32 %v6632_v37, %v1508_v22  ;;  %v1640_v47 = vadd.f32 %v6633_v19, %v1509_v33  ;;  %v1878_v6 = vpop.permute.xlu1 %1877  ;;  %v1882_v39 = vpop.permute.xlu0 %1881  ;;  %6636 = vst [vmem:[#allocation67_spill] sm:$0xff] %v5598_v57 }
 0x211   : > { %v1905_v11 = vsel %vm1116_vm5, %v1876_v61, %v1878_v6  ;;  %v1906_v59 = vsel %vm1116_vm5, %v1878_v6, %v1880_v16  ;;  %v1907_v55 = vsel %vm1116_vm5, %v1880_v16, %v1882_v39  ;;  %v1908_v4 = vsel %vm1116_vm5, %v1882_v39, %v5443_v26 }
 0x212   : > { %v1769_v8 = vadd.f32 %v1744_v52, %v1639_v12  ;;  %v1770_v36 = vadd.f32 %v1745_v53, %v1640_v47  ;;  %v1935_v60 = vadd.f32 %v1907_v55, %v1771_v63  ;;  %v5593_v0 = vadd.f32 %v1908_v4, %v1772_v24  ;;  %v6638_v52 = vld [vmem:[#allocation43_spill] sm:$0xff] }
 0x213   : > { %v889_v16 = vmul.f32 %v6619_v34, %v5361_v15  ;;  %v6639_v53 = vld [vmem:[#allocation39_spill] sm:$0xff]  ;;  %v891_v15 = vmul.f32 %v6625_v58, %v5371_v49  ;;  %v888_v24 = vmul.f32 %v6605_v44, %v838_v51  ;;  %v890_v55 = vmul.f32 %v6617_v7, %v5359_v29 }
 0x214   : > { %v1933_v35 = vadd.f32 %v1905_v11, %v1769_v8  ;;  %v1934_v25 = vadd.f32 %v1906_v59, %v1770_v36  ;;  %v5601_v61 = vmul.f32 %v5598_v57, %v1935_v60  ;;  %v974_v31 = vpop.permute.xlu1 %973  ;;  %v972_v26 = vpop.permute.xlu0 %971  ;;  %v5608_v63 = vsel %vm869_vm4, %v6639_v53, %v6638_v52  ;;  %v6645_v52 = vld [vmem:[#allocation52_spill] sm:$0xff] }
 0x215   : > { %6640 = vst [vmem:[#allocation23_spill] sm:$0xff] %v5608_v63  ;;  %v985_v18 = vsel %vm869_vm4, %v972_v26, %v974_v31  ;;  %v1013_v19 = vadd.f32 %v972_v26, %v888_v24  ;;  %v6643_v8 = vrot.slane %v5267_v32, 1  ;;  %v6644_v7 = vrot.slane %v5271_v1, 1 }
 0x216   : > { %6637 = vst [vmem:[#allocation69_spill] sm:$0xff] %v5601_v61  ;;  %v5612_v2 = vmul.f32 %v5608_v63, %v1933_v35  ;;  %v5615_v46 = vmul.f32 %v6641_v5, %v1934_v25  ;;  %v1014_v22 = vadd.f32 %v985_v18, %v889_v16  ;;  %v2289_v18 = vld [vmem:[%s6328_s6 + $0x180] sm:$0xff] }
 0x218   : > { %6642 = vst [vmem:[#allocation22_spill] sm:$0xff] %v5615_v46  ;;  %v978_v33 = vpop.permute.xlu1 %977  ;;  %v976_v34 = vpop.permute.xlu0 %975 }
 0x219   : > { %v987_v37 = vsel %vm869_vm4, %v976_v34, %v978_v33  ;;  %v986_v39 = vsel %vm869_vm4, %v974_v31, %v976_v34  ;;  %v1017_v25 = vadd.f32 %v978_v33, %v892_v27  ;;  %v2258_v33 = vld [vmem:[%s6328_s6 + $0x88] sm:$0xff]  ;;  %v2276_v27 = vld [vmem:[%s6328_s6 + $0x118] sm:$0xff] }
 0x21a   : > { %v1016_v12 = vadd.f32 %v987_v37, %v891_v15  ;;  %v1015_v49 = vadd.f32 %v986_v39, %v890_v55  ;;  %v2273_v15 = vld [vmem:[%s6328_s6 + $0x100] sm:$0xff]  ;;  %v2274_v34 = vld [vmem:[%s6328_s6 + $0x108] sm:$0xff]  ;;  %v3533_v24 = vpack.c.bf16 %v2258_v33, %v2257_v13 }
 0x21b   : > { %v3567_v37 = vpack.c.bf16 %v2274_v34, %v2273_v15  ;;  %v2261_v13 = vld [vmem:[%s6328_s6 + $0xa0] sm:$0xff]  ;;  %v2278_v34 = vld [vmem:[%s6328_s6 + $0x128] sm:$0xff] }
 0x21c   : > { %v1109_v47 = vpop.permute.xlu1 %1108  ;;  %v1107_v6 = vpop.permute.xlu0 %1106  ;;  %3534 = vmatprep.subr.bf16.mxu0 %v3533_v24  ;;  %v2245_v24 = vld [vmem:[%s6328_s6 + $0x20] sm:$0xff] }
 0x21d   : > { %v1125_v11 = vsel %vm1116_vm5, %v1107_v6, %v1109_v47  ;;  %v5623_v59 = vadd.f32 %v1107_v6, %v1013_v19  ;;  %v2242_v19 = vld [vmem:[%s6328_s6 + $0x8] sm:$0xff] }
 0x21e   : > { %v1155_v4 = vadd.f32 %v1125_v11, %v1014_v22  ;;  %v3565_v22 = vpack.c.bf16 %v2290_v28, %v2289_v18  ;;  %v6646_v11 = vrot.slane %v5275_v14, 1  ;;  %v2260_v14 = vld [vmem:[%s6328_s6 + $0x98] sm:$0xff] }
 0x220   : > { %v5627_v58 = vpop.permute.xlu1 %1332  ;;  %v1111_v44 = vpop.permute.xlu0 %1110  ;;  %v5631_v36 = vadd.f32 %v6643_v8, %v1155_v4  ;;  %v6647_v4 = vrot.slane %v5279_v50, 1  ;;  %3566 = vmatprep.subr.bf16.mxu1 %v3565_v22  ;;  %v2292_v8 = vld [vmem:[%s6328_s6 + $0x198] sm:$0xff]  ;;  %v2275_v50 = vld [vmem:[%s6328_s6 + $0x110] sm:$0xff] }
 0x221   : > { %v1126_v60 = vsel %vm1116_vm5, %v1109_v47, %v1111_v44  ;;  %v2291_v47 = vld [vmem:[%s6328_s6 + $0x190] sm:$0xff]  ;;  %3568 = vmatpush3.bf16.msra.mxu1 %v3567_v37  ;;  %v2246_v37 = vld [vmem:[%s6328_s6 + $0x28] sm:$0xff] }
 0x222   : > { %v1156_v35 = vadd.f32 %v1126_v60, %v1015_v49  ;;  %v2259_v60 = vld [vmem:[%s6328_s6 + $0x90] sm:$0xff] }
 0x224   : > { %v5636_v31 = vpop.permute.xlu1 %1336  ;;  %v1113_v16 = vpop.permute.xlu0 %1112  ;;  %v5640_v29 = vadd.f32 %v6644_v7, %v1156_v35  ;;  %v2243_v35 = vld [vmem:[%s6328_s6 + $0x10] sm:$0xff]  ;;  %v2244_v7 = vld [vmem:[%s6328_s6 + $0x18] sm:$0xff] }
 0x225   : > { %v1127_v26 = vsel %vm1116_vm5, %v1111_v44, %v1113_v16  ;;  %v1128_v32 = vsel %vm1116_vm5, %v1113_v16, %v6645_v52  ;;  %v3537_v16 = vpack.c.bf16 %v2260_v14, %v2259_v60  ;;  %v2294_v52 = vld [vmem:[%s6328_s6 + $0x1a8] sm:$0xff]  ;;  %v3539_v18 = vpack.c.bf16 %v2244_v7, %v2243_v35  ;;  %v2279_v60 = vld [vmem:[%s6328_s6 + $0x130] sm:$0xff]  ;;  %v2280_v14 = vld [vmem:[%s6328_s6 + $0x138] sm:$0xff] }
 0x226   : > { %v1157_v1 = vadd.f32 %v1127_v26, %v1016_v12  ;;  %v1158_v51 = vadd.f32 %v1128_v32, %v1017_v25  ;;  %v2241_v12 = vld [vmem:[%s6328_s6] sm:$0xff]  ;;  %v3569_v25 = vpack.c.bf16 %v2292_v8, %v2291_v47  ;;  %v3571_v32 = vpack.c.bf16 %v2276_v27, %v2275_v50  ;;  %v2296_v47 = vld [vmem:[%s6328_s6 + $0x1b8] sm:$0xff]  ;;  %v2247_v27 = vld [vmem:[%s6328_s6 + $0x30] sm:$0xff] }
 0x227   : > { %v3535_v44 = vpack.c.bf16 %v2242_v19, %v2241_v12  ;;  %v2293_v26 = vld [vmem:[%s6328_s6 + $0x1a0] sm:$0xff]  ;;  %v2295_v19 = vld [vmem:[%s6328_s6 + $0x1b0] sm:$0xff]  ;;  %v2264_v8 = vld [vmem:[%s6328_s6 + $0xb8] sm:$0xff] }
 0x228   : > { %v5672_v6 = vpop.permute.xlu1 %1470  ;;  %v5674_v39 = vpop.permute.xlu0 %1334  ;;  %v5678_v55 = vadd.f32 %v6646_v11, %v1157_v1  ;;  %v5682_v49 = vadd.f32 %v6647_v4, %v1158_v51  ;;  %v3573_v28 = vpack.c.bf16 %v2294_v52, %v2293_v26  ;;  %v2262_v1 = vld [vmem:[%s6328_s6 + $0xa8] sm:$0xff]  ;;  %v2277_v51 = vld [vmem:[%s6328_s6 + $0x120] sm:$0xff]  ;;  %3570 = vmatprep.subr.bf16.mxu1 %v3569_v25  ;;  %v2263_v11 = vld [vmem:[%s6328_s6 + $0xb0] sm:$0xff]  ;;  %v3543_v4 = vpack.c.bf16 %v2246_v37, %v2245_v24 }
 0x229   : > { %3536 = vmatpush3.bf16.msra.mxu0 %v3535_v44  ;;  %v3541_v15 = vpack.c.bf16 %v2262_v1, %v2261_v13  ;;  %3572 = vmatpush3.bf16.msra.mxu1 %v3571_v32  ;;  %v3575_v12 = vpack.c.bf16 %v2278_v34, %v2277_v51  ;;  %v3577_v44 = vpack.c.bf16 %v2296_v47, %v2295_v19  ;;  %v2248_v35 = vld [vmem:[%s6328_s6 + $0x38] sm:$0xff]  ;;  %v2297_v25 = vld [vmem:[%s6328_s6 + $0x1c0] sm:$0xff]  ;;  %v2298_v26 = vld [vmem:[%s6328_s6 + $0x1c8] sm:$0xff] }
 0x22a   : > { %3538 = vmatprep.subr.bf16.mxu0 %v3537_v16  ;;  %3574 = vmatprep.subr.bf16.mxu1 %v3573_v28  ;;  %v3545_v50 = vpack.c.bf16 %v2264_v8, %v2263_v11  ;;  %v2265_v52 = vld [vmem:[%s6328_s6 + $0xc0] sm:$0xff]  ;;  %v2266_v32 = vld [vmem:[%s6328_s6 + $0xc8] sm:$0xff]  ;;  %v3547_v1 = vpack.c.bf16 %v2248_v35, %v2247_v27  ;;  %v3581_v51 = vpack.c.bf16 %v2298_v26, %v2297_v25  ;;  %v2299_v24 = vld [vmem:[%s6328_s6 + $0x1d0] sm:$0xff] }
 0x22b   : > { %v2281_v28 = vld [vmem:[%s6328_s6 + $0x140] sm:$0xff]  ;;  %v2282_v13 = vld [vmem:[%s6328_s6 + $0x148] sm:$0xff]  ;;  %v1346_v37 = vsel %vm869_vm4, %v5627_v58, %v5674_v39  ;;  %v2300_v19 = vld [vmem:[%s6328_s6 + $0x1d8] sm:$0xff] }
 0x22c   : > { %v5720_v22 = vpop.permute.xlu1 %1474  ;;  %v5722_v33 = vpop.permute.xlu0 %1338  ;;  %v2250_v34 = vld [vmem:[%s6328_s6 + $0x48] sm:$0xff]  ;;  %v2267_v47 = vld [vmem:[%s6328_s6 + $0xd0] sm:$0xff]  ;;  %v2268_v11 = vld [vmem:[%s6328_s6 + $0xd8] sm:$0xff]  ;;  %v3583_v27 = vpack.c.bf16 %v2282_v13, %v2281_v28  ;;  %v3585_v13 = vpack.c.bf16 %v2300_v19, %v2299_v24 }
 0x22d   : > { %3540 = vmatpush3.bf16.msra.mxu0 %v3539_v18  ;;  %3576 = vmatpush3.bf16.msra.mxu1 %v3575_v12  ;;  %v3579_v18 = vpack.c.bf16 %v2280_v14, %v2279_v60  ;;  %v3549_v12 = vpack.c.bf16 %v2266_v32, %v2265_v52  ;;  %v2283_v60 = vld [vmem:[%s6328_s6 + $0x150] sm:$0xff]  ;;  %v2284_v14 = vld [vmem:[%s6328_s6 + $0x158] sm:$0xff]  ;;  %v2301_v25 = vld [vmem:[%s6328_s6 + $0x1e0] sm:$0xff]  ;;  %v1375_v52 = vadd.f32 %v1346_v37, %v5631_v36 }
 0x22e   : > { %3542 = vmatprep.subr.bf16.mxu0 %v3541_v15  ;;  %3578 = vmatprep.subr.bf16.mxu1 %v3577_v44  ;;  %v2249_v15 = vld [vmem:[%s6328_s6 + $0x40] sm:$0xff]  ;;  %v2252_v35 = vld [vmem:[%s6328_s6 + $0x58] sm:$0xff]  ;;  %v2302_v26 = vld [vmem:[%s6328_s6 + $0x1e8] sm:$0xff]  ;;  %v1378_v28 = vadd.f32 %v5722_v33, %v5682_v49  ;;  %v3553_v61 = vpack.c.bf16 %v2268_v11, %v2267_v47  ;;  %v3587_v36 = vpack.c.bf16 %v2284_v14, %v2283_v60 }
 0x22f   : > { %v3551_v32 = vpack.c.bf16 %v2250_v34, %v2249_v15  ;;  %v3589_v63 = vpack.c.bf16 %v2302_v26, %v2301_v25  ;;  %v2285_v19 = vld [vmem:[%s6328_s6 + $0x160] sm:$0xff]  ;;  %v1527_v14 = vld [vmem:[#allocation2 + $0x90] sm:$0x1] }
 0x230   : > { %v5760_v16 = vpop.permute.xlu1 %1324  ;;  %v5762_v7 = vpop.permute.xlu0 %1460 }
 0x231   : > { %3544 = vmatpush3.bf16.msra.mxu0 %v3543_v4  ;;  %v1347_v4 = vsel %vm869_vm4, %v5674_v39, %v5636_v31  ;;  %v1348_v39 = vsel %vm869_vm4, %v5636_v31, %v5722_v33  ;;  %3580 = vmatpush3.bf16.msra.mxu1 %v3579_v18  ;;  %v1226_v31 = vsel %vm1219_vm2, %v5528_v20, %v5528_v20 }
 0x232   : > { %3546 = vmatprep.subr.bf16.mxu0 %v3545_v50  ;;  %v2251_v50 = vld [vmem:[%s6328_s6 + $0x50] sm:$0xff]  ;;  %3582 = vmatprep.subr.bf16.mxu1 %v3581_v51  ;;  %v1376_v18 = vadd.f32 %v1347_v4, %v5640_v29  ;;  %v1377_v57 = vadd.f32 %v1348_v39, %v5678_v55  ;;  %v2270_v29 = vld [vmem:[%s6328_s6 + $0xe8] sm:$0xff]  ;;  %v1255_v47 = vadd.f32 %v1226_v31, %v5500_v42 }
 0x233   : > { %v3555_v37 = vpack.c.bf16 %v2252_v35, %v2251_v50 }
 0x234   : > { %v5803_v44 = vpop.permute.xlu1 %1328  ;;  %v5805_v8 = vpop.permute.xlu0 %1464  ;;  %v1369_v50 = vadd.f32 %v5760_v16, %v1255_v47 }
 0x235   : > { %3548 = vmatpush3.bf16.msra.mxu0 %v3547_v1  ;;  %v2269_v1 = vld [vmem:[%s6328_s6 + $0xe0] sm:$0xff]  ;;  %3584 = vmatpush3.bf16.msra.mxu1 %v3583_v27 }
 0x236   : > { %3550 = vmatprep.subr.bf16.mxu0 %v3549_v12  ;;  %3586 = vmatprep.subr.bf16.mxu1 %v3585_v13  ;;  %v1512_v26 = vadd.f32 %v5762_v7, %v1369_v50 }
 0x238   : > { %v1477_v46 = vpop.permute.xlu1 %1476  ;;  %v1473_v5 = vpop.permute.xlu0 %1472 }
 0x239   : > { %v1490_v49 = vsel %vm1116_vm5, %v5720_v22, %v1477_v46  ;;  %v1491_v33 = vsel %vm1116_vm5, %v1477_v46, %v5462_v48  ;;  %v1488_v55 = vsel %vm1116_vm5, %v5672_v6, %v1473_v5  ;;  %v1489_v51 = vsel %vm1116_vm5, %v1473_v5, %v5720_v22  ;;  %3552 = vmatpush3.bf16.msra.mxu0 %v3551_v32  ;;  %v2286_v48 = vld [vmem:[%s6328_s6 + $0x168] sm:$0xff]  ;;  %v2253_v5 = vld [vmem:[%s6328_s6 + $0x60] sm:$0xff] }
 0x23a   : > { %v1520_v15 = vadd.f32 %v1490_v49, %v1377_v57  ;;  %v1521_v34 = vadd.f32 %v1491_v33, %v1378_v28  ;;  %v1518_v24 = vadd.f32 %v1488_v55, %v1375_v52  ;;  %v1519_v12 = vadd.f32 %v1489_v51, %v1376_v18  ;;  %3554 = vmatprep.subr.bf16.mxu0 %v3553_v61  ;;  %v2254_v22 = vld [vmem:[%s6328_s6 + $0x68] sm:$0xff] }
 0x23b   : > { %v1572_v46 = vmul.f32 %v5487_v17, %v6629_v10  ;;  %v3557_v57 = vpack.c.bf16 %v2270_v29, %v2269_v1  ;;  %3588 = vmatpush3.bf16.msra.mxu1 %v3587_v36  ;;  %v3591_v39 = vpack.c.bf16 %v2286_v48, %v2285_v19  ;;  %v3559_v27 = vpack.c.bf16 %v2254_v22, %v2253_v5  ;;  %v6650_v19 = vld [vmem:[#allocation47_spill] sm:$0xff] }
 0x23c   : > { %v5865_v11 = vpop.permute.xlu1 %1885  ;;  %v5867_v4 = vpop.permute.xlu0 %1728  ;;  %v5870_v60 = vadd.f32 %v5284_v9, %v1518_v24  ;;  %v5873_v17 = vadd.f32 %v5287_v56, %v1519_v12  ;;  %v5876_v42 = vadd.f32 %v5346_v41, %v1520_v15  ;;  %v5879_v61 = vadd.f32 %v5300_v54, %v1521_v34  ;;  %3590 = vmatprep.subr.bf16.mxu1 %v3589_v63  ;;  %v6648_v63 = vld [vmem:[#allocation48_spill] sm:$0xff] }
 0x23d   : > { %3556 = vmatpush3.bf16.msra.mxu0 %v3555_v37  ;;  %v1981_v9 = vmul.f32 %v6639_v53, %v5563_v23  ;;  %v1260_v56 = vadd.f32 %v5528_v20, %v5623_v59  ;;  %v1577_v41 = vmul.f32 %v6629_v10, %v1527_v14  ;;  %v1603_v35 = vrot.slane %v1572_v46, 2 }
 0x23e   : > { %3558 = vmatprep.subr.bf16.mxu0 %v3557_v57  ;;  %v6649_v20 = vrot.slane %v5558_v38, 2  ;;  %v5914_v48 = vsel %vm869_vm4, %v6648_v63, %v6650_v19 }
 0x23f   : > { %3592 = vmatpush3.bf16.msra.mxu1 %v3591_v39  ;;  %v5893_v52 = vadd.f32 %v6648_v63, %v1981_v9  ;;  %v1374_v23 = vadd.f32 %v5627_v58, %v1260_v56  ;;  %v1613_v31 = vrot.slane %v1577_v41, 2  ;;  %v5921_v47 = vadd.f32 %v5914_v48, %v5612_v2 }
 0x240   : > { %v5887_v54 = vpop.permute.xlu1 %1889  ;;  %v5889_v25 = vpop.permute.xlu0 %1732  ;;  %v1604_v59 = vsel %vm1597_vm3, %v6649_v20, %v1603_v35 }
 0x241   : > { %3560 = vmatpush3.bf16.msra.mxu0 %v3559_v27  ;;  %v1517_v18 = vadd.f32 %v5672_v6, %v1374_v23  ;;  %v1643_v28 = vadd.f32 %v1604_v59, %v1512_v26  ;;  %v3270_v13 = vmul.f32 -1.442695, %v5893_v52  ;;  %v1614_v37 = vsel %vm1597_vm3, %v1603_v35, %v1613_v31 }
 0x242   : > { %v3271_v41 = vmul.f32 -1.442695, %v5921_v47 }
 0x243   : > { %v1773_v36 = vadd.f32 %v5867_v4, %v1643_v28  ;;  %v1648_v49 = vadd.f32 %v1614_v37, %v1517_v18  ;;  %3822 = vpow2.f32 %v3270_v13  ;;  %v6651_v28 = vld [vmem:[#allocation70_spill] sm:$0xff] }
 0x244   : > { %v1467_v10 = vpop.permute.xlu1 %1466  ;;  %v1737_v32 = vpop.permute.xlu0 %1736 }
 0x245   : > { %v1937_v58 = vadd.f32 %v5865_v11, %v1773_v36  ;;  %v1778_v38 = vadd.f32 %v1737_v32, %v1648_v49  ;;  %v1486_v18 = vsel %vm1116_vm5, %v5805_v8, %v1467_v10 }
 0x247   : > { %v1986_v6 = vmul.f32 %v6639_v53, %v1937_v58  ;;  %v6652_v58 = vld [vmem:[#allocation44_spill] sm:$0xff] }
 0x248   : > { %v1463_v1 = vpop.permute.xlu1 %1462  ;;  %v1741_v29 = vpop.permute.xlu0 %1740 }
 0x249   : > { %v5917_v46 = vadd.f32 %v6648_v63, %v1986_v6  ;;  %v1484_v9 = vsel %vm1116_vm5, %v5762_v7, %v1463_v1 }
 0x24b   : > { %v3275_v27 = vmul.f32 -1.442695, %v5917_v46 }
 0x24c   : > { %v5904_v33 = vpop.permute.xlu1 %1730  ;;  %v1896_v55 = vpop.permute.xlu0 %1895 }
 0x24d   : > { %v1942_v51 = vadd.f32 %v1896_v55, %v1778_v38  ;;  %v1747_v6 = vsel %vm869_vm4, %v5867_v4, %v5904_v33 }
 0x24f   : > { %v1991_v15 = vmul.f32 %v6639_v53, %v1942_v51  ;;  %v3823_v53 = vpop.eup %3822  ;;  %v6653_v51 = vld [vmem:[#allocation41_spill] sm:$0xff] }
 0x250   : > { %v1735_v34 = vpop.permute.xlu1 %1734  ;;  %v1900_v24 = vpop.permute.xlu0 %1899  ;;  %v2090_v56 = vadd.f32 1.0, %v3823_v53 }
 0x251   : > { %v5909_v12 = vadd.f32 %v6648_v63, %v1991_v15  ;;  %v6654_v15 = vld [vmem:[#allocation23_spill] sm:$0xff] }
 0x253   : > { %v3280_v14 = vmul.f32 -1.442695, %v5909_v12 }
 0x254   : > { %v1739_v57 = vpop.permute.xlu1 %1738  ;;  %v1327_v5 = vpop.permute.xlu0 %1326 }
 0x255   : > { %v1343_v22 = vsel %vm869_vm4, %v5760_v16, %v1327_v5  ;;  %v1344_v50 = vsel %vm869_vm4, %v1327_v5, %v5803_v44  ;;  %v1485_v16 = vsel %vm1116_vm5, %v1463_v1, %v5805_v8  ;;  %v1750_v23 = vsel %vm869_vm4, %v1737_v32, %v1739_v57  ;;  %v6655_v5 = vld [vmem:[#allocation45_spill] sm:$0xff] }
 0x256   : > { %v1370_v39 = vadd.f32 %v1343_v22, %v5548_v30  ;;  %v1371_v2 = vadd.f32 %v1344_v50, %v5545_v43  ;;  %v1751_v30 = vsel %vm869_vm4, %v1739_v57, %v1741_v29  ;;  %3824 = vpow2.f32 %v3280_v14 }
 0x257   : > { %3826 = vpow2.f32 %v3275_v27  ;;  %v1487_v32 = vsel %vm1116_vm5, %v1467_v10, %v5477_v21  ;;  %v1779_v36 = vadd.f32 %v1750_v23, %v5870_v60 }
 0x258   : > { %v1513_v35 = vadd.f32 %v1484_v9, %v1370_v39  ;;  %v5936_v26 = vpop.permute.xlu1 %1742  ;;  %v1331_v63 = vpop.permute.xlu0 %1330  ;;  %v1514_v31 = vadd.f32 %v1485_v16, %v1371_v2  ;;  %3828 = vrcp.f32 %v2090_v56  ;;  %v6656_v56 = vld [vmem:[#allocation22_spill] sm:$0xff] }
 0x259   : > { %v1345_v7 = vsel %vm869_vm4, %v5803_v44, %v1331_v63  ;;  %v1373_v20 = vadd.f32 %v1331_v63, %v5551_v62  ;;  %v1780_v44 = vadd.f32 %v1751_v30, %v5873_v17  ;;  %3830 = vpow2.f32 %v3271_v41 }
 0x25a   : > { %v1372_v43 = vadd.f32 %v1345_v7, %v5555_v40  ;;  %v1644_v59 = vadd.f32 %v5312_v45, %v1513_v35  ;;  %v1645_v13 = vadd.f32 %v6651_v28, %v1514_v31  ;;  %v1752_v45 = vsel %vm869_vm4, %v1741_v29, %v5936_v26  ;;  %v6658_v31 = vld [vmem:[#allocation67_spill] sm:$0xff] }
 0x25b   : > { %v1516_v1 = vadd.f32 %v1487_v32, %v1373_v20  ;;  %v1985_v17 = vmul.f32 %v6634_v3, %v5593_v0  ;;  %v1749_v29 = vsel %vm869_vm4, %v5889_v25, %v1735_v34 }
 0x25c   : > { %v1515_v37 = vadd.f32 %v1486_v18, %v1372_v43  ;;  %v1898_v40 = vpop.permute.xlu1 %1897  ;;  %v1892_v49 = vpop.permute.xlu0 %1891 }
 0x25d   : > { %v1913_v62 = vsel %vm1116_vm5, %v1896_v55, %v1898_v40  ;;  %v1914_v8 = vsel %vm1116_vm5, %v1898_v40, %v1900_v24  ;;  %v1647_v21 = vadd.f32 %v6652_v58, %v1516_v1  ;;  %v1781_v55 = vadd.f32 %v1752_v45, %v5876_v42 }
 0x25e   : > { %v1943_v10 = vadd.f32 %v1913_v62, %v1779_v36  ;;  %v1944_v38 = vadd.f32 %v1914_v8, %v1780_v44  ;;  %v1646_v60 = vadd.f32 %v6653_v51, %v1515_v37  ;;  %v1911_v0 = vsel %vm1116_vm5, %v5887_v54, %v1892_v49 }
 0x25f   : > { %v1777_v39 = vadd.f32 %v1735_v34, %v1647_v21  ;;  %v1748_v42 = vsel %vm869_vm4, %v5904_v33, %v5889_v25  ;;  %v6657_v34 = vld [vmem:[#allocation72_spill] sm:$0xff] }
 0x260   : > { %v1992_v57 = vmul.f32 %v6654_v15, %v1943_v10  ;;  %v1993_v53 = vmul.f32 %v6655_v5, %v1944_v38  ;;  %v1776_v22 = vadd.f32 %v1749_v29, %v1646_v60  ;;  %v2019_v14 = vpop.permute.xlu1 %2018  ;;  %v1902_v50 = vpop.permute.xlu0 %1901  ;;  %v1912_v16 = vsel %vm1116_vm5, %v1892_v49, %v6657_v34 }
 0x261   : > { %v2023_v27 = vsel %vm869_vm4, %v6650_v19, %v2019_v14  ;;  %v1915_v4 = vsel %vm1116_vm5, %v1900_v24, %v1902_v50  ;;  %v1774_v19 = vadd.f32 %v1747_v6, %v1644_v59  ;;  %v3825_v23 = vpop.eup %3824  ;;  %v1941_v30 = vadd.f32 %v1912_v16, %v1777_v39  ;;  %v6659_v59 = vld [vmem:[#allocation71_spill] sm:$0xff] }
 0x262   : > { %v5977_v9 = vadd.f32 %v5914_v48, %v1992_v57  ;;  %v1940_v2 = vadd.f32 %v1911_v0, %v1776_v22  ;;  %v5980_v41 = vadd.f32 %v2023_v27, %v6656_v56  ;;  %v5984_v35 = vadd.f32 %v2023_v27, %v1993_v53  ;;  %v3827_v43 = vpop.eup %3826 }
 0x263   : > { %v1945_v63 = vadd.f32 %v1915_v4, %v1781_v55  ;;  %v1775_v32 = vadd.f32 %v1748_v42, %v1645_v13  ;;  %v1916_v36 = vsel %vm1116_vm5, %v1902_v50, %v6659_v59  ;;  %v5997_v1 = vpop.eup %3828  ;;  %v2100_v40 = vadd.f32 1.0, %v3825_v23 }
 0x264   : > { %v3281_v24 = vmul.f32 -1.442695, %v5977_v9  ;;  %v1989_v25 = vmul.f32 %v6658_v31, %v1940_v2  ;;  %v3272_v33 = vmul.f32 -1.442695, %v5980_v41  ;;  %v1888_v7 = vpop.permute.xlu0 %1887  ;;  %v3282_v20 = vmul.f32 -1.442695, %v5984_v35  ;;  %v3831_v58 = vpop.eup %3830 }
 0x265   : > { %v1994_v18 = vmul.f32 %v6658_v31, %v1945_v63  ;;  %v1909_v28 = vsel %vm1116_vm5, %v5865_v11, %v1888_v7  ;;  %v1910_v44 = vsel %vm1116_vm5, %v1888_v7, %v5887_v54  ;;  %v1782_v49 = vadd.f32 %v5936_v26, %v5879_v61  ;;  %v6660_v61 = vld [vmem:[#allocation69_spill] sm:$0xff] }
 0x266   : > { %3832 = vpow2.f32 %v3281_v24  ;;  %v1938_v37 = vadd.f32 %v1909_v28, %v1774_v19  ;;  %v1939_v45 = vadd.f32 %v1910_v44, %v1775_v32  ;;  %v2095_v13 = vadd.f32 1.0, %v3827_v43 }
 0x267   : > { %3834 = vpow2.f32 %v3272_v33  ;;  %v1990_v62 = vmul.f32 %v6634_v3, %v1941_v30  ;;  %v1946_v21 = vadd.f32 %v1916_v36, %v1782_v49  ;;  %v6040_v32 = vmul.f32 %v5997_v1, %v5893_v52 }
 0x268   : > { %3836 = vpow2.f32 %v3282_v20  ;;  %v1987_v11 = vmul.f32 %v6654_v15, %v1938_v37  ;;  %v2021_v8 = vpop.permute.xlu0 %2020  ;;  %v1988_v54 = vmul.f32 %v6655_v5, %v1939_v45 }
 0x269   : > { %v2024_v10 = vsel %vm869_vm4, %v2019_v14, %v2021_v8  ;;  %v6005_v38 = vadd.f32 %v2021_v8, %v1985_v17  ;;  %v6015_v6 = vadd.f32 %v2021_v8, %v1990_v62  ;;  %3838 = vrcp.f32 %v2100_v40 }
 0x26a   : > { %v6008_v51 = vadd.f32 %v5914_v48, %v1987_v11  ;;  %v6011_v26 = vadd.f32 %v2024_v10, %v6660_v61  ;;  %v6013_v60 = vadd.f32 %v2024_v10, %v1989_v25  ;;  %v6017_v29 = vadd.f32 %v2023_v27, %v1988_v54 }
 0x26b   : > { %v3274_v55 = vmul.f32 -1.442695, %v6005_v38  ;;  %3840 = vrcp.f32 %v2095_v13  ;;  %v1995_v48 = vmul.f32 %v6634_v3, %v1946_v21  ;;  %v6025_v53 = vadd.f32 %v2024_v10, %v1994_v18 }
 0x26c   : > { %v3276_v15 = vmul.f32 -1.442695, %v6008_v51  ;;  %v3273_v17 = vmul.f32 -1.442695, %v6011_v26  ;;  %v3277_v57 = vmul.f32 -1.442695, %v6017_v29 }
 0x26d   : > { %3842 = vpow2.f32 %v3274_v55  ;;  %v3278_v5 = vmul.f32 -1.442695, %v6013_v60  ;;  %v3279_v22 = vmul.f32 -1.442695, %v6015_v6  ;;  %v2091_v14 = vadd.f32 1.0, %v3831_v58 }
 0x26e   : > { %3844 = vpow2.f32 %v3276_v15  ;;  %v6028_v50 = vadd.f32 %v2021_v8, %v1995_v48  ;;  %v3283_v42 = vmul.f32 -1.442695, %v6025_v53  ;;  %v2166_v49 = vrot.slane %v6040_v32, 7 }
 0x26f   : > { %3846 = vpow2.f32 %v3277_v57 }
 0x270   : > { %v3833_v39 = vpop.eup %3832  ;;  %3848 = vpow2.f32 %v3273_v17  ;;  %v3284_v2 = vmul.f32 -1.442695, %v6028_v50 }
 0x271   : > { %v3835_v0 = vpop.eup %3834  ;;  %v2101_v27 = vadd.f32 1.0, %v3833_v39  ;;  %3850 = vpow2.f32 %v3278_v5 }
 0x272   : > { %v3837_v3 = vpop.eup %3836  ;;  %v2092_v4 = vadd.f32 1.0, %v3835_v0  ;;  %3852 = vpow2.f32 %v3279_v22 }
 0x273   : > { %3854 = vrcp.f32 %v2091_v14  ;;  %v2102_v56 = vadd.f32 1.0, %v3837_v3  ;;  %v3839_v34 = vpop.eup %3838 }
 0x274   : > { %3856 = vrcp.f32 %v2101_v27  ;;  %v6033_v23 = vmul.f32 %v3839_v34, %v5909_v12 }
 0x275   : > { %3858 = vrcp.f32 %v2092_v4  ;;  %v3841_v16 = vpop.eup %3840 }
 0x276   : > { %3860 = vpow2.f32 %v3283_v42  ;;  %v6036_v33 = vmul.f32 %v3841_v16, %v5917_v46  ;;  %v2181_v12 = vrot.slane %v6033_v23, 7 }
 0x277   : > { %v3843_v63 = vpop.eup %3842  ;;  %3862 = vpow2.f32 %v3284_v2 }
 0x278   : > { %v3845_v19 = vpop.eup %3844  ;;  %3864 = vrcp.f32 %v2102_v56  ;;  %v2094_v24 = vadd.f32 1.0, %v3843_v63  ;;  %v2167_v46 = vrot.slane %v6036_v33, 7 }
 0x279   : > { %v3847_v30 = vpop.eup %3846  ;;  %v2096_v31 = vadd.f32 1.0, %v3845_v19 }
 0x27a   : > { %v3849_v25 = vpop.eup %3848  ;;  %v2097_v7 = vadd.f32 1.0, %v3847_v30  ;;  %3866 = vrcp.f32 %v2094_v24  ;;  %v2182_v52 = vsel %vm2165_vm6, %v2167_v46, %v2181_v12  ;;  %v2168_v11 = vsel %vm2165_vm6, %v2166_v49, %v2167_v46 }
 0x27b   : > { %v3851_v43 = vpop.eup %3850  ;;  %3868 = vrcp.f32 %v2096_v31  ;;  %v2093_v20 = vadd.f32 1.0, %v3849_v25  ;;  %v2203_v8 = vsel %vm2201_vm7, %v2182_v52, 0.0  ;;  %v2202_v15 = vsel %vm2201_vm7, %v2168_v11, 0.0 }
 0x27c   : > { %v3853_v18 = vpop.eup %3852  ;;  %3870 = vrcp.f32 %v2097_v7  ;;  %v2098_v28 = vadd.f32 1.0, %v3851_v43  ;;  %v2204_v57 = vadd.f32 %v2203_v8, %v2202_v15 }
 0x27d   : > { %v3855_v59 = vpop.eup %3854  ;;  %v2099_v36 = vadd.f32 1.0, %v3853_v18  ;;  %3872 = vrcp.f32 %v2093_v20 }
 0x27e   : > { %v3857_v44 = vpop.eup %3856  ;;  %3874 = vrcp.f32 %v2098_v28  ;;  %v6048_v21 = vmul.f32 %v3855_v59, %v5921_v47  ;;  %v2205_v2 = vrot.slane %v2204_v57, 4 }
 0x27f   : > { %v3859_v37 = vpop.eup %3858  ;;  %3876 = vrcp.f32 %v2099_v36  ;;  %v6051_v54 = vmul.f32 %v3857_v44, %v5977_v9 }
 0x280   : > { %v3861_v40 = vpop.eup %3860  ;;  %v6054_v61 = vmul.f32 %v3859_v37, %v5980_v41  ;;  %v2169_v41 = vrot.slane %v6048_v21, 7  ;;  %v2206_v43 = vadd.f32 %v2205_v2, %v2204_v57 }
 0x281   : > { %v3863_v1 = vpop.eup %3862  ;;  %v2103_v45 = vadd.f32 1.0, %v3861_v40  ;;  %v2183_v14 = vrot.slane %v6051_v54, 7 }
 0x282   : > { %v3865_v13 = vpop.eup %3864  ;;  %v2104_v62 = vadd.f32 1.0, %v3863_v1  ;;  %v2172_v0 = vrot.slane %v6054_v61, 7  ;;  %v2207_v49 = vrot.slane %v2206_v43, 2 }
 0x283   : > { %3878 = vrcp.f32 %v2103_v45  ;;  %v6057_v55 = vmul.f32 %v3865_v13, %v5984_v35 }
 0x284   : > { %v3867_v58 = vpop.eup %3866  ;;  %3880 = vrcp.f32 %v2104_v62 }
 0x285   : > { %v3869_v10 = vpop.eup %3868  ;;  %v6066_v9 = vmul.f32 %v3867_v58, %v6005_v38  ;;  %v2185_v27 = vrot.slane %v6057_v55, 7 }
 0x286   : > { %v3871_v17 = vpop.eup %3870  ;;  %v6060_v48 = vmul.f32 %v3869_v10, %v6008_v51  ;;  %v2208_v10 = vadd.f32 %v2207_v49, %v2206_v43 }
 0x287   : > { %v3873_v5 = vpop.eup %3872  ;;  %v6063_v47 = vmul.f32 %v3871_v17, %v6017_v29  ;;  %v2178_v34 = vrot.slane %v6066_v9, 7 }
 0x288   : > { %v3875_v22 = vpop.eup %3874  ;;  %v2170_v35 = vrot.slane %v6060_v48, 7  ;;  %v6072_v39 = vmul.f32 %v3873_v5, %v6011_v26  ;;  %v2209_v2 = vrot.slane %v2208_v10, 1 }
 0x289   : > { %v3877_v51 = vpop.eup %3876  ;;  %v2173_v29 = vrot.slane %v6063_v47, 7  ;;  %v6078_v38 = vmul.f32 %v3875_v22, %v6013_v60  ;;  %v2303_v22 = vld [vmem:[%s6328_s6 + $0x1f0] sm:$0xff] }
 0x28a   : > { %v2171_v3 = vsel %vm2165_vm6, %v2169_v41, %v2170_v35  ;;  %v2184_v4 = vsel %vm2165_vm6, %v2170_v35, %v2183_v14  ;;  %v6083_v42 = vmul.f32 %v3877_v51, %v6015_v6  ;;  %v2175_v63 = vrot.slane %v6072_v39, 7  ;;  %v2304_v41 = vld [vmem:[%s6328_s6 + $0x1f8] sm:$0xff]  ;;  %v2271_v14 = vld [vmem:[%s6328_s6 + $0xf0] sm:$0xff] }
 0x28b   : > { %v2174_v26 = vsel %vm2165_vm6, %v2172_v0, %v2173_v29  ;;  %v2186_v56 = vsel %vm2165_vm6, %v2173_v29, %v2185_v27  ;;  %v2211_v16 = vadd.f32 %v2184_v4, %v2171_v3  ;;  %v2176_v60 = vrot.slane %v6078_v38, 7  ;;  %v2272_v27 = vld [vmem:[%s6328_s6 + $0xf8] sm:$0xff]  ;;  %v2287_v29 = vld [vmem:[%s6328_s6 + $0x170] sm:$0xff] }
 0x28c   : > { %v2179_v19 = vrot.slane %v6083_v42, 7  ;;  %v2218_v24 = vadd.f32 %v2186_v56, %v2174_v26  ;;  %v3593_v0 = vpack.c.bf16 %v2304_v41, %v2303_v22  ;;  %v2288_v3 = vld [vmem:[%s6328_s6 + $0x178] sm:$0xff]  ;;  %v3561_v26 = vpack.c.bf16 %v2272_v27, %v2271_v14 }
 0x28d   : > { %v3879_v30 = vpop.eup %3878  ;;  %v2212_v31 = vrot.slane %v2211_v16, 4  ;;  %v2177_v59 = vsel %vm2165_vm6, %v2175_v63, %v2176_v60  ;;  %v3595_v56 = vpack.c.bf16 %v2288_v3, %v2287_v29 }
 0x28e   : > { %v3881_v25 = vpop.eup %3880  ;;  %v6092_v6 = vmul.f32 %v3879_v30, %v6025_v53  ;;  %v2219_v7 = vrot.slane %v2218_v24, 4  ;;  %v2180_v18 = vsel %vm2165_vm6, %v2178_v34, %v2179_v19  ;;  %v2255_v34 = vld [vmem:[%s6328_s6 + $0x70] sm:$0xff]  ;;  %3594 = vmatprep.subr.bf16.mxu1 %v3593_v0  ;;  %3562 = vmatprep.subr.bf16.mxu0 %v3561_v26 }
 0x28f   : > { %v6095_v20 = vmul.f32 %v3881_v25, %v6028_v50  ;;  %v2213_v12 = vadd.f32 %v2212_v31, %v2211_v16  ;;  %v2232_v37 = vsel %vm869_vm4, %v2180_v18, 0.0  ;;  %v2256_v16 = vld [vmem:[%s6328_s6 + $0x78] sm:$0xff]  ;;  %3596 = vmatpush3.bf16.msra.mxu1 %v3595_v56  ;;  %v2210_v31 = vadd.f32 %v2209_v2, %v2208_v10  ;;  %v6130_v25 = vld [vmem:[#allocation2] sm:$0xff] }
 0x290   : > { %v2187_v28 = vrot.slane %v6092_v6, 7  ;;  %v2220_v36 = vadd.f32 %v2219_v7, %v2218_v24  ;;  %3464 = vmatprep.subr.mxu1 %v6130_v25 }
 0x291   : > { %v2189_v44 = vrot.slane %v6095_v20, 7  ;;  %v2214_v46 = vrot.slane %v2213_v12, 2 }
 0x292   : > { %v2188_v53 = vsel %vm2165_vm6, %v2176_v60, %v2187_v28  ;;  %v2221_v40 = vrot.slane %v2220_v36, 2 }
 0x293   : > { %v2190_v50 = vsel %vm2165_vm6, %v2179_v19, %v2189_v44  ;;  %v2225_v52 = vadd.f32 %v2188_v53, %v2177_v59  ;;  %v2215_v1 = vadd.f32 %v2214_v46, %v2213_v12  ;;  %v3563_v19 = vpack.c.bf16 %v2256_v16, %v2255_v34  ;;  %v2641_v34 = vld [vmem:[%s6329_s7 + $0x8] sm:$0xff] }
 0x294   : > { %v2233_v45 = vsel %vm869_vm4, %v2190_v50, 0.0  ;;  %v2222_v13 = vadd.f32 %v2221_v40, %v2220_v36  ;;  %v2645_v16 = vld [vmem:[%s6329_s7 + $0x28] sm:$0xff] }
 0x295   : > { %v2226_v62 = vrot.slane %v2225_v52, 4  ;;  %v2234_v11 = vadd.f32 %v2233_v45, %v2232_v37  ;;  %v2216_v8 = vrot.slane %v2215_v1, 1  ;;  %3564 = vmatpush3.bf16.msra.mxu0 %v3563_v19  ;;  %v2469_v45 = vld [vmem:[%s6330_s8] sm:$0xff]  ;;  %v2647_v19 = vld [vmem:[%s6329_s7 + $0x38] sm:$0xff] }
 0x296   : > { %v2223_v58 = vrot.slane %v2222_v13, 1 }
 0x297   : > { %v2227_v15 = vadd.f32 %v2226_v62, %v2225_v52  ;;  %v2235_v17 = vrot.slane %v2234_v11, 4  ;;  %v2217_v57 = vadd.f32 %v2216_v8, %v2215_v1  ;;  %v4033_v1 = vmov 0.0|0.0   ;;  %v2471_v62 = vld [vmem:[%s6330_s8 + $0x10] sm:$0xff]  ;;  %v2472_v8 = vld [vmem:[%s6330_s8 + $0x18] sm:$0xff] }
 0x298   : > { %v2224_v5 = vadd.f32 %v2223_v58, %v2222_v13  ;;  %3597 = vmatprep.subr.bf16.mxu0 %v4033_v1  ;;  %v2470_v13 = vld [vmem:[%s6330_s8 + $0x8] sm:$0xff]  ;;  %v3601_v58 = vpack.c.bf16 %v2472_v8, %v2471_v62 }
 0x299   : > { %v2228_v35 = vrot.slane %v2227_v15, 2  ;;  %v2236_v51 = vadd.f32 %v2235_v17, %v2234_v11  ;;  %v3598_v11 = vpack.c.bf16 %v2470_v13, %v2469_v45 }
 0x29a   : > { %v3755_v4 = vpack.i.bf16 %v2224_v5, %v2217_v57 }
 0x29b   : > { %v2229_v63 = vadd.f32 %v2228_v35, %v2227_v15  ;;  %v2237_v60 = vrot.slane %v2236_v51, 2  ;;  %v2554_v35 = vld [vmem:[%s6332_s10] sm:$0x3] }
 0x29c   : > { %3756 = vrot.lane.b32.xlu1 %v3755_v4, %s4030_s28 }
 0x29d   : > { %v2230_v24 = vrot.slane %v2229_v63, 1  ;;  %v2238_v30 = vadd.f32 %v2237_v60, %v2236_v51  ;;  %v2473_v51 = vld [vmem:[%s6331_s9] sm:$0x1]  ;;  %v3603_v60 = vpack.c.bf16 %v2645_v16, %v2641_v34 }
 0x29e   : > { %v2900_v16 = vld [vmem:[#allocation6 + $0x180] sm:$0xff] }
 0x29f   : > { %v2231_v7 = vadd.f32 %v2230_v24, %v2229_v63  ;;  %v2239_v43 = vrot.slane %v2238_v30, 1  ;;  %v2643_v63 = vld [vmem:[%s6329_s7 + $0x18] sm:$0xff]  ;;  %v2640_v24 = vld [vmem:[%s6329_s7] sm:$0xff] }
 0x2a0   : > { %2310 = vrot.lane.b32.xlu1 %v2210_v31, %s4030_s28  ;;  %v3611_v31 = vpack.c.bf16 %v2647_v19, %v2643_v63  ;;  %v2901_v63 = vld [vmem:[#allocation6 + $0x188] sm:$0xff] }
 0x2a1   : > { %v2240_v18 = vadd.f32 %v2239_v43, %v2238_v30  ;;  %v2644_v30 = vld [vmem:[%s6329_s7 + $0x20] sm:$0xff]  ;;  %v2646_v43 = vld [vmem:[%s6329_s7 + $0x30] sm:$0xff]  ;;  %v3651_v19 = vpack.c.bf16 %v2901_v63, %v2900_v16  ;;  %v2893_v63 = vld [vmem:[#allocation6 + $0x148] sm:$0xff] }
 0x2a2   : > { %v2892_v16 = vld [vmem:[#allocation6 + $0x140] sm:$0xff] }
 0x2a3   : > { %v3760_v12 = vpack.i.bf16 %v2240_v18, %v2231_v7  ;;  %v2642_v7 = vld [vmem:[%s6329_s7 + $0x10] sm:$0xff]  ;;  %v2649_v18 = vld [vmem:[%s6329_s7 + $0x48] sm:$0xff] }
 0x2a5   : > { %3761 = vrot.lane.b32.xlu0 %v3760_v12, %s4030_s28  ;;  %v3613_v12 = vpack.c.bf16 %v2646_v43, %v2642_v7  ;;  %v2872_v43 = vld [vmem:[#allocation6 + $0xa0] sm:$0xff] }
 0x30e   : > { %v3757_v28 = vpop.permute.xlu1 %3756 }
 0x30f   : > { %v3759_v59 = vunpack.i.h.bf16 %v3757_v28  ;;  %v3758_v36 = vunpack.i.l.bf16 %v3757_v28  ;;  %v2653_v28 = vld [vmem:[%s6329_s7 + $0x68] sm:$0xff] }
 0x311   : > { %v2321_v44 = vsel %vm799_vm0, %v3758_v36, %v3759_v59 }
 0x312   : > { %v2311_v46 = vpop.permute.xlu1 %2310  ;;  %2392 = vmatprep.mubr.f32.mxu0 %v2321_v44  ;;  %v3607_v44 = vpack.c.bf16 %v2653_v28, %v2649_v18  ;;  %v2873_v18 = vld [vmem:[#allocation6 + $0xa8] sm:$0xff] }
 0x313   : > { %v2320_v37 = vsel %vm799_vm0, %v2311_v46, %v3758_v36  ;;  %v2655_v36 = vld [vmem:[%s6329_s7 + $0x78] sm:$0xff]  ;;  %v3627_v28 = vpack.c.bf16 %v2873_v18, %v2872_v43  ;;  %v2880_v43 = vld [vmem:[#allocation6 + $0xe0] sm:$0xff]  ;;  %v2881_v18 = vld [vmem:[#allocation6 + $0xe8] sm:$0xff] }
 0x314   : > { %2393 = vmatmul.mubr.f32.vlgmr.msra.gmra.mrb[4].mxu0 %v2320_v37  ;;  %v2648_v37 = vld [vmem:[%s6329_s7 + $0x40] sm:$0xff] }
 0x315   : > { %3461 = vmatprep.mubr.msk.f32.mxu0 %vm4034_vm8, %v6130_v25  ;;  %3599 = vmatpush3.bf16.msra.mxu0 %v3598_v11 }
 0x316   : > { %3600 = vmatprep.subr.bf16.mxu0 %v4033_v1  ;;  %v2555_v1 = vld [vmem:[%s6333_s11] sm:$0x1] }
 0x317   : > { %v3762_v53 = vpop.permute.xlu0 %3761 }
 0x318   : > { %v3764_v40 = vunpack.i.h.bf16 %v3762_v53  ;;  %v3763_v49 = vunpack.i.l.bf16 %v3762_v53  ;;  %v2652_v53 = vld [vmem:[%s6329_s7 + $0x60] sm:$0xff] }
 0x319   : > { %3602 = vmatpush3.bf16.msra.mxu0 %v3601_v58 }
 0x31a   : > { %v2323_v50 = vsel %vm799_vm0, %v3763_v49, %v3764_v40  ;;  %v2322_v52 = vsel %vm799_vm0, %v3759_v59, %v3763_v49  ;;  %v2651_v59 = vld [vmem:[%s6329_s7 + $0x58] sm:$0xff]  ;;  %3612 = vmatprep.subr.bf16.mxu0 %v3611_v31  ;;  %v2650_v40 = vld [vmem:[%s6329_s7 + $0x50] sm:$0xff]  ;;  %v3609_v49 = vpack.c.bf16 %v2652_v53, %v2648_v37  ;;  %v2885_v31 = vld [vmem:[#allocation6 + $0x108] sm:$0xff] }
 0x31b   : > { %2462 = vmatprep.mubr.f32.mxu1 %v2323_v50  ;;  %v3615_v46 = vpack.c.bf16 %v2655_v36, %v2651_v59  ;;  %v2654_v50 = vld [vmem:[%s6329_s7 + $0x70] sm:$0xff]  ;;  %v2903_v59 = vld [vmem:[#allocation6 + $0x198] sm:$0xff]  ;;  %v2856_v36 = vld [vmem:[#allocation6 + $0x20] sm:$0xff] }
 0x31c   : > { %2463 = vmatmul.mubr.f32.vlgmr.msra.gmra.mrb[4].mxu1 %v2322_v52  ;;  %v3617_v52 = vpack.c.bf16 %v2654_v50, %v2650_v40  ;;  %v2886_v37 = vld [vmem:[#allocation6 + $0x110] sm:$0xff]  ;;  %v2887_v53 = vld [vmem:[#allocation6 + $0x118] sm:$0xff] }
 0x31d   : > { %3466 = vmatprep.mubr.msk.f32.mxu1 %vm4034_vm8, %v6130_v25  ;;  %3465 = vmatpush3.msk.msra.mxu1 %vm2560_vm9, %v2554_v35  ;;  %v2874_v40 = vld [vmem:[#allocation6 + $0xb0] sm:$0xff]  ;;  %v2875_v50 = vld [vmem:[#allocation6 + $0xb8] sm:$0xff] }
 0x31e   : > { %3604 = vmatprep.subr.bf16.mxu1 %v3603_v60  ;;  %v2854_v60 = vld [vmem:[#allocation6 + $0x10] sm:$0xff] }
 0x3e7   : > { %v3332_v10 = vpop.f32.mrb[4].mxu0 }
 0x3e8   : > { %v3333_v15 = vpop.f32.mrb[5].mxu0 }
 0x3e9   : > { %v3334_v17 = vadd.f32 %v3333_v15, %v3332_v10 }
 0x3ef   : > { %v3367_v57 = vpop.f32.mrb[4].mxu1 }
 0x3f0   : > { %v3368_v5 = vpop.f32.mrb[5].mxu1 }
 0x3f1   : > { %v3369_v22 = vadd.f32 %v3368_v5, %v3367_v57  ;;  %v6661_v57 = vld [vmem:[#allocation19_spill] sm:$0xff] }
 0x3f3   : > { %v2465_v41 = vadd.f32 %v3369_v22, %v3334_v17 }
 0x3f5   : > { %v2468_v14 = vmul.f32 0.00390625, %v2465_v41 }
 0x3f7   : > { %3462 = vmatmul.mubr.msk.f32.vlgmr.msra.gmra.mrb[6].mxu0 %vm799_vm0, %v2468_v14 }
 0x3f8   : > { %2794 = vmatprep.mubr.f32.mxu0 %v6130_v25  ;;  %3614 = vmatpush1.bf16.msra.mxu0 %v3613_v12  ;;  %v2902_v12 = vld [vmem:[#allocation6 + $0x190] sm:$0xff] }
 0x3f9   : > { %3616 = vmatprep.subr.bf16.mxu0 %v3615_v46  ;;  %v3655_v46 = vpack.c.bf16 %v2903_v59, %v2902_v12  ;;  %v2895_v59 = vld [vmem:[#allocation6 + $0x158] sm:$0xff] }
 0x3fc   : > { %3618 = vmatpush1.bf16.msra.mxu0 %v3617_v52  ;;  %v2904_v52 = vld [vmem:[#allocation6 + $0x1a0] sm:$0xff] }
 0x3fd   : > { %3652 = vmatprep.subr.bf16.mxu0 %v3651_v19  ;;  %v2910_v19 = vld [vmem:[#allocation6 + $0x1d0] sm:$0xff] }
 0x4ca   : > { %v2543_v0 = vpop.f32.mrb[6].mxu0 }
 0x4cb   : > { %v2544_v27 = vadd.f32 %v2543_v0, %v2473_v51  ;;  %v3463_v29 = vpop.f32.mrb[7].mxu0  ;;  %v2868_v0 = vld [vmem:[#allocation6 + $0x80] sm:$0xff] }
 0x4cc   : > { %v2852_v29 = vld [vmem:[#allocation6] sm:$0xff] }
 0x4cd   : > { %v3286_v3 = vmul.f32 -1.442695, %v2544_v27 }
 0x4cf   : > { %3882 = vpow2.f32 %v3286_v3 }
 0x4d9   : > { %v3883_v4 = vpop.eup %3882 }
 0x4da   : > { %v2550_v2 = vadd.f32 1.0, %v3883_v4  ;;  %v2853_v4 = vld [vmem:[#allocation6 + $0x8] sm:$0xff] }
 0x4dc   : > { %3884 = vrcp.f32 %v2550_v2  ;;  %v2870_v2 = vld [vmem:[#allocation6 + $0x90] sm:$0xff] }
 0x4e6   : > { %v3885_v26 = vpop.eup %3884 }
 0x4e7   : > { %v2553_v56 = vmul.f32 %v3885_v26, %v2544_v27  ;;  %v2869_v27 = vld [vmem:[#allocation6 + $0x88] sm:$0xff]  ;;  %v2871_v26 = vld [vmem:[#allocation6 + $0x98] sm:$0xff] }
 0x4e8   : > { %v3619_v3 = vpack.c.bf16 %v2869_v27, %v2868_v0  ;;  %v3623_v34 = vpack.c.bf16 %v2871_v26, %v2870_v2  ;;  %v2908_v0 = vld [vmem:[#allocation6 + $0x1c0] sm:$0xff]  ;;  %v2878_v26 = vld [vmem:[#allocation6 + $0xd0] sm:$0xff] }
 0x4e9   : > { %3467 = vmatmul.mubr.msk.f32.vlgmr.msra.gmra.mrb[6].mxu1 %vm2556_vm10, %v2553_v56  ;;  %v3621_v56 = vpack.c.bf16 %v2853_v4, %v2852_v29  ;;  %v2860_v29 = vld [vmem:[#allocation6 + $0x40] sm:$0xff]  ;;  %v2909_v4 = vld [vmem:[#allocation6 + $0x1c8] sm:$0xff] }
 0x4ea   : > { %2723 = vmatprep.mubr.f32.mxu1 %v6130_v25  ;;  %v3605_v25 = vpack.c.bf16 %v2644_v30, %v2640_v24  ;;  %v2855_v24 = vld [vmem:[#allocation6 + $0x18] sm:$0xff]  ;;  %v2884_v30 = vld [vmem:[#allocation6 + $0x100] sm:$0xff] }
 0x4eb   : > { %v3653_v7 = vpack.c.bf16 %v2885_v31, %v2884_v30  ;;  %v2862_v31 = vld [vmem:[#allocation6 + $0x50] sm:$0xff] }
 0x4ec   : > { %3606 = vmatpush1.bf16.msra.mxu1 %v3605_v25  ;;  %v3625_v25 = vpack.c.bf16 %v2855_v24, %v2854_v60  ;;  %v2911_v24 = vld [vmem:[#allocation6 + $0x1d8] sm:$0xff] }
 0x4ed   : > { %3608 = vmatprep.subr.bf16.mxu1 %v3607_v44  ;;  %v2857_v44 = vld [vmem:[#allocation6 + $0x28] sm:$0xff]  ;;  %v3671_v12 = vpack.c.bf16 %v2911_v24, %v2910_v19  ;;  %v2896_v24 = vld [vmem:[#allocation6 + $0x160] sm:$0xff] }
 0x4f0   : > { %3610 = vmatpush1.bf16.msra.mxu1 %v3609_v49  ;;  %v3657_v49 = vpack.c.bf16 %v2887_v53, %v2886_v37  ;;  %v2865_v37 = vld [vmem:[#allocation6 + $0x68] sm:$0xff] }
 0x4f1   : > { %3620 = vmatprep.subr.bf16.mxu1 %v3619_v3  ;;  %v2861_v3 = vld [vmem:[#allocation6 + $0x48] sm:$0xff] }
 0x4f2   : > { %v3637_v60 = vpack.c.bf16 %v2861_v3, %v2860_v29 }
 0x5bc   : > { %v2630_v45 = vpop.f32.mrb[6].mxu1 }
 0x5bd   : > { %v2631_v13 = vadd.f32 %v2630_v45, %v2555_v1  ;;  %v3468_v62 = vpop.f32.mrb[7].mxu1  ;;  %v2905_v1 = vld [vmem:[#allocation6 + $0x1a8] sm:$0xff]  ;;  %v3629_v45 = vpack.c.bf16 %v2857_v44, %v2856_v36  ;;  %v3643_v44 = vpack.c.bf16 %v2881_v18, %v2880_v43 }
 0x5be   : > { %v2858_v62 = vld [vmem:[#allocation6 + $0x30] sm:$0xff] }
 0x5bf   : > { %v3289_v11 = vmul.f32 -1.442695, %v2631_v13  ;;  %v3659_v13 = vpack.c.bf16 %v2905_v1, %v2904_v52 }
 0x5c1   : > { %3886 = vpow2.f32 %v3289_v11  ;;  %v2888_v11 = vld [vmem:[#allocation6 + $0x120] sm:$0xff] }
 0x5cb   : > { %v3887_v8 = vpop.eup %3886 }
 0x5cc   : > { %v2637_v58 = vadd.f32 1.0, %v3887_v8  ;;  %v3631_v8 = vpack.c.bf16 %v2875_v50, %v2874_v40 }
 0x5ce   : > { %3888 = vrcp.f32 %v2637_v58  ;;  %v2859_v58 = vld [vmem:[#allocation6 + $0x38] sm:$0xff] }
 0x5d8   : > { %v3889_v10 = vpop.eup %3888 }
 0x5d9   : > { %3290 = vmatmul.mubr.msk.f32.vlgmr.msra.gmra.mrb[8].mxu1 %vm799_vm0, %v3889_v10  ;;  %3291 = vmatmul.mubr.msk.f32.vlgmr.msra.gmra.mrb[8].mxu0 %vm799_vm0, %v3889_v10  ;;  %v2889_v10 = vld [vmem:[#allocation6 + $0x128] sm:$0xff] }
 0x5da   : > { %3622 = vmatpush3.bf16.msra.mxu1 %v3621_v56  ;;  %3654 = vmatpush3.bf16.msra.mxu0 %v3653_v7  ;;  %v2879_v56 = vld [vmem:[#allocation6 + $0xd8] sm:$0xff]  ;;  %v3669_v7 = vpack.c.bf16 %v2893_v63, %v2892_v16 }
 0x5db   : > { %3624 = vmatprep.subr.bf16.mxu1 %v3623_v34  ;;  %3656 = vmatprep.subr.bf16.mxu0 %v3655_v46  ;;  %v3667_v34 = vpack.c.bf16 %v2909_v4, %v2908_v0  ;;  %v3639_v30 = vpack.c.bf16 %v2879_v56, %v2878_v26  ;;  %v2864_v46 = vld [vmem:[#allocation6 + $0x60] sm:$0xff] }
 0x5dc   : > { %v3645_v40 = vpack.c.bf16 %v2865_v37, %v2864_v46 }
 0x5de   : > { %3626 = vmatpush3.bf16.msra.mxu1 %v3625_v25  ;;  %3658 = vmatpush3.bf16.msra.mxu0 %v3657_v49  ;;  %v2863_v25 = vld [vmem:[#allocation6 + $0x58] sm:$0xff] }
 0x5df   : > { %3628 = vmatprep.subr.bf16.mxu1 %v3627_v28  ;;  %3660 = vmatprep.subr.bf16.mxu0 %v3659_v13  ;;  %v2894_v28 = vld [vmem:[#allocation6 + $0x150] sm:$0xff]  ;;  %v3641_v36 = vpack.c.bf16 %v2863_v25, %v2862_v31  ;;  %v2883_v13 = vld [vmem:[#allocation6 + $0xf8] sm:$0xff]  ;;  %v2897_v31 = vld [vmem:[#allocation6 + $0x168] sm:$0xff] }
 0x5e0   : > { %v3673_v53 = vpack.c.bf16 %v2895_v59, %v2894_v28  ;;  %v2914_v25 = vld [vmem:[#allocation6 + $0x1f0] sm:$0xff]  ;;  %v3677_v46 = vpack.c.bf16 %v2897_v31, %v2896_v24 }
 0x5e1   : > { %v2898_v59 = vld [vmem:[#allocation6 + $0x170] sm:$0xff] }
 0x5e2   : > { %3630 = vmatpush3.bf16.msra.mxu1 %v3629_v45  ;;  %v2882_v45 = vld [vmem:[#allocation6 + $0xf0] sm:$0xff] }
 0x5e3   : > { %3632 = vmatprep.subr.bf16.mxu1 %v3631_v8  ;;  %v3647_v8 = vpack.c.bf16 %v2883_v13, %v2882_v45 }
 0x6ac   : > { %v2725_v15 = vpop.f32.mrb[8].mxu1  ;;  %v2796_v17 = vpop.f32.mrb[8].mxu0 }
 0x6ad   : > { %v2804_v5 = vrot.slane %v2725_v15, %v6661_v57  ;;  %v2727_v22 = vpop.f32.mrb[9].mxu1  ;;  %v2798_v41 = vpop.f32.mrb[9].mxu0  ;;  %v2812_v35 = vrot.slane %v2796_v17, %v6661_v57  ;;  %v2876_v15 = vld [vmem:[#allocation6 + $0xc0] sm:$0xff]  ;;  %v3661_v17 = vpack.c.bf16 %v2889_v10, %v2888_v11  ;;  %v2866_v10 = vld [vmem:[#allocation6 + $0x70] sm:$0xff] }
 0x6ae   : > { %v2808_v14 = vrot.slane %v2727_v22, %v6661_v57  ;;  %v2816_v51 = vrot.slane %v2798_v41, %v6661_v57  ;;  %v2877_v57 = vld [vmem:[#allocation6 + $0xc8] sm:$0xff]  ;;  %v2907_v22 = vld [vmem:[#allocation6 + $0x1b8] sm:$0xff] }
 0x6af   : > { %2821 = vrot.lane.b32.xlu0 %v2804_v5, %s4031_s14  ;;  %v2906_v5 = vld [vmem:[#allocation6 + $0x1b0] sm:$0xff]  ;;  %v3635_v27 = vpack.c.bf16 %v2877_v57, %v2876_v15  ;;  %3662 = vmatpush3.bf16.msra.mxu0 %v3661_v17  ;;  %v2867_v15 = vld [vmem:[#allocation6 + $0x78] sm:$0xff] }
 0x6b0   : > { %2823 = vrot.lane.b32.xlu1 %v2808_v14, %s4031_s14  ;;  %v3663_v41 = vpack.c.bf16 %v2907_v22, %v2906_v5  ;;  %v2890_v14 = vld [vmem:[#allocation6 + $0x130] sm:$0xff]  ;;  %v3649_v22 = vpack.c.bf16 %v2867_v15, %v2866_v10 }
 0x6b2   : > { %3664 = vmatprep.subr.bf16.mxu0 %v3663_v41 }
 0x6b3   : > { %2825 = vrot.lane.b32.xlu0 %v2812_v35, %s4031_s14  ;;  %v2891_v35 = vld [vmem:[#allocation6 + $0x138] sm:$0xff] }
 0x6b4   : > { %2827 = vrot.lane.b32.xlu1 %v2816_v51, %s4031_s14  ;;  %v3633_v51 = vpack.c.bf16 %v2859_v58, %v2858_v62  ;;  %v3665_v2 = vpack.c.bf16 %v2891_v35, %v2890_v14  ;;  %v2912_v62 = vld [vmem:[#allocation6 + $0x1e0] sm:$0xff]  ;;  %v2913_v58 = vld [vmem:[#allocation6 + $0x1e8] sm:$0xff] }
 0x6b6   : > { %3634 = vmatpush3.bf16.msra.mxu1 %v3633_v51  ;;  %3666 = vmatpush3.bf16.msra.mxu0 %v3665_v2 }
 0x6b7   : > { %3636 = vmatprep.subr.bf16.mxu1 %v3635_v27  ;;  %3668 = vmatprep.subr.bf16.mxu0 %v3667_v34 }
 0x6ba   : > { %3638 = vmatpush3.bf16.msra.mxu1 %v3637_v60  ;;  %3670 = vmatpush3.bf16.msra.mxu0 %v3669_v7 }
 0x6bb   : > { %3640 = vmatprep.subr.bf16.mxu1 %v3639_v30  ;;  %3672 = vmatprep.subr.bf16.mxu0 %v3671_v12 }
 0x6be   : > { %3642 = vmatpush3.bf16.msra.mxu1 %v3641_v36  ;;  %3674 = vmatpush3.bf16.msra.mxu0 %v3673_v53  ;;  %v2899_v36 = vld [vmem:[#allocation6 + $0x178] sm:$0xff] }
 0x6bf   : > { %3644 = vmatprep.subr.bf16.mxu1 %v3643_v44 }
 0x6c2   : > { %3646 = vmatpush3.bf16.msra.mxu1 %v3645_v40 }
 0x6c3   : > { %3648 = vmatprep.subr.bf16.mxu1 %v3647_v8 }
 0x6c6   : > { %3650 = vmatpush3.bf16.msra.mxu1 %v3649_v22 }
 0x721   : > { %v2822_v49 = vpop.permute.xlu0 %2821 }
 0x722   : > { %v2837_v50 = vmul.f32 %v2822_v49, %v6040_v32  ;;  %v6225_v52 = vmul.f32 %v2822_v49, %v6036_v33  ;;  %v2824_v1 = vpop.permute.xlu1 %2823  ;;  %v2847_v57 = vmul.f32 %v2822_v49, %v6033_v23  ;;  %v3675_v33 = vpack.c.bf16 %v2913_v58, %v2912_v62 }
 0x723   : > { %v2829_v11 = vsel %vm869_vm4, %v2822_v49, %v2824_v1 }
 0x724   : > { %v2838_v17 = vmul.f32 %v2829_v11, %v6048_v21  ;;  %v2843_v5 = vmul.f32 %v2829_v11, %v6060_v48  ;;  %v2938_v41 = vrot.slane %v2837_v50, 7  ;;  %v2939_v14 = vrot.slane %v6225_v52, 7  ;;  %3676 = vmatprep.subr.bf16.mxu0 %v3675_v33 }
 0x725   : > { %v2826_v32 = vpop.permute.xlu0 %2825  ;;  %v2848_v35 = vmul.f32 %v2829_v11, %v6051_v54  ;;  %v2953_v7 = vrot.slane %v2847_v57, 7  ;;  %3678 = vmatpush3.bf16.msra.mxu0 %v3677_v46  ;;  %v3681_v50 = vpack.c.bf16 %v2899_v36, %v2898_v59 }
 0x726   : > { %v2830_v51 = vsel %vm869_vm4, %v2824_v1, %v2826_v32  ;;  %v2828_v0 = vpop.permute.xlu1 %2827  ;;  %v2941_v27 = vrot.slane %v2838_v17, 7  ;;  %v2942_v29 = vrot.slane %v2843_v5, 7 }
 0x727   : > { %v2839_v21 = vmul.f32 %v2830_v51, %v6054_v61  ;;  %v2844_v23 = vmul.f32 %v2830_v51, %v6063_v47  ;;  %v2849_v48 = vmul.f32 %v2830_v51, %v6057_v55  ;;  %v2831_v3 = vsel %vm869_vm4, %v2826_v32, %v2828_v0 }
 0x728   : > { %v2841_v4 = vmul.f32 %v2828_v0, %v6066_v9  ;;  %v2846_v2 = vmul.f32 %v2828_v0, %v6083_v42  ;;  %v2840_v56 = vmul.f32 %v2831_v3, %v6072_v39  ;;  %v2845_v34 = vmul.f32 %v2831_v3, %v6078_v38  ;;  %v2915_v39 = vld [vmem:[#allocation6 + $0x1f8] sm:$0xff] }
 0x729   : > { %v2944_v54 = vrot.slane %v2839_v21, 7  ;;  %v2945_v26 = vrot.slane %v2844_v23, 7  ;;  %v2850_v61 = vmul.f32 %v2831_v3, %v6092_v6  ;;  %v2851_v47 = vmul.f32 %v2828_v0, %v6095_v20 }
 0x72a   : > { %v2950_v16 = vrot.slane %v2841_v4, 7  ;;  %v2957_v63 = vrot.slane %v2849_v48, 7  ;;  %v2947_v60 = vrot.slane %v2840_v56, 7  ;;  %v2948_v55 = vrot.slane %v2845_v34, 7 }
 0x72b   : > { %v2951_v19 = vrot.slane %v2846_v2, 7  ;;  %v2955_v30 = vrot.slane %v2848_v35, 7  ;;  %v2943_v9 = vsel %vm2165_vm6, %v2941_v27, %v2942_v29  ;;  %v2946_v42 = vsel %vm2165_vm6, %v2944_v54, %v2945_v26 }
 0x72c   : > { %v3765_v38 = vpack.i.bf16 %v2946_v42, %v2943_v9  ;;  %v2940_v6 = vsel %vm2165_vm6, %v2938_v41, %v2939_v14  ;;  %v2949_v20 = vsel %vm2165_vm6, %v2947_v60, %v2948_v55  ;;  %v2959_v43 = vrot.slane %v2850_v61, 7  ;;  %v3893_v9 = vld [vmem:[%s4471_s19] sm:$0xff] }
 0x72d   : > { %v2961_v18 = vrot.slane %v2851_v47, 7  ;;  %v3770_v12 = vpack.i.bf16 %v2949_v20, %v2940_v6  ;;  %v2952_v28 = vsel %vm2165_vm6, %v2950_v16, %v2951_v19  ;;  %v2958_v44 = vsel %vm2165_vm6, %v2945_v26, %v2957_v63  ;;  %v3292_v26 = vld [vmem:[%s6335_s13] ss:$0 sm:$0xff] }
 0x72e   : > { %3766 = vrot.lane.b32.xlu0 %v3765_v38, %s4030_s28  ;;  %v3679_v37 = vpack.c.bf16 %v2915_v39, %v2914_v25  ;;  %v2956_v53 = vsel %vm2165_vm6, %v2942_v29, %v2955_v30  ;;  %v2954_v49 = vsel %vm2165_vm6, %v2939_v14, %v2953_v7  ;;  %v2960_v1 = vsel %vm2165_vm6, %v2948_v55, %v2959_v43  ;;  %v3894_v39 = vld [vmem:[%s4471_s19 + $0x8] sm:$0xff] }
 0x72f   : > { %3771 = vrot.lane.b32.xlu1 %v3770_v12, %s4030_s28  ;;  %v3775_v40 = vpack.i.bf16 %v2956_v53, %v2952_v28  ;;  %v3780_v52 = vpack.i.bf16 %v2954_v49, %v2958_v44  ;;  %v2962_v45 = vsel %vm2165_vm6, %v2951_v19, %v2961_v18 }
 0x730   : > { %3680 = vmatprep.subr.bf16.mxu0 %v3679_v37  ;;  %v3785_v13 = vpack.i.bf16 %v2962_v45, %v2960_v1 }
 0x731   : > { %3682 = vmatpush3.bf16.msra.mxu0 %v3681_v50 }
 0x732   : > { %3776 = vrot.lane.b32.xlu0 %v3775_v40, %s4030_s28 }
 0x733   : > { %3781 = vrot.lane.b32.xlu1 %v3780_v52, %s4030_s28 }
 0x736   : > { %3786 = vrot.lane.b32.xlu0 %v3785_v13, %s4030_s28  ;;  %s3955_s28 = sshll.u32 %s4035_s17, 4  ;;  %s3956_s28 = int_to_ptr.vmem [resolvable:$false] %s3955_s28 }
 0x737   : > { %s3957_s14 = scalar_lea.vmem %s3956_s28, 512  ;;  %p3958_p4 = scmp.lt.s32.totalorder %s6273_s26, %s3956_s28 }
 0x738   : > { %p3959_p7 = scmp.lt.s32.totalorder %s3957_s14, %s3951_s22 }
 0x73a   : > { %p3960_p8 = por %p3959_p7, %p3958_p4 }
 0x73c   : > { %p3961_p11 = pnand %p3960_p8, %p3954_p3 }
 0x7a0   : > { %v3767_v62 = vpop.permute.xlu0 %3766 }
 0x7a1   : > { %v3769_v11 = vunpack.i.h.bf16 %v3767_v62  ;;  %v3768_v8 = vunpack.i.l.bf16 %v3767_v62  ;;  %v3772_v58 = vpop.permute.xlu1 %3771 }
 0x7a2   : > { %v3773_v10 = vunpack.i.l.bf16 %v3772_v58  ;;  %v3774_v17 = vunpack.i.h.bf16 %v3772_v58 }
 0x7a3   : > { %v2984_v15 = vsel %vm799_vm0, %v3768_v8, %v3769_v11 }
 0x7a4   : > { %3063 = vmatprep.mubr.f32.mxu1 %v2984_v15  ;;  %v3777_v57 = vpop.permute.xlu0 %3776  ;;  %v2983_v5 = vsel %vm799_vm0, %v3773_v10, %v3768_v8  ;;  %v2985_v27 = vsel %vm799_vm0, %v3769_v11, %v3774_v17 }
 0x7a5   : > { %v3779_v32 = vunpack.i.h.bf16 %v3777_v57  ;;  %v3778_v33 = vunpack.i.l.bf16 %v3777_v57  ;;  %v3782_v22 = vpop.permute.xlu1 %3781  ;;  %3064 = vmatmul.mubr.f32.vlgmr.msra.gmra.mrb[10].mxu1 %v2983_v5 }
 0x7a6   : > { %v3784_v41 = vunpack.i.h.bf16 %v3782_v22  ;;  %v3783_v14 = vunpack.i.l.bf16 %v3782_v22 }
 0x7a7   : > { %v2986_v35 = vsel %vm799_vm0, %v3774_v17, %v3778_v33 }
 0x7a8   : > { %v3787_v51 = vpop.permute.xlu0 %3786  ;;  %3138 = vmatprep.mubr.f32.mxu0 %v2986_v35  ;;  %v2988_v0 = vsel %vm799_vm0, %v3779_v32, %v3783_v14  ;;  %v2987_v29 = vsel %vm799_vm0, %v3784_v41, %v3779_v32 }
 0x7a9   : > { %v3789_v21 = vunpack.i.h.bf16 %v3787_v51  ;;  %v3788_v23 = vunpack.i.l.bf16 %v3787_v51  ;;  %3068 = vmatprep.mubr.f32.mxu1 %v2988_v0  ;;  %3139 = vmatmul.mubr.f32.vlgmr.msra.gmra.mrb[10].mxu0 %v2985_v27 }
 0x7aa   : > { %3069 = vmatmul.mubr.f32.gmra.mrb[12].mxu1 %v2987_v29 }
 0x7ab   : > { %v2990_v48 = vsel %vm799_vm0, %v3788_v23, %v3789_v21  ;;  %v2989_v3 = vsel %vm799_vm0, %v3783_v14, %v3788_v23 }
 0x7ac   : > { %3143 = vmatprep.mubr.f32.mxu0 %v2990_v48 }
 0x7ad   : > { %3144 = vmatmul.mubr.f32.gmra.mrb[12].mxu0 %v2989_v3 }
 0x878   : > { %v3409_v4 = vpop.f32.mrb[10].mxu1 }
 0x879   : > { %v3410_v2 = vpop.f32.mrb[11].mxu1 }
 0x87a   : > { %v3411_v54 = vadd.f32 %v3410_v2, %v3409_v4 }
 0x87c   : > { %v3447_v56 = vpop.f32.mrb[10].mxu0  ;;  %v3066_v47 = vadd.f32 %v3411_v54, %v3292_v26 }
 0x87d   : > { %v3412_v34 = vpop.f32.mrb[12].mxu1  ;;  %v3448_v61 = vpop.f32.mrb[11].mxu0 }
 0x87e   : > { %v3449_v16 = vadd.f32 %v3448_v61, %v3447_v56  ;;  %v3413_v63 = vpop.f32.mrb[13].mxu1 }
 0x87f   : > { %v3414_v60 = vadd.f32 %v3413_v63, %v3412_v34 }
 0x880   : > { %v3141_v55 = vadd.f32 %v3449_v16, %v3066_v47  ;;  %v3450_v19 = vpop.f32.mrb[12].mxu0 }
 0x881   : > { %v3071_v24 = vadd.f32 %v3414_v60, %v3292_v26  ;;  %v3451_v30 = vpop.f32.mrb[13].mxu0 }
 0x882   : > { %v3149_v42 = vadd.f32 %v3893_v9, %v3141_v55  ;;  %v3452_v31 = vadd.f32 %v3451_v30, %v3450_v19 }
 0x884   : > { %3151 = vst [vmem:[%s490_s21] sm:$0xff] %v3149_v42  ;;  %v3146_v25 = vadd.f32 %v3452_v31, %v3071_v24 }
 0x886   : > { %v3150_v7 = vadd.f32 %v3894_v39, %v3146_v25 }
 0x888   : > { %3152 = vst [vmem:[%s490_s21 + $0x8] sm:$0xff] %v3150_v7 }
 0x889   : > { %3964 = shalt.err (!%p3961_p11)
}
 0x88a   : > { %s3965_s19 = scalar_lea.hbm %s6279_s25, 256  ;;  %s3969_s21 = scalar_lea.hbm %s6663_s23, 512 }
 0x88b   : > { %p3966_p13 = scmp.ne.s32.totalorder %s6279_s25, %s3965_s19  ;;  %p3970_p6 = scmp.lt.u32.totalorder %s6279_s25, %s6663_s23 }
 0x88c   : > { %p3971_p9 = scmp.lt.u32.totalorder %s3969_s21, %s3965_s19  ;;  %p3973_p10 = scmp.lt.u32.totalorder %s3965_s19, %s6279_s25 }
 0x88d   : > { %p3967_p0 = pnand %p3966_p13, %p6664_p1 }
 0x88e   : > { %p3972_p12 = por %p3971_p9, %p3970_p6 }
 0x88f   : > { %p3968_p5 = pneg %p3967_p0 }
 0x890   : > { %p3974_p2 = por %p3973_p10, %p3972_p12 }
 0x892   : > { %p3975_p3 = pnand %p3974_p2, %p3968_p5 }
 0x894   : > { %3978 = shalt.err (!%p3975_p3)
}
 0x895   : > { %s4036_s16 = smov 128   ;;  %s4037_s22 = smov 8  }
 0x896   : > { %3691 = dma.vmem_to_hbm [thread:$0]  (%p6664_p1), %s6273_s26, 256, %s6279_s25, %s6281_s20, %s4036_s16, %s4036_s16, %s4037_s22  }
 0x897 PF: > { %s6665_s17 = sld [smem:[#allocation14_spill]]  ;;  %s6666_s28 = sld [smem:[#allocation12_spill]] }
 0x898   : > { %s6667_s14 = sld [smem:[#allocation18_spill]] }
 0x89d   : > { %p3708_p4 = scmp.ge.s32.totalorder %s6665_s17, 2  ;;  %s3182_s29 = sand.u32 1, %s6666_s28  }
 0x89e   : > { %p6668_p7 = scmp.ne.s32.totalorder %s6667_s14, 0  ;;  %s3183_s19 = scalar_lea.sflag [#allocation5], %s3182_s29 }
 0x8a0   : > { %p3701_p8 = pnand %p3708_p4, %p6668_p7 }
 0x8a2   : > { %4004 = dma.done.wait (!%p3701_p8), %s3183_s19, 256  }
 0x8a3   : > { %4006 = vsyncadd (!%p3701_p8), %s3183_s19, 4294967040  ;;  %s6669_s16 = sld [smem:[#allocation15_spill]]  ;;  %s6670_s15 = sld [smem:[#allocation13_spill]] }
 0x8a4   : > { %s6671_s21 = sld [smem:[#allocation16_spill]]  ;;  %s6672_s29 = smov %s4013_s30 }
 0x8a9   : > { %p26_p11 = scmp.ge.s32.totalorder %s6669_s16, 4   ;;  %s6673_s30 = smov %s6670_s15 }
 0x8aa   : > { %s6674_s15 = smov %s6671_s21 }
 0x8ab   :  { %28 = sbr.rel (!%p26_p11) target bundleno = 7 (0x7), region = 128 }
 0x8b2   :  { %3188 = vsyncpa [#allocation4], 1 }
 0x8b3   :  { %3190 = vsyncpa [#allocation4 + $0x1], 1 }
 0x8b4   :  { %3191 = vsyncpa [#allocation7], 1 }
 0x8b5   :  { %3192 = vsyncpa [#allocation5], 1 }
 0x8b6   :  { %3194 = vsyncpa [#allocation5 + $0x1], 1 }

</bundles_post_ra>
